<compile_context>
chip_gen: v6e
topology: v6e:2x2x1
jax: 0.10.0
libtpu: 0.0.40
codegen_flags: <defaults>
</compile_context>

<pallas_src>
import jax
import jax.numpy as jnp
from jax.experimental import pallas as pl
from jax.experimental.pallas import tpu as pltpu


def fusion_kernel(
    audio_ref,    # (TB, Da)  f32   VMEM
    video_ref,    # (TB, F, Di) f32 VMEM
    w_fa_ref,     # (1, Di)   f32   frame_attention.weight
    w_ft_ref,     # (Di, Do)  bf16  frame_transform.weight^T
    b_ft_ref,     # (1, Do)   f32
    w_at_ref,     # (Da, Do)  bf16  audio_transform.weight^T
    b_at_ref,     # (1, Do)   f32
    w_it_ref,     # (Di, Do)  bf16  image_transform.weight^T
    b_it_ref,     # (1, Do)   f32
    w_ca_ref,     # (2, Da)   f32   cross_modality_attention.weight[:, :Da]
    w_cv_ref,     # (2, Di)   f32   cross_modality_attention.weight[:, Da:]
    b_fa_ref,     # (1,)      SMEM  frame_attention.bias
    b_c_ref,      # (2,)      SMEM  cross_modality_attention.bias
    out_ref,      # (TB, Do)  f32
):
    TB, F, Di = video_ref.shape
    inv_f = 1.0 / F

    audio = audio_ref[...]                                   # (TB, Da) f32
    w_fa = w_fa_ref[...]                                     # (1, Di)
    b_fa = b_fa_ref[0]

    # --- pass 1: per-frame attention logits (never bind the full video) -------
    logits = []
    for f in range(F):
        vf = video_ref[:, f, :]                              # (TB, Di)
        logits.append(jnp.sum(vf * w_fa, axis=-1, keepdims=True) + b_fa)  # (TB,1)

    m = logits[0]
    for f in range(1, F):
        m = jnp.maximum(m, logits[f])
    es = [jnp.exp(l - m) for l in logits]                    # unnormalized softmax
    denom = es[0]
    for f in range(1, F):
        denom = denom + es[f]
    # Exact reciprocal: a (TB,1) divide is negligible and keeps the softmax /
    # bias algebra exact (sum of attention weights == 1).
    scale = inv_f / denom                                    # (TB, 1)

    # --- pass 2: pool frames BEFORE frame_transform (F-fold MXU reduction) ----
    v_pool = video_ref[:, 0, :] * es[0]
    for f in range(1, F):
        v_pool = v_pool + video_ref[:, f, :] * es[f]
    v_pool = v_pool * scale                                  # (TB, Di) == (1/F)·Σ att_f v_f

    video_t = (
        jnp.dot(v_pool.astype(w_ft_ref.dtype), w_ft_ref[...],
                preferred_element_type=jnp.float32)
        + b_ft_ref[...] * inv_f
    )                                                        # (TB, Do)

    # --- L2 normalize (torch F.normalize: p=2, dim=1, eps=1e-12) via EUP rsqrt -
    def l2norm(x):
        n2 = jnp.sum(x * x, axis=1, keepdims=True)
        return x * jax.lax.rsqrt(jnp.maximum(n2, 1e-24))

    audio_n = l2norm(audio)                                  # (TB, Da)
    video_n = l2norm(video_t)                                # (TB, Do)

    # --- cross-modality attention: Linear(Da+Do, 2) as two row-dot-products ----
    # (avoids a lane-width-2 output tile)
    w_ca = w_ca_ref[...]                                     # (2, Da)
    w_cv = w_cv_ref[...]                                     # (2, Do)
    s0 = (jnp.sum(audio_n * w_ca[0:1, :], axis=1, keepdims=True)
          + jnp.sum(video_n * w_cv[0:1, :], axis=1, keepdims=True)
          + b_c_ref[0])                                      # (TB, 1)
    s1 = (jnp.sum(audio_n * w_ca[1:2, :], axis=1, keepdims=True)
          + jnp.sum(video_n * w_cv[1:2, :], axis=1, keepdims=True)
          + b_c_ref[1])                                      # (TB, 1)
    mm = jnp.maximum(s0, s1)
    e0 = jnp.exp(s0 - mm)
    e1 = jnp.exp(s1 - mm)
    inv_z = 1.0 / (e0 + e1)
    a0 = e0 * inv_z                                          # (TB, 1)
    a1 = e1 * inv_z                                          # (TB, 1)

    # --- output projection: two accumulating MXU dots (no concat copy) --------
    fused = jnp.dot((audio_n * a0).astype(w_at_ref.dtype), w_at_ref[...],
                    preferred_element_type=jnp.float32)      # (TB, Do)
    fused = fused + jnp.dot((video_n * a1).astype(w_it_ref.dtype), w_it_ref[...],
                            preferred_element_type=jnp.float32)
    out_ref[...] = fused + a0 * b_at_ref[...] + a1 * b_it_ref[...]


def prepare_params(params, *, weight_dtype=jnp.bfloat16):
    """One-time parameter prep (run OUTSIDE the hot path / jit).

    Casts the three large matmul weights to bf16, halving the HBM weight bytes
    that dominate this HBM-bound kernel. Biases and the tiny attention weights
    stay f32.
    """
    p = dict(params)
    for k in ("w_ft", "w_at", "w_it"):
        p[k] = jnp.asarray(params[k], weight_dtype)
    return p


def small_net_soft_attention_fusion(audio, video, params, *, tb=None):
    B, F, Di = video.shape
    Da = audio.shape[1]
    Do = params["w_ft"].shape[1]
    assert params["w_ft"].shape[0] == Di, "frame_transform in_dim mismatch"
    assert params["w_it"].shape == (Di, Do), "image_transform shape mismatch"
    assert params["w_at"].shape == (Da, Do), "audio_transform shape mismatch"

    if tb is None:
        tb = B          # single grid step: everything fits in VMEM on v5e/v6e/v7x
    assert B % tb == 0
    steps = B // tb

    def weight_spec(shape):
        n = len(shape)
        idx = lambda i, n=n: (0,) * n
        if steps > 1:
            # Weights are grid-invariant: one buffer is enough (no pointless
            # double-buffer reservation when the batch is tiled).
            return pl.BlockSpec(shape, idx, pipeline_mode=pl.Buffered(1))
        return pl.BlockSpec(shape, idx)

    smem_spec = pl.BlockSpec(memory_space=pltpu.MemorySpace.SMEM)

    in_specs = [
        pl.BlockSpec((tb, Da), lambda i: (i, 0)),        # audio
        pl.BlockSpec((tb, F, Di), lambda i: (i, 0, 0)),  # video
        weight_spec((1, Di)),                            # w_fa
        weight_spec((Di, Do)),                           # w_ft (bf16)
        weight_spec((1, Do)),                            # b_ft
        weight_spec((Da, Do)),                           # w_at (bf16)
        weight_spec((1, Do)),                            # b_at
        weight_spec((Di, Do)),                           # w_it (bf16)
        weight_spec((1, Do)),                            # b_it
        weight_spec((2, Da)),                            # w_ca
        weight_spec((2, Di)),                            # w_cv
        smem_spec,                                       # b_fa (scalar)
        smem_spec,                                       # b_c  (2 scalars)
    ]
    out_spec = pl.BlockSpec((tb, Do), lambda i: (i, 0))

    return pl.pallas_call(
        fusion_kernel,
        out_shape=jax.ShapeDtypeStruct((B, Do), jnp.float32),
        grid_spec=pltpu.PrefetchScalarGridSpec(
            num_scalar_prefetch=0,
            grid=(steps,),
            in_specs=in_specs,
            out_specs=out_spec,
        ),
        # Single-step grid stays on one TensorCore (weight DMA dominates); if
        # the batch is tiled, output blocks are disjoint so the axis is safe to
        # split across v7x's two TensorCores.
        compiler_params=pltpu.CompilerParams(
            dimension_semantics=("arbitrary",) if steps == 1 else ("parallel",)),
    )(
        audio, video,
        params["w_fa"], params["w_ft"], params["b_ft"],
        params["w_at"], params["b_at"], params["w_it"], params["b_it"],
        params["w_ca"], params["w_cv"],
        params["b_fa"], params["b_c"],
    )


def reference(audio, video, p):
    """Pure-JAX reimplementation of the PyTorch forward, same param layout (f32)."""
    B, F, Di = video.shape
    flat = video.reshape(B * F, Di)
    scores = (flat @ p["w_fa"].T + p["b_fa"]).reshape(B, F)
    att = jax.nn.softmax(scores, axis=1)[:, :, None]
    transformed = (flat @ p["w_ft"] + p["b_ft"]).reshape(B, F, -1)
    pooled = jnp.mean(transformed * att, axis=1)

    def l2n(x):
        n = jnp.sqrt(jnp.sum(x * x, axis=1, keepdims=True))
        return x / jnp.maximum(n, 1e-12)

    a_n = l2n(audio)
    v_n = l2n(pooled)
    w_cross = jnp.concatenate([p["w_ca"], p["w_cv"]], axis=1)   # (2, Da+Di)
    logits = jnp.concatenate([a_n, v_n], axis=1) @ w_cross.T + p["b_c"]
    mm = jax.nn.softmax(logits, axis=1)
    a_emb = a_n @ p["w_at"] + p["b_at"]
    f_emb = v_n @ p["w_it"] + p["b_it"]
    return a_emb * mm[:, 0:1] + f_emb * mm[:, 1:2]


if __name__ == "__main__":
    B, F = 16, 8            # batch, frames
    Da = 128                # audio_dim
    Di = 512                # image_dim (hard-coded 512 in the torch forward)
    Do = 512                # out_dim

    key = jax.random.PRNGKey(0)
    ks = jax.random.split(key, 16)

    def uni(k, shape, fan_in):
        b = 1.0 / jnp.sqrt(jnp.float32(fan_in))
        return jax.random.uniform(k, shape, jnp.float32, -b, b)

    params = {
        "w_fa": uni(ks[0], (1, Di), Di),       # frame_attention.weight
        "b_fa": uni(ks[1], (1,), Di),          # frame_attention.bias
        "w_ft": uni(ks[2], (Di, Do), Di),      # frame_transform.weight^T
        "b_ft": uni(ks[3], (1, Do), Di),
        "w_at": uni(ks[4], (Da, Do), Da),      # audio_transform.weight^T
        "b_at": uni(ks[5], (1, Do), Da),
        "w_it": uni(ks[6], (Di, Do), Di),      # image_transform.weight^T
        "b_it": uni(ks[7], (1, Do), Di),
        "w_ca": uni(ks[8], (2, Da), Da + Di),  # cross attention weight (audio cols)
        "w_cv": uni(ks[9], (2, Di), Da + Di),  # cross attention weight (video cols)
        "b_c":  uni(ks[10], (2,), Da + Di),
    }

    audio = jax.random.normal(ks[11], (B, Da), jnp.float32)
    video = jax.random.normal(ks[12], (B, F, Di), jnp.float32)

    # One-time weight prep (bf16 for the large matmul weights) — not per call.
    prepped = prepare_params(params)

    out = small_net_soft_attention_fusion(audio, video, prepped)
    out = jax.block_until_ready(out)

    ref = reference(audio, video, params)
    assert out.shape == (B, Do), out.shape
    max_err = float(jnp.max(jnp.abs(out - ref)))
    assert jnp.allclose(out, ref, rtol=2e-3, atol=2e-3), f"max abs err {max_err}"

    print("KERNEL_OK")
</pallas_src>

<mosaic_0001>
module attributes {stable_mosaic.version = 11 : i64} {
  func.func @fusion_kernel(%arg0: i32, %arg1: memref<16x128xf32, #tpu.memory_space<vmem>>, %arg2: memref<16x8x512xf32, #tpu.memory_space<vmem>>, %arg3: memref<1x512xf32, #tpu.memory_space<vmem>>, %arg4: memref<512x512xbf16, #tpu.memory_space<vmem>>, %arg5: memref<1x512xf32, #tpu.memory_space<vmem>>, %arg6: memref<128x512xbf16, #tpu.memory_space<vmem>>, %arg7: memref<1x512xf32, #tpu.memory_space<vmem>>, %arg8: memref<512x512xbf16, #tpu.memory_space<vmem>>, %arg9: memref<1x512xf32, #tpu.memory_space<vmem>>, %arg10: memref<2x128xf32, #tpu.memory_space<vmem>>, %arg11: memref<2x512xf32, #tpu.memory_space<vmem>>, %arg12: memref<1xf32, #tpu.memory_space<smem>>, %arg13: memref<2xf32, #tpu.memory_space<smem>>, %arg14: memref<16x512xf32, #tpu.memory_space<vmem>>) attributes {dimension_semantics = [#tpu.dimension_semantics<arbitrary>], iteration_bounds = array<i64: 1>, scalar_prefetch = 0 : i64, scratch_operands = 0 : i64, tpu.core_type = #tpu.core_type<tc>, window_params = [{transform_indices = @transform_0, window_bounds = array<i64: 16, 128>}, {transform_indices = @transform_1, window_bounds = array<i64: 16, 8, 512>}, {pipeline_mode = #tpu.pipeline_mode<synchronous>, transform_indices = @transform_2, window_bounds = array<i64: 1, 512>}, {pipeline_mode = #tpu.pipeline_mode<synchronous>, transform_indices = @transform_3, window_bounds = array<i64: 512, 512>}, {pipeline_mode = #tpu.pipeline_mode<synchronous>, transform_indices = @transform_4, window_bounds = array<i64: 1, 512>}, {pipeline_mode = #tpu.pipeline_mode<synchronous>, transform_indices = @transform_5, window_bounds = array<i64: 128, 512>}, {pipeline_mode = #tpu.pipeline_mode<synchronous>, transform_indices = @transform_6, window_bounds = array<i64: 1, 512>}, {pipeline_mode = #tpu.pipeline_mode<synchronous>, transform_indices = @transform_7, window_bounds = array<i64: 512, 512>}, {pipeline_mode = #tpu.pipeline_mode<synchronous>, transform_indices = @transform_8, window_bounds = array<i64: 1, 512>}, {pipeline_mode = #tpu.pipeline_mode<synchronous>, transform_indices = @transform_9, window_bounds = array<i64: 2, 128>}, {pipeline_mode = #tpu.pipeline_mode<synchronous>, transform_indices = @transform_10, window_bounds = array<i64: 2, 512>}, {transform_indices = @transform_11, window_bounds = array<i64: 1>}, {transform_indices = @transform_12, window_bounds = array<i64: 2>}, {transform_indices = @transform_13, window_bounds = array<i64: 16, 512>}]} {
    %c0 = arith.constant 0 : index
    %c0_0 = arith.constant 0 : index
    %0 = vector.load %arg1[%c0, %c0_0] : memref<16x128xf32, #tpu.memory_space<vmem>>, vector<16x128xf32>
    %c0_1 = arith.constant 0 : index
    %c0_2 = arith.constant 0 : index
    %1 = vector.load %arg3[%c0_1, %c0_2] : memref<1x512xf32, #tpu.memory_space<vmem>>, vector<1x512xf32>
    %c0_3 = arith.constant 0 : index
    %2 = memref.load %arg12[%c0_3] : memref<1xf32, #tpu.memory_space<smem>>
    %c0_4 = arith.constant 0 : index
    %c0_5 = arith.constant 0 : index
    %c0_6 = arith.constant 0 : index
    %3 = vector.load %arg2[%c0_4, %c0_5, %c0_6] : memref<16x8x512xf32, #tpu.memory_space<vmem>>, vector<16x1x512xf32>
    %4 = vector.shape_cast %3 : vector<16x1x512xf32> to vector<16x512xf32>
    %5 = vector.broadcast %1 : vector<1x512xf32> to vector<16x512xf32>
    %6 = arith.mulf %4, %5 : vector<16x512xf32>
    %cst = arith.constant dense<0.000000e+00> : vector<16xf32>
    %7 = vector.multi_reduction <add>, %6, %cst [1] : vector<16x512xf32> to vector<16xf32>
    %8 = vector.shape_cast %7 : vector<16xf32> to vector<16x1xf32>
    %9 = vector.broadcast %2 : f32 to vector<16x1xf32>
    %10 = arith.addf %8, %9 : vector<16x1xf32>
    %c0_7 = arith.constant 0 : index
    %c1 = arith.constant 1 : index
    %c0_8 = arith.constant 0 : index
    %11 = vector.load %arg2[%c0_7, %c1, %c0_8] : memref<16x8x512xf32, #tpu.memory_space<vmem>>, vector<16x1x512xf32>
    %12 = vector.shape_cast %11 : vector<16x1x512xf32> to vector<16x512xf32>
    %13 = vector.broadcast %1 : vector<1x512xf32> to vector<16x512xf32>
    %14 = arith.mulf %12, %13 : vector<16x512xf32>
    %cst_9 = arith.constant dense<0.000000e+00> : vector<16xf32>
    %15 = vector.multi_reduction <add>, %14, %cst_9 [1] : vector<16x512xf32> to vector<16xf32>
    %16 = vector.shape_cast %15 : vector<16xf32> to vector<16x1xf32>
    %17 = vector.broadcast %2 : f32 to vector<16x1xf32>
    %18 = arith.addf %16, %17 : vector<16x1xf32>
    %c0_10 = arith.constant 0 : index
    %c2 = arith.constant 2 : index
    %c0_11 = arith.constant 0 : index
    %19 = vector.load %arg2[%c0_10, %c2, %c0_11] : memref<16x8x512xf32, #tpu.memory_space<vmem>>, vector<16x1x512xf32>
    %20 = vector.shape_cast %19 : vector<16x1x512xf32> to vector<16x512xf32>
    %21 = vector.broadcast %1 : vector<1x512xf32> to vector<16x512xf32>
    %22 = arith.mulf %20, %21 : vector<16x512xf32>
    %cst_12 = arith.constant dense<0.000000e+00> : vector<16xf32>
    %23 = vector.multi_reduction <add>, %22, %cst_12 [1] : vector<16x512xf32> to vector<16xf32>
    %24 = vector.shape_cast %23 : vector<16xf32> to vector<16x1xf32>
    %25 = vector.broadcast %2 : f32 to vector<16x1xf32>
    %26 = arith.addf %24, %25 : vector<16x1xf32>
    %c0_13 = arith.constant 0 : index
    %c3 = arith.constant 3 : index
    %c0_14 = arith.constant 0 : index
    %27 = vector.load %arg2[%c0_13, %c3, %c0_14] : memref<16x8x512xf32, #tpu.memory_space<vmem>>, vector<16x1x512xf32>
    %28 = vector.shape_cast %27 : vector<16x1x512xf32> to vector<16x512xf32>
    %29 = vector.broadcast %1 : vector<1x512xf32> to vector<16x512xf32>
    %30 = arith.mulf %28, %29 : vector<16x512xf32>
    %cst_15 = arith.constant dense<0.000000e+00> : vector<16xf32>
    %31 = vector.multi_reduction <add>, %30, %cst_15 [1] : vector<16x512xf32> to vector<16xf32>
    %32 = vector.shape_cast %31 : vector<16xf32> to vector<16x1xf32>
    %33 = vector.broadcast %2 : f32 to vector<16x1xf32>
    %34 = arith.addf %32, %33 : vector<16x1xf32>
    %c0_16 = arith.constant 0 : index
    %c4 = arith.constant 4 : index
    %c0_17 = arith.constant 0 : index
    %35 = vector.load %arg2[%c0_16, %c4, %c0_17] : memref<16x8x512xf32, #tpu.memory_space<vmem>>, vector<16x1x512xf32>
    %36 = vector.shape_cast %35 : vector<16x1x512xf32> to vector<16x512xf32>
    %37 = vector.broadcast %1 : vector<1x512xf32> to vector<16x512xf32>
    %38 = arith.mulf %36, %37 : vector<16x512xf32>
    %cst_18 = arith.constant dense<0.000000e+00> : vector<16xf32>
    %39 = vector.multi_reduction <add>, %38, %cst_18 [1] : vector<16x512xf32> to vector<16xf32>
    %40 = vector.shape_cast %39 : vector<16xf32> to vector<16x1xf32>
    %41 = vector.broadcast %2 : f32 to vector<16x1xf32>
    %42 = arith.addf %40, %41 : vector<16x1xf32>
    %c0_19 = arith.constant 0 : index
    %c5 = arith.constant 5 : index
    %c0_20 = arith.constant 0 : index
    %43 = vector.load %arg2[%c0_19, %c5, %c0_20] : memref<16x8x512xf32, #tpu.memory_space<vmem>>, vector<16x1x512xf32>
    %44 = vector.shape_cast %43 : vector<16x1x512xf32> to vector<16x512xf32>
    %45 = vector.broadcast %1 : vector<1x512xf32> to vector<16x512xf32>
    %46 = arith.mulf %44, %45 : vector<16x512xf32>
    %cst_21 = arith.constant dense<0.000000e+00> : vector<16xf32>
    %47 = vector.multi_reduction <add>, %46, %cst_21 [1] : vector<16x512xf32> to vector<16xf32>
    %48 = vector.shape_cast %47 : vector<16xf32> to vector<16x1xf32>
    %49 = vector.broadcast %2 : f32 to vector<16x1xf32>
    %50 = arith.addf %48, %49 : vector<16x1xf32>
    %c0_22 = arith.constant 0 : index
    %c6 = arith.constant 6 : index
    %c0_23 = arith.constant 0 : index
    %51 = vector.load %arg2[%c0_22, %c6, %c0_23] : memref<16x8x512xf32, #tpu.memory_space<vmem>>, vector<16x1x512xf32>
    %52 = vector.shape_cast %51 : vector<16x1x512xf32> to vector<16x512xf32>
    %53 = vector.broadcast %1 : vector<1x512xf32> to vector<16x512xf32>
    %54 = arith.mulf %52, %53 : vector<16x512xf32>
    %cst_24 = arith.constant dense<0.000000e+00> : vector<16xf32>
    %55 = vector.multi_reduction <add>, %54, %cst_24 [1] : vector<16x512xf32> to vector<16xf32>
    %56 = vector.shape_cast %55 : vector<16xf32> to vector<16x1xf32>
    %57 = vector.broadcast %2 : f32 to vector<16x1xf32>
    %58 = arith.addf %56, %57 : vector<16x1xf32>
    %c0_25 = arith.constant 0 : index
    %c7 = arith.constant 7 : index
    %c0_26 = arith.constant 0 : index
    %59 = vector.load %arg2[%c0_25, %c7, %c0_26] : memref<16x8x512xf32, #tpu.memory_space<vmem>>, vector<16x1x512xf32>
    %60 = vector.shape_cast %59 : vector<16x1x512xf32> to vector<16x512xf32>
    %61 = vector.broadcast %1 : vector<1x512xf32> to vector<16x512xf32>
    %62 = arith.mulf %60, %61 : vector<16x512xf32>
    %cst_27 = arith.constant dense<0.000000e+00> : vector<16xf32>
    %63 = vector.multi_reduction <add>, %62, %cst_27 [1] : vector<16x512xf32> to vector<16xf32>
    %64 = vector.shape_cast %63 : vector<16xf32> to vector<16x1xf32>
    %65 = vector.broadcast %2 : f32 to vector<16x1xf32>
    %66 = arith.addf %64, %65 : vector<16x1xf32>
    %67 = arith.maximumf %10, %18 : vector<16x1xf32>
    %68 = arith.maximumf %67, %26 : vector<16x1xf32>
    %69 = arith.maximumf %68, %34 : vector<16x1xf32>
    %70 = arith.maximumf %69, %42 : vector<16x1xf32>
    %71 = arith.maximumf %70, %50 : vector<16x1xf32>
    %72 = arith.maximumf %71, %58 : vector<16x1xf32>
    %73 = arith.maximumf %72, %66 : vector<16x1xf32>
    %74 = arith.subf %10, %73 : vector<16x1xf32>
    %75 = math.exp %74 : vector<16x1xf32>
    %76 = arith.subf %18, %73 : vector<16x1xf32>
    %77 = math.exp %76 : vector<16x1xf32>
    %78 = arith.subf %26, %73 : vector<16x1xf32>
    %79 = math.exp %78 : vector<16x1xf32>
    %80 = arith.subf %34, %73 : vector<16x1xf32>
    %81 = math.exp %80 : vector<16x1xf32>
    %82 = arith.subf %42, %73 : vector<16x1xf32>
    %83 = math.exp %82 : vector<16x1xf32>
    %84 = arith.subf %50, %73 : vector<16x1xf32>
    %85 = math.exp %84 : vector<16x1xf32>
    %86 = arith.subf %58, %73 : vector<16x1xf32>
    %87 = math.exp %86 : vector<16x1xf32>
    %88 = arith.subf %66, %73 : vector<16x1xf32>
    %89 = math.exp %88 : vector<16x1xf32>
    %90 = arith.addf %75, %77 : vector<16x1xf32>
    %91 = arith.addf %90, %79 : vector<16x1xf32>
    %92 = arith.addf %91, %81 : vector<16x1xf32>
    %93 = arith.addf %92, %83 : vector<16x1xf32>
    %94 = arith.addf %93, %85 : vector<16x1xf32>
    %95 = arith.addf %94, %87 : vector<16x1xf32>
    %96 = arith.addf %95, %89 : vector<16x1xf32>
    %cst_28 = arith.constant 1.250000e-01 : f32
    %97 = vector.broadcast %cst_28 : f32 to vector<16x1xf32>
    %98 = arith.divf %97, %96 : vector<16x1xf32>
    %c0_29 = arith.constant 0 : index
    %c0_30 = arith.constant 0 : index
    %c0_31 = arith.constant 0 : index
    %99 = vector.load %arg2[%c0_29, %c0_30, %c0_31] : memref<16x8x512xf32, #tpu.memory_space<vmem>>, vector<16x1x512xf32>
    %100 = vector.shape_cast %99 : vector<16x1x512xf32> to vector<16x512xf32>
    %101 = vector.broadcast %75 : vector<16x1xf32> to vector<16x512xf32>
    %102 = arith.mulf %100, %101 : vector<16x512xf32>
    %c0_32 = arith.constant 0 : index
    %c1_33 = arith.constant 1 : index
    %c0_34 = arith.constant 0 : index
    %103 = vector.load %arg2[%c0_32, %c1_33, %c0_34] : memref<16x8x512xf32, #tpu.memory_space<vmem>>, vector<16x1x512xf32>
    %104 = vector.shape_cast %103 : vector<16x1x512xf32> to vector<16x512xf32>
    %105 = vector.broadcast %77 : vector<16x1xf32> to vector<16x512xf32>
    %106 = arith.mulf %104, %105 : vector<16x512xf32>
    %107 = arith.addf %102, %106 : vector<16x512xf32>
    %c0_35 = arith.constant 0 : index
    %c2_36 = arith.constant 2 : index
    %c0_37 = arith.constant 0 : index
    %108 = vector.load %arg2[%c0_35, %c2_36, %c0_37] : memref<16x8x512xf32, #tpu.memory_space<vmem>>, vector<16x1x512xf32>
    %109 = vector.shape_cast %108 : vector<16x1x512xf32> to vector<16x512xf32>
    %110 = vector.broadcast %79 : vector<16x1xf32> to vector<16x512xf32>
    %111 = arith.mulf %109, %110 : vector<16x512xf32>
    %112 = arith.addf %107, %111 : vector<16x512xf32>
    %c0_38 = arith.constant 0 : index
    %c3_39 = arith.constant 3 : index
    %c0_40 = arith.constant 0 : index
    %113 = vector.load %arg2[%c0_38, %c3_39, %c0_40] : memref<16x8x512xf32, #tpu.memory_space<vmem>>, vector<16x1x512xf32>
    %114 = vector.shape_cast %113 : vector<16x1x512xf32> to vector<16x512xf32>
    %115 = vector.broadcast %81 : vector<16x1xf32> to vector<16x512xf32>
    %116 = arith.mulf %114, %115 : vector<16x512xf32>
    %117 = arith.addf %112, %116 : vector<16x512xf32>
    %c0_41 = arith.constant 0 : index
    %c4_42 = arith.constant 4 : index
    %c0_43 = arith.constant 0 : index
    %118 = vector.load %arg2[%c0_41, %c4_42, %c0_43] : memref<16x8x512xf32, #tpu.memory_space<vmem>>, vector<16x1x512xf32>
    %119 = vector.shape_cast %118 : vector<16x1x512xf32> to vector<16x512xf32>
    %120 = vector.broadcast %83 : vector<16x1xf32> to vector<16x512xf32>
    %121 = arith.mulf %119, %120 : vector<16x512xf32>
    %122 = arith.addf %117, %121 : vector<16x512xf32>
    %c0_44 = arith.constant 0 : index
    %c5_45 = arith.constant 5 : index
    %c0_46 = arith.constant 0 : index
    %123 = vector.load %arg2[%c0_44, %c5_45, %c0_46] : memref<16x8x512xf32, #tpu.memory_space<vmem>>, vector<16x1x512xf32>
    %124 = vector.shape_cast %123 : vector<16x1x512xf32> to vector<16x512xf32>
    %125 = vector.broadcast %85 : vector<16x1xf32> to vector<16x512xf32>
    %126 = arith.mulf %124, %125 : vector<16x512xf32>
    %127 = arith.addf %122, %126 : vector<16x512xf32>
    %c0_47 = arith.constant 0 : index
    %c6_48 = arith.constant 6 : index
    %c0_49 = arith.constant 0 : index
    %128 = vector.load %arg2[%c0_47, %c6_48, %c0_49] : memref<16x8x512xf32, #tpu.memory_space<vmem>>, vector<16x1x512xf32>
    %129 = vector.shape_cast %128 : vector<16x1x512xf32> to vector<16x512xf32>
    %130 = vector.broadcast %87 : vector<16x1xf32> to vector<16x512xf32>
    %131 = arith.mulf %129, %130 : vector<16x512xf32>
    %132 = arith.addf %127, %131 : vector<16x512xf32>
    %c0_50 = arith.constant 0 : index
    %c7_51 = arith.constant 7 : index
    %c0_52 = arith.constant 0 : index
    %133 = vector.load %arg2[%c0_50, %c7_51, %c0_52] : memref<16x8x512xf32, #tpu.memory_space<vmem>>, vector<16x1x512xf32>
    %134 = vector.shape_cast %133 : vector<16x1x512xf32> to vector<16x512xf32>
    %135 = vector.broadcast %89 : vector<16x1xf32> to vector<16x512xf32>
    %136 = arith.mulf %134, %135 : vector<16x512xf32>
    %137 = arith.addf %132, %136 : vector<16x512xf32>
    %138 = vector.broadcast %98 : vector<16x1xf32> to vector<16x512xf32>
    %139 = arith.mulf %137, %138 : vector<16x512xf32>
    %140 = arith.truncf %139 : vector<16x512xf32> to vector<16x512xbf16>
    %c0_53 = arith.constant 0 : index
    %c0_54 = arith.constant 0 : index
    %141 = vector.load %arg4[%c0_53, %c0_54] : memref<512x512xbf16, #tpu.memory_space<vmem>>, vector<512x512xbf16>
    %cst_55 = arith.constant dense<0.000000e+00> : vector<16x512xf32>
    %142 = tpu.matmul %140, %141, %cst_55 {dimension_numbers = #tpu.dot_dimension_numbers<[1], [0], [0], [1], [0, 0, 1, 1], [], []>} : vector<16x512xbf16>, vector<512x512xbf16>, vector<16x512xf32> -> vector<16x512xf32>
    %c0_56 = arith.constant 0 : index
    %c0_57 = arith.constant 0 : index
    %143 = vector.load %arg5[%c0_56, %c0_57] : memref<1x512xf32, #tpu.memory_space<vmem>>, vector<1x512xf32>
    %cst_58 = arith.constant 1.250000e-01 : f32
    %144 = vector.broadcast %cst_58 : f32 to vector<1x512xf32>
    %145 = arith.mulf %143, %144 : vector<1x512xf32>
    %146 = vector.broadcast %145 : vector<1x512xf32> to vector<16x512xf32>
    %147 = arith.addf %142, %146 : vector<16x512xf32>
    %148 = arith.mulf %0, %0 : vector<16x128xf32>
    %cst_59 = arith.constant dense<0.000000e+00> : vector<16xf32>
    %149 = vector.multi_reduction <add>, %148, %cst_59 [1] : vector<16x128xf32> to vector<16xf32>
    %150 = vector.shape_cast %149 : vector<16xf32> to vector<16x1xf32>
    %cst_60 = arith.constant 1.000000e-24 : f32
    %151 = vector.broadcast %cst_60 : f32 to vector<16x1xf32>
    %152 = arith.maximumf %150, %151 : vector<16x1xf32>
    %153 = math.rsqrt %152 : vector<16x1xf32>
    %154 = vector.broadcast %153 : vector<16x1xf32> to vector<16x128xf32>
    %155 = arith.mulf %0, %154 : vector<16x128xf32>
    %156 = arith.mulf %147, %147 : vector<16x512xf32>
    %cst_61 = arith.constant dense<0.000000e+00> : vector<16xf32>
    %157 = vector.multi_reduction <add>, %156, %cst_61 [1] : vector<16x512xf32> to vector<16xf32>
    %158 = vector.shape_cast %157 : vector<16xf32> to vector<16x1xf32>
    %cst_62 = arith.constant 1.000000e-24 : f32
    %159 = vector.broadcast %cst_62 : f32 to vector<16x1xf32>
    %160 = arith.maximumf %158, %159 : vector<16x1xf32>
    %161 = math.rsqrt %160 : vector<16x1xf32>
    %162 = vector.broadcast %161 : vector<16x1xf32> to vector<16x512xf32>
    %163 = arith.mulf %147, %162 : vector<16x512xf32>
    %c0_63 = arith.constant 0 : index
    %c0_64 = arith.constant 0 : index
    %164 = vector.load %arg10[%c0_63, %c0_64] : memref<2x128xf32, #tpu.memory_space<vmem>>, vector<2x128xf32>
    %c0_65 = arith.constant 0 : index
    %c0_66 = arith.constant 0 : index
    %165 = vector.load %arg11[%c0_65, %c0_66] : memref<2x512xf32, #tpu.memory_space<vmem>>, vector<2x512xf32>
    %166 = vector.extract_strided_slice %164 {offsets = [0, 0], sizes = [1, 128], strides = [1, 1]} : vector<2x128xf32> to vector<1x128xf32>
    %167 = vector.broadcast %166 : vector<1x128xf32> to vector<16x128xf32>
    %168 = arith.mulf %155, %167 : vector<16x128xf32>
    %cst_67 = arith.constant dense<0.000000e+00> : vector<16xf32>
    %169 = vector.multi_reduction <add>, %168, %cst_67 [1] : vector<16x128xf32> to vector<16xf32>
    %170 = vector.shape_cast %169 : vector<16xf32> to vector<16x1xf32>
    %171 = vector.extract_strided_slice %165 {offsets = [0, 0], sizes = [1, 512], strides = [1, 1]} : vector<2x512xf32> to vector<1x512xf32>
    %172 = vector.broadcast %171 : vector<1x512xf32> to vector<16x512xf32>
    %173 = arith.mulf %163, %172 : vector<16x512xf32>
    %cst_68 = arith.constant dense<0.000000e+00> : vector<16xf32>
    %174 = vector.multi_reduction <add>, %173, %cst_68 [1] : vector<16x512xf32> to vector<16xf32>
    %175 = vector.shape_cast %174 : vector<16xf32> to vector<16x1xf32>
    %176 = arith.addf %170, %175 : vector<16x1xf32>
    %c0_69 = arith.constant 0 : index
    %177 = memref.load %arg13[%c0_69] : memref<2xf32, #tpu.memory_space<smem>>
    %178 = vector.broadcast %177 : f32 to vector<16x1xf32>
    %179 = arith.addf %176, %178 : vector<16x1xf32>
    %180 = vector.extract_strided_slice %164 {offsets = [1, 0], sizes = [1, 128], strides = [1, 1]} : vector<2x128xf32> to vector<1x128xf32>
    %181 = vector.broadcast %180 : vector<1x128xf32> to vector<16x128xf32>
    %182 = arith.mulf %155, %181 : vector<16x128xf32>
    %cst_70 = arith.constant dense<0.000000e+00> : vector<16xf32>
    %183 = vector.multi_reduction <add>, %182, %cst_70 [1] : vector<16x128xf32> to vector<16xf32>
    %184 = vector.shape_cast %183 : vector<16xf32> to vector<16x1xf32>
    %185 = vector.extract_strided_slice %165 {offsets = [1, 0], sizes = [1, 512], strides = [1, 1]} : vector<2x512xf32> to vector<1x512xf32>
    %186 = vector.broadcast %185 : vector<1x512xf32> to vector<16x512xf32>
    %187 = arith.mulf %163, %186 : vector<16x512xf32>
    %cst_71 = arith.constant dense<0.000000e+00> : vector<16xf32>
    %188 = vector.multi_reduction <add>, %187, %cst_71 [1] : vector<16x512xf32> to vector<16xf32>
    %189 = vector.shape_cast %188 : vector<16xf32> to vector<16x1xf32>
    %190 = arith.addf %184, %189 : vector<16x1xf32>
    %c1_72 = arith.constant 1 : index
    %191 = memref.load %arg13[%c1_72] : memref<2xf32, #tpu.memory_space<smem>>
    %192 = vector.broadcast %191 : f32 to vector<16x1xf32>
    %193 = arith.addf %190, %192 : vector<16x1xf32>
    %194 = arith.maximumf %179, %193 : vector<16x1xf32>
    %195 = arith.subf %179, %194 : vector<16x1xf32>
    %196 = math.exp %195 : vector<16x1xf32>
    %197 = arith.subf %193, %194 : vector<16x1xf32>
    %198 = math.exp %197 : vector<16x1xf32>
    %199 = arith.addf %196, %198 : vector<16x1xf32>
    %cst_73 = arith.constant 1.000000e+00 : f32
    %200 = vector.broadcast %cst_73 : f32 to vector<16x1xf32>
    %201 = arith.divf %200, %199 : vector<16x1xf32>
    %202 = arith.mulf %196, %201 : vector<16x1xf32>
    %203 = arith.mulf %198, %201 : vector<16x1xf32>
    %204 = vector.broadcast %202 : vector<16x1xf32> to vector<16x128xf32>
    %205 = arith.mulf %155, %204 : vector<16x128xf32>
    %206 = arith.truncf %205 : vector<16x128xf32> to vector<16x128xbf16>
    %c0_74 = arith.constant 0 : index
    %c0_75 = arith.constant 0 : index
    %207 = vector.load %arg6[%c0_74, %c0_75] : memref<128x512xbf16, #tpu.memory_space<vmem>>, vector<128x512xbf16>
    %cst_76 = arith.constant dense<0.000000e+00> : vector<16x512xf32>
    %208 = tpu.matmul %206, %207, %cst_76 {dimension_numbers = #tpu.dot_dimension_numbers<[1], [0], [0], [1], [0, 0, 1, 1], [], []>} : vector<16x128xbf16>, vector<128x512xbf16>, vector<16x512xf32> -> vector<16x512xf32>
    %209 = vector.broadcast %203 : vector<16x1xf32> to vector<16x512xf32>
    %210 = arith.mulf %163, %209 : vector<16x512xf32>
    %211 = arith.truncf %210 : vector<16x512xf32> to vector<16x512xbf16>
    %c0_77 = arith.constant 0 : index
    %c0_78 = arith.constant 0 : index
    %212 = vector.load %arg8[%c0_77, %c0_78] : memref<512x512xbf16, #tpu.memory_space<vmem>>, vector<512x512xbf16>
    %cst_79 = arith.constant dense<0.000000e+00> : vector<16x512xf32>
    %213 = tpu.matmul %211, %212, %cst_79 {dimension_numbers = #tpu.dot_dimension_numbers<[1], [0], [0], [1], [0, 0, 1, 1], [], []>} : vector<16x512xbf16>, vector<512x512xbf16>, vector<16x512xf32> -> vector<16x512xf32>
    %214 = arith.addf %208, %213 : vector<16x512xf32>
    %c0_80 = arith.constant 0 : index
    %c0_81 = arith.constant 0 : index
    %215 = vector.load %arg7[%c0_80, %c0_81] : memref<1x512xf32, #tpu.memory_space<vmem>>, vector<1x512xf32>
    %216 = vector.broadcast %202 : vector<16x1xf32> to vector<16x512xf32>
    %217 = vector.broadcast %215 : vector<1x512xf32> to vector<16x512xf32>
    %218 = arith.mulf %216, %217 : vector<16x512xf32>
    %219 = arith.addf %214, %218 : vector<16x512xf32>
    %c0_82 = arith.constant 0 : index
    %c0_83 = arith.constant 0 : index
    %220 = vector.load %arg9[%c0_82, %c0_83] : memref<1x512xf32, #tpu.memory_space<vmem>>, vector<1x512xf32>
    %221 = vector.broadcast %203 : vector<16x1xf32> to vector<16x512xf32>
    %222 = vector.broadcast %220 : vector<1x512xf32> to vector<16x512xf32>
    %223 = arith.mulf %221, %222 : vector<16x512xf32>
    %224 = arith.addf %219, %223 : vector<16x512xf32>
    %c0_84 = arith.constant 0 : index
    %c0_85 = arith.constant 0 : index
    %225 = vector.load %arg14[%c0_84, %c0_85] : memref<16x512xf32, #tpu.memory_space<vmem>>, vector<16x512xf32>
    tpu.vector_store %arg14[%c0_84, %c0_85], %224 {strides = array<i32>} : memref<16x512xf32, #tpu.memory_space<vmem>>, vector<16x512xf32>,
    return
  }
  func.func @transform_0(%arg0: i32) -> (i32, i32) {
    %c0_i32 = arith.constant 0 : i32
    %c0_i32_0 = arith.constant 0 : i32
    return %arg0, %c0_i32 : i32, i32
  }
  func.func @transform_1(%arg0: i32) -> (i32, i32, i32) {
    %c0_i32 = arith.constant 0 : i32
    %c0_i32_0 = arith.constant 0 : i32
    %c0_i32_1 = arith.constant 0 : i32
    return %arg0, %c0_i32, %c0_i32_0 : i32, i32, i32
  }
  func.func @transform_2(%arg0: i32) -> (i32, i32) {
    %c0_i32 = arith.constant 0 : i32
    %c0_i32_0 = arith.constant 0 : i32
    %c0_i32_1 = arith.constant 0 : i32
    return %c0_i32, %c0_i32_0 : i32, i32
  }
  func.func @transform_3(%arg0: i32) -> (i32, i32) {
    %c0_i32 = arith.constant 0 : i32
    %c0_i32_0 = arith.constant 0 : i32
    %c0_i32_1 = arith.constant 0 : i32
    return %c0_i32, %c0_i32_0 : i32, i32
  }
  func.func @transform_4(%arg0: i32) -> (i32, i32) {
    %c0_i32 = arith.constant 0 : i32
    %c0_i32_0 = arith.constant 0 : i32
    %c0_i32_1 = arith.constant 0 : i32
    return %c0_i32, %c0_i32_0 : i32, i32
  }
  func.func @transform_5(%arg0: i32) -> (i32, i32) {
    %c0_i32 = arith.constant 0 : i32
    %c0_i32_0 = arith.constant 0 : i32
    %c0_i32_1 = arith.constant 0 : i32
    return %c0_i32, %c0_i32_0 : i32, i32
  }
  func.func @transform_6(%arg0: i32) -> (i32, i32) {
    %c0_i32 = arith.constant 0 : i32
    %c0_i32_0 = arith.constant 0 : i32
    %c0_i32_1 = arith.constant 0 : i32
    return %c0_i32, %c0_i32_0 : i32, i32
  }
  func.func @transform_7(%arg0: i32) -> (i32, i32) {
    %c0_i32 = arith.constant 0 : i32
    %c0_i32_0 = arith.constant 0 : i32
    %c0_i32_1 = arith.constant 0 : i32
    return %c0_i32, %c0_i32_0 : i32, i32
  }
  func.func @transform_8(%arg0: i32) -> (i32, i32) {
    %c0_i32 = arith.constant 0 : i32
    %c0_i32_0 = arith.constant 0 : i32
    %c0_i32_1 = arith.constant 0 : i32
    return %c0_i32, %c0_i32_0 : i32, i32
  }
  func.func @transform_9(%arg0: i32) -> (i32, i32) {
    %c0_i32 = arith.constant 0 : i32
    %c0_i32_0 = arith.constant 0 : i32
    %c0_i32_1 = arith.constant 0 : i32
    return %c0_i32, %c0_i32_0 : i32, i32
  }
  func.func @transform_10(%arg0: i32) -> (i32, i32) {
    %c0_i32 = arith.constant 0 : i32
    %c0_i32_0 = arith.constant 0 : i32
    %c0_i32_1 = arith.constant 0 : i32
    return %c0_i32, %c0_i32_0 : i32, i32
  }
  func.func @transform_11(%arg0: i32) -> i32 {
    %c0_i32 = arith.constant 0 : i32
    %c0_i32_0 = arith.constant 0 : i32
    return %c0_i32 : i32
  }
  func.func @transform_12(%arg0: i32) -> i32 {
    %c0_i32 = arith.constant 0 : i32
    %c0_i32_0 = arith.constant 0 : i32
    return %c0_i32 : i32
  }
  func.func @transform_13(%arg0: i32) -> (i32, i32) {
    %c0_i32 = arith.constant 0 : i32
    %c0_i32_0 = arith.constant 0 : i32
    return %arg0, %c0_i32 : i32, i32
  }
}

</mosaic_0001>

<bundles_post_ra>
// kernel: tpu_custom_call.1
= control target key start
LH: loop header
LB: loop body
LE: loop exit
PB: predicated region body
PF: predicated region fallthrough
CT: control target
= control target key end

     0   :  { %19 = vsyncpa [#allocation4], 0  ;;  %s8881_s0 = inlined_call_operand.hbm [shape: f32[16,128], index: 0, kind: input, shape index: {}]   ;;  %s8882_s1 = inlined_call_operand.hbm [shape: f32[16,8,512], index: 1, kind: input, shape index: {}]   ;;  %s8883_s2 = inlined_call_operand.vmem [shape: f32[1,512], index: 2, kind: input, shape index: {}]   ;;  %s8884_s3 = inlined_call_operand.hbm [shape: bf16[512,512], index: 3, kind: input, shape index: {}]   ;;  %s8885_s4 = inlined_call_operand.vmem [shape: f32[1,512], index: 4, kind: input, shape index: {}]   ;;  %s8886_s5 = inlined_call_operand.hbm [shape: bf16[128,512], index: 5, kind: input, shape index: {}]   ;;  %s8887_s6 = inlined_call_operand.hbm [shape: f32[1,512], index: 6, kind: input, shape index: {}]   ;;  %s8888_s7 = inlined_call_operand.hbm [shape: bf16[512,512], index: 7, kind: input, shape index: {}]   ;;  %s8889_s8 = inlined_call_operand.hbm [shape: f32[1,512], index: 8, kind: input, shape index: {}]   ;;  %s8890_s9 = inlined_call_operand.vmem [shape: f32[2,128], index: 9, kind: input, shape index: {}]   ;;  %s8891_s10 = inlined_call_operand.vmem [shape: f32[2,512], index: 10, kind: input, shape index: {}]   ;;  %s8892_s11 = inlined_call_operand.<no memory space> [shape: f32[1], index: 11, kind: input, shape index: {}]   ;;  %s8893_s12 = inlined_call_operand.vmem [shape: f32[2], index: 12, kind: input, shape index: {}]   ;;  %s8894_s13 = inlined_call_operand.hbm [shape: f32[16,512], index: 13, kind: output, shape index: {}]  }
   0x1   :  { %20 = vsyncpa [#allocation8], 0 }
   0x2   :  { %21 = vsyncpa [#allocation11], 0 }
   0x3   :  { %22 = vsyncpa [#allocation14], 0 }
   0x4   :  { %23 = vsyncpa [#allocation6], 0 }
   0x5   :  { %24 = vsyncpa [#allocation5], 0  ;;  %s7353_s25 = smov [#allocation7]  }
   0x6   :  { %s42_s26 = sshll.u32 %s7353_s25, 4  ;;  %s43_s26 = int_to_ptr.vmem [resolvable:$true] %s42_s26 }
   0x7   :  { %s7177_s27 = scalar_lea.vmem %s43_s26, 8192  ;;  %p7182_p1 = scmp.lt.s32.totalorder %s43_s26, %s43_s26 }
   0x8   :  { %p7178_p0 = scmp.ne.s32.totalorder %s43_s26, %s7177_s27  ;;  %p7183_p2 = scmp.lt.s32.totalorder %s7177_s27, %s7177_s27 }
   0xa   :  { %p7184_p3 = por %p7183_p2, %p7182_p1 }
   0xc   :  { %p7185_p4 = pnand %p7184_p3, %p7178_p0 }
   0xe   :  { %7188 = shalt.err (!%p7185_p4)
}
   0xf   :  { %s7354_s28 = smov 512   ;;  %s7355_s29 = smov 32  }
  0x10   :  { %48 = dma.hbm_to_vmem [thread:$0]  %s8882_s1, 8192, %s43_s26, [#allocation8], %s7354_s28, %s7354_s28, %s7355_s29  }
  0x11   :  { %s7356_s15 = smov [#allocation10]   ;;  %s7357_s17 = smov [#allocation13]  }
  0x12   :  { %s70_s16 = sshll.u32 %s7356_s15, 4  ;;  %s92_s18 = sshll.u32 %s7357_s17, 4  ;;  %s71_s16 = int_to_ptr.vmem [resolvable:$true] %s70_s16  ;;  %s93_s18 = int_to_ptr.vmem [resolvable:$true] %s92_s18 }
  0x13   :  { %s7197_s19 = scalar_lea.vmem %s71_s16, 4096  ;;  %p7202_p6 = scmp.lt.s32.totalorder %s71_s16, %s71_s16 }
  0x14   :  { %p7198_p5 = scmp.ne.s32.totalorder %s71_s16, %s7197_s19  ;;  %p7203_p7 = scmp.lt.s32.totalorder %s7197_s19, %s7197_s19 }
  0x16   :  { %p7204_p8 = por %p7203_p7, %p7202_p6 }
  0x18   :  { %p7205_p9 = pnand %p7204_p8, %p7198_p5 }
  0x1a   :  { %7208 = shalt.err (!%p7205_p9)
}
  0x1b   :  { %s7358_s20 = smov 256   ;;  %s7359_s21 = smov 16  }
  0x1c   :  { %76 = dma.hbm_to_vmem [thread:$0]  %s8886_s5, 4096, %s71_s16, [#allocation11], %s7358_s20, %s7358_s20, %s7359_s21  }
  0x1d   :  { %s7217_s1 = scalar_lea.vmem %s93_s18, 16384  ;;  %p7222_p11 = scmp.lt.s32.totalorder %s93_s18, %s93_s18 }
  0x1e   :  { %p7218_p10 = scmp.ne.s32.totalorder %s93_s18, %s7217_s1  ;;  %p7223_p12 = scmp.lt.s32.totalorder %s7217_s1, %s7217_s1 }
  0x20   :  { %p7224_p13 = por %p7223_p12, %p7222_p11 }
  0x22   :  { %p7225_p0 = pnand %p7224_p13, %p7218_p10 }
  0x24   :  { %7228 = shalt.err (!%p7225_p0)
}
  0x25   :  { %98 = dma.hbm_to_vmem [thread:$0]  %s8888_s7, 16384, %s93_s18, [#allocation14], %s7358_s20, %s7358_s20, %s7359_s21  }
  0x26   :  { %s7360_s26 = smov [#allocation3]  }
  0x27   :  { %s30_s27 = sshll.u32 %s7360_s26, 4  ;;  %s31_s27 = int_to_ptr.vmem [resolvable:$true] %s30_s27 }
  0x28   :  { %s7237_s30 = scalar_lea.vmem %s31_s27, 256  ;;  %p7242_p2 = scmp.lt.s32.totalorder %s31_s27, %s31_s27 }
  0x29   :  { %p7238_p1 = scmp.ne.s32.totalorder %s31_s27, %s7237_s30  ;;  %p7243_p3 = scmp.lt.s32.totalorder %s7237_s30, %s7237_s30 }
  0x2b   :  { %p7244_p4 = por %p7243_p3, %p7242_p2 }
  0x2d   :  { %p7245_p5 = pnand %p7244_p4, %p7238_p1 }
  0x2f   :  { %7248 = shalt.err (!%p7245_p5)
}
  0x30   :  { %s7361_s5 = smov 128   ;;  %s7362_s14 = smov 8  }
  0x31   :  { %36 = dma.hbm_to_vmem [thread:$0]  %s8881_s0, 256, %s31_s27, [#allocation4], %s7361_s5, %s7361_s5, %s7362_s14  }
  0x32   :  { %s7363_s17 = smov [#allocation9]   ;;  %s7364_s22 = smov [#allocation12]  }
  0x33   :  { %s56_s19 = sshll.u32 %s7363_s17, 4  ;;  %s83_s7 = sshll.u32 %s7364_s22, 4  ;;  %s57_s19 = int_to_ptr.vmem [resolvable:$true] %s56_s19  ;;  %s84_s7 = int_to_ptr.vmem [resolvable:$true] %s83_s7 }
  0x34   :  { %s7257_s18 = scalar_lea.vmem %s57_s19, 16384  ;;  %p7262_p7 = scmp.lt.s32.totalorder %s57_s19, %s57_s19 }
  0x35   :  { %p7258_p6 = scmp.ne.s32.totalorder %s57_s19, %s7257_s18  ;;  %p7263_p8 = scmp.lt.s32.totalorder %s7257_s18, %s7257_s18 }
  0x37   :  { %p7264_p9 = por %p7263_p8, %p7262_p7 }
  0x39   :  { %p7265_p10 = pnand %p7264_p9, %p7258_p6 }
  0x3b   :  { %7268 = shalt.err (!%p7265_p10)
}
  0x3c   :  { %62 = dma.hbm_to_vmem [thread:$0]  %s8884_s3, 16384, %s57_s19, [#allocation8], %s7358_s20, %s7358_s20, %s7359_s21  }
  0x3d   :  { %s7277_s0 = scalar_lea.vmem %s84_s7, 64  ;;  %p7282_p12 = scmp.lt.s32.totalorder %s84_s7, %s84_s7 }
  0x3e   :  { %p7278_p11 = scmp.ne.s32.totalorder %s84_s7, %s7277_s0  ;;  %p7283_p13 = scmp.lt.s32.totalorder %s7277_s0, %s7277_s0 }
  0x40   :  { %p7284_p0 = por %p7283_p13, %p7282_p12 }
  0x42   :  { %p7285_p1 = pnand %p7284_p0, %p7278_p11 }
  0x44   :  { %7288 = shalt.err (!%p7285_p1)
}
  0x45   :  { %86 = dma.hbm_to_vmem [thread:$0]  %s8887_s6, 64, %s84_s7, [#allocation11]  }
  0x46   :  { %s121_s30 = sshll.u32 %s8893_s12, 4  ;;  %s7365_s5 = smov [#allocation15]   ;;  %s122_s30 = int_to_ptr.vmem [resolvable:$true] %s121_s30 }
  0x47   :  { %s105_s14 = sshll.u32 %s7365_s5, 4  ;;  %s106_s14 = int_to_ptr.vmem [resolvable:$true] %s105_s14 }
  0x48   :  { %s7297_s3 = scalar_lea.vmem %s106_s14, 64  ;;  %p7302_p3 = scmp.lt.s32.totalorder %s106_s14, %s106_s14 }
  0x49   :  { %p7298_p2 = scmp.ne.s32.totalorder %s106_s14, %s7297_s3  ;;  %p7303_p4 = scmp.lt.s32.totalorder %s7297_s3, %s7297_s3 }
  0x4b   :  { %p7304_p5 = por %p7303_p4, %p7302_p3 }
  0x4d   :  { %p7305_p6 = pnand %p7304_p5, %p7298_p2 }
  0x4f   :  { %7308 = shalt.err (!%p7305_p6)
}
  0x50   :  { %108 = dma.hbm_to_vmem [thread:$0]  %s8889_s8, 64, %s106_s14, [#allocation14]  }
  0x51   :  { %s7309_s6 = scalar_lea.vmem %s122_s30, 16  ;;  %p7314_p8 = scmp.lt.s32.totalorder %s122_s30, %s122_s30 }
  0x52   :  { %p7310_p7 = scmp.ne.s32.totalorder %s122_s30, %s7309_s6  ;;  %p7315_p9 = scmp.lt.s32.totalorder %s7309_s6, %s7309_s6 }
  0x54   :  { %p7316_p10 = por %p7315_p9, %p7314_p8 }
  0x56   :  { %p7317_p11 = pnand %p7316_p10, %p7310_p7 }
  0x58   :  { %7320 = shalt.err (!%p7317_p11)
}
  0x59   :  { %s7366_s12 = smov [#allocation16]  }
  0x5a   :  { %124 = dma.vmem_to_smem %s122_s30, 16, %s7366_s12, [#allocation6]  }
  0x5b   :  { %7341 = dma.done.wait [#allocation4], 256  }
  0x5c   :  { %7342 = vsyncadd [#allocation4], 4294967040 }
  0x5d   :  { %7343 = dma.done.wait [#allocation8], 24576  }
  0x5e   :  { %7344 = vsyncadd [#allocation8], 4294942720 }
  0x5f   :  { %7345 = dma.done.wait [#allocation11], 4160  }
  0x60   :  { %7346 = vsyncadd [#allocation11], 4294963136 }
  0x61   :  { %7347 = dma.done.wait [#allocation14], 16448  }
  0x62   :  { %7348 = vsyncadd [#allocation14], 4294950848 }
  0x63   :  { %7349 = dma.done.wait [#allocation6], 16  }
  0x64   :  { %7350 = vsyncadd [#allocation6], 4294967280 }
  0x65   :  { %149 = sfence }
  0x66   :  { %v187_v0 = vlaneseq  ;;  %v7367_v1 = vmov 1966171168   ;;  %v153_v4 = vld [vmem:[%s8883_s2] sm:$0xf]  ;;  %vm3762_vm0 = vcmask 1041409   ;;  %vm3765_vm1 = vcmask 1042434  }
  0x67   :  { %v208_v2 = vunpack.c.l.s4 %v7367_v1  ;;  %v469_v27 = vld [vmem:[#allocation7 + $0x1] ss:$8 sm:$0xf]  ;;  %v155_v43 = vld [vmem:[#allocation7] ss:$8 sm:$0xf] }
  0x68   :  { %v7476_v3 = vshrl.u32 %v187_v0, 7  ;;  %v471_v28 = vld [vmem:[#allocation7 + $0x21] ss:$8 sm:$0xf]  ;;  %vm3768_vm2 = vcmask 1043459   ;;  %vm3771_vm3 = vcmask 1044484  }
  0x69   :  { %v209_v5 = vunpack.c.0.s8 %v208_v2  ;;  %v473_v29 = vld [vmem:[#allocation7 + $0x41] ss:$8 sm:$0xf]  ;;  %v157_v44 = vld [vmem:[#allocation7 + $0x20] ss:$8 sm:$0xf] }
  0x6a   :  { %v7482_v6 = vsub.s32 0, %v7476_v3  ;;  %v7485_v7 = vsub.s32 1, %v7476_v3  ;;  %v7488_v8 = vsub.s32 2, %v7476_v3  ;;  %v7491_v9 = vsub.s32 3, %v7476_v3  ;;  %s7369_s18 = smov [#allocation17]  }
  0x6b   :  { %v7494_v10 = vsub.s32 %v209_v5, %v7476_v3  ;;  %v475_v30 = vld [vmem:[#allocation7 + $0x61] ss:$8 sm:$0xf]  ;;  %v159_v49 = vld [vmem:[#allocation7 + $0x40] ss:$8 sm:$0xf] }
  0x6c   :  { %v190_v11 = vrot.slane %v153_v4, %v7482_v6  ;;  %v194_v12 = vrot.slane %v153_v4, %v7485_v7  ;;  %v198_v13 = vrot.slane %v153_v4, %v7488_v8  ;;  %v202_v14 = vrot.slane %v153_v4, %v7491_v9  ;;  %v477_v35 = vld [vmem:[#allocation7 + $0x81] ss:$8 sm:$0xf]  ;;  %v161_v50 = vld [vmem:[#allocation7 + $0x60] ss:$8 sm:$0xf] }
  0x6d   :  { %v479_v36 = vld [vmem:[#allocation7 + $0xa1] ss:$8 sm:$0xf]  ;;  %v163_v55 = vld [vmem:[#allocation7 + $0x80] ss:$8 sm:$0xf] }
  0x6e   :  { %v203_v15 = vcombine.low %v190_v11, %v194_v12  ;;  %v204_v16 = vcombine.high %v190_v11, %v194_v12  ;;  %v205_v17 = vcombine.low %v198_v13, %v202_v14  ;;  %v206_v18 = vcombine.high %v198_v13, %v202_v14  ;;  %v481_v37 = vld [vmem:[#allocation7 + $0xc1] ss:$8 sm:$0xf]  ;;  %v165_v56 = vld [vmem:[#allocation7 + $0xa0] ss:$8 sm:$0xf] }
  0x6f   :  { %v483_v38 = vld [vmem:[#allocation7 + $0xe1] ss:$8 sm:$0xf]  ;;  %v167_v59 = vld [vmem:[#allocation7 + $0xc0] ss:$8 sm:$0xf] }
  0x70   :  { %v213_v19 = vrot.slane %v203_v15, %v7494_v10  ;;  %v220_v20 = vrot.slane %v204_v16, %v7494_v10  ;;  %v227_v21 = vrot.slane %v205_v17, %v7494_v10  ;;  %v234_v22 = vrot.slane %v206_v18, %v7494_v10  ;;  %v169_v60 = vld [vmem:[#allocation7 + $0xe0] ss:$8 sm:$0xf]  ;;  %v485_v4 = vld [vmem:[#allocation7 + $0x101] ss:$8 sm:$0xf] }
  0x71   :  { %vm3774_vm4 = vcmask 1045509   ;;  %vm3777_vm5 = vcmask 1046534   ;;  %vm3780_vm6 = vcmask 1047559   ;;  %s6231_s23 = sshll.u32 %s7369_s18, 4  ;;  %s6232_s23 = int_to_ptr.vmem [resolvable:$true] %s6231_s23 }
  0x72   :  { %v235_v23 = vcombine.low %v213_v19, %v227_v21  ;;  %v236_v24 = vcombine.high %v213_v19, %v227_v21  ;;  %v237_v25 = vcombine.low %v220_v20, %v234_v22  ;;  %v238_v26 = vcombine.high %v220_v20, %v234_v22  ;;  %s7321_s1 = scalar_lea.vmem %s6232_s23, 1024  ;;  %p7326_p13 = scmp.lt.s32.totalorder %s6232_s23, %s6232_s23 }
  0x73   :  { %p7322_p12 = scmp.ne.s32.totalorder %s6232_s23, %s7321_s1  ;;  %p7327_p0 = scmp.lt.s32.totalorder %s7321_s1, %s7321_s1 }
  0x74   :  { %v7505_v31 = vrot.slane %v235_v23, %v7494_v10  ;;  %v7508_v32 = vrot.slane %v237_v25, %v7494_v10  ;;  %v7511_v33 = vrot.slane %v236_v24, %v7494_v10  ;;  %v7514_v34 = vrot.slane %v238_v26, %v7494_v10  ;;  %v487_v26 = vld [vmem:[#allocation7 + $0x121] ss:$8 sm:$0xf] }
  0x75   :  { %p7328_p1 = por %p7327_p0, %p7326_p13 }
  0x76   :  { %v7518_v39 = vcombine.high %v7505_v31, %v7505_v31  ;;  %v7522_v40 = vcombine.high %v7508_v32, %v7508_v32  ;;  %v7526_v41 = vcombine.high %v7511_v33, %v7511_v33  ;;  %v7530_v42 = vcombine.high %v7514_v34, %v7514_v34 }
  0x77   :  { %v500_v45 = vmul.f32 %v469_v27, %v7505_v31  ;;  %v501_v46 = vmul.f32 %v471_v28, %v7511_v33  ;;  %v504_v47 = vmul.f32 %v477_v35, %v7508_v32  ;;  %v505_v48 = vmul.f32 %v479_v36, %v7514_v34  ;;  %p7329_p2 = pnand %p7328_p1, %p7322_p12 }
  0x78   :  { %v502_v51 = vmul.f32 %v473_v29, %v7518_v39  ;;  %v503_v52 = vmul.f32 %v475_v30, %v7526_v41  ;;  %v506_v53 = vmul.f32 %v481_v37, %v7522_v40  ;;  %v507_v54 = vmul.f32 %v483_v38, %v7530_v42 }
  0x79   :  { %v532_v57 = vcombine.low %v500_v45, %v501_v46  ;;  %v534_v58 = vcombine.low %v504_v47, %v505_v48  ;;  %v279_v61 = vmul.f32 %v7505_v31, %v155_v43  ;;  %v280_v62 = vmul.f32 %v7511_v33, %v157_v44  ;;  %v489_v43 = vld [vmem:[#allocation7 + $0x141] ss:$8 sm:$0xf] }
  0x7a   :  { %v533_v63 = vcombine.low %v502_v51, %v503_v52  ;;  %v535_v0 = vcombine.low %v506_v53, %v507_v54  ;;  %v281_v1 = vmul.f32 %v7518_v39, %v159_v49  ;;  %v282_v2 = vmul.f32 %v7526_v41, %v161_v50  ;;  %v491_v47 = vld [vmem:[#allocation7 + $0x161] ss:$8 sm:$0xf] }
  0x7b   :  { %v542_v5 = vrot.slane %v532_v57, %v7494_v10  ;;  %v556_v11 = vrot.slane %v534_v58, %v7494_v10  ;;  %v283_v12 = vmul.f32 %v7508_v32, %v163_v55  ;;  %v284_v13 = vmul.f32 %v7514_v34, %v165_v56  ;;  %v493_v48 = vld [vmem:[#allocation7 + $0x181] ss:$8 sm:$0xf] }
  0x7c   :  { %v549_v14 = vrot.slane %v533_v63, %v7494_v10  ;;  %v563_v15 = vrot.slane %v535_v0, %v7494_v10  ;;  %v285_v16 = vmul.f32 %v7522_v40, %v167_v59  ;;  %v286_v17 = vmul.f32 %v7530_v42, %v169_v60  ;;  %v495_v54 = vld [vmem:[#allocation7 + $0x1a1] ss:$8 sm:$0xf] }
  0x7d   :  { %v311_v18 = vcombine.low %v279_v61, %v280_v62  ;;  %v312_v19 = vcombine.low %v281_v1, %v282_v2  ;;  %v313_v20 = vcombine.low %v283_v12, %v284_v13  ;;  %v508_v21 = vmul.f32 %v485_v4, %v7505_v31  ;;  %v497_v55 = vld [vmem:[#allocation7 + $0x1c1] ss:$8 sm:$0xf] }
  0x7e   :  { %v564_v22 = vcombine.low %v542_v5, %v549_v14  ;;  %v565_v23 = vcombine.high %v542_v5, %v549_v14  ;;  %v566_v24 = vcombine.low %v556_v11, %v563_v15  ;;  %v567_v25 = vcombine.high %v556_v11, %v563_v15  ;;  %v499_v60 = vld [vmem:[#allocation7 + $0x1e1] ss:$8 sm:$0xf]  ;;  %v171_v15 = vld [vmem:[#allocation7 + $0x100] ss:$8 sm:$0xf] }
  0x7f   :  { %v314_v27 = vcombine.low %v285_v16, %v286_v17  ;;  %v321_v28 = vrot.slane %v311_v18, %v7494_v10  ;;  %v328_v29 = vrot.slane %v312_v19, %v7494_v10  ;;  %v335_v30 = vrot.slane %v313_v20, %v7494_v10  ;;  %v173_v16 = vld [vmem:[#allocation7 + $0x120] ss:$8 sm:$0xf] }
  0x80   :  { %v574_v35 = vrot.slane %v564_v22, %v7494_v10  ;;  %v581_v36 = vrot.slane %v565_v23, %v7494_v10  ;;  %v588_v37 = vrot.slane %v566_v24, %v7494_v10  ;;  %v595_v38 = vrot.slane %v567_v25, %v7494_v10  ;;  %v175_v22 = vld [vmem:[#allocation7 + $0x140] ss:$8 sm:$0xf] }
  0x81   :  { %v342_v44 = vrot.slane %v314_v27, %v7494_v10  ;;  %v343_v45 = vcombine.low %v321_v28, %v328_v29  ;;  %v344_v46 = vcombine.high %v321_v28, %v328_v29  ;;  %v509_v49 = vmul.f32 %v487_v26, %v7511_v33  ;;  %v177_v23 = vld [vmem:[#allocation7 + $0x160] ss:$8 sm:$0xf] }
  0x82   :  { %v596_v50 = vcombine.low %v574_v35, %v588_v37  ;;  %v597_v51 = vcombine.high %v574_v35, %v588_v37  ;;  %v598_v52 = vcombine.low %v581_v36, %v595_v38  ;;  %v599_v53 = vcombine.high %v581_v36, %v595_v38  ;;  %v179_v28 = vld [vmem:[#allocation7 + $0x180] ss:$8 sm:$0xf] }
  0x83   :  { %v345_v56 = vcombine.low %v335_v30, %v342_v44  ;;  %v346_v57 = vcombine.high %v335_v30, %v342_v44  ;;  %v353_v58 = vrot.slane %v343_v45, %v7494_v10  ;;  %v360_v59 = vrot.slane %v344_v46, %v7494_v10  ;;  %v181_v35 = vld [vmem:[#allocation7 + $0x1a0] ss:$8 sm:$0xf] }
  0x84   :  { %v676_v61 = vadd.f32 %v598_v52, %v596_v50  ;;  %v510_v62 = vmul.f32 %v489_v43, %v7518_v39  ;;  %v511_v63 = vmul.f32 %v491_v47, %v7526_v41  ;;  %v512_v0 = vmul.f32 %v493_v48, %v7508_v32  ;;  %v185_v44 = vld [vmem:[#allocation7 + $0x1e0] ss:$8 sm:$0xf] }
  0x85   :  { %v367_v1 = vrot.slane %v345_v56, %v7494_v10  ;;  %v374_v2 = vrot.slane %v346_v57, %v7494_v10  ;;  %v513_v4 = vmul.f32 %v495_v54, %v7514_v34  ;;  %v514_v5 = vmul.f32 %v497_v55, %v7522_v40  ;;  %v705_v55 = vld [vmem:[#allocation7 + $0x102] ss:$8 sm:$0xf] }
  0x86   :  { %v677_v11 = vadd.f32 %v676_v61, %v597_v51  ;;  %v515_v12 = vmul.f32 %v499_v60, %v7530_v42  ;;  %v600_v13 = vcombine.low %v508_v21, %v509_v49  ;;  %v601_v14 = vcombine.low %v510_v62, %v511_v63  ;;  %v183_v21 = vld [vmem:[#allocation7 + $0x1c0] ss:$8 sm:$0xf]  ;;  %v707_v56 = vld [vmem:[#allocation7 + $0x122] ss:$8 sm:$0xf] }
  0x87   :  { %v375_v17 = vcombine.low %v353_v58, %v367_v1  ;;  %v376_v18 = vcombine.high %v353_v58, %v367_v1  ;;  %v377_v19 = vcombine.low %v360_v59, %v374_v2  ;;  %v378_v20 = vcombine.high %v360_v59, %v374_v2  ;;  %v709_v1 = vld [vmem:[#allocation7 + $0x142] ss:$8 sm:$0xf] }
  0x88   :  { %v678_v24 = vadd.f32 %v677_v11, %v599_v53  ;;  %v602_v25 = vcombine.low %v512_v0, %v513_v4  ;;  %v603_v26 = vcombine.low %v514_v5, %v515_v12  ;;  %v610_v27 = vrot.slane %v600_v13, %v7494_v10  ;;  %v711_v5 = vld [vmem:[#allocation7 + $0x162] ss:$8 sm:$0xf] }
  0x89   :  { %v455_v29 = vadd.f32 %v377_v19, %v375_v17  ;;  %v617_v30 = vrot.slane %v601_v14, %v7494_v10  ;;  %v287_v36 = vmul.f32 %v7505_v31, %v171_v15  ;;  %v288_v37 = vmul.f32 %v7511_v33, %v173_v16  ;;  %v713_v11 = vld [vmem:[#allocation7 + $0x182] ss:$8 sm:$0xf] }
  0x8a   :  { %679 = vadd.xlane.f32.xlu1 %v678_v24  ;;  %v624_v38 = vrot.slane %v602_v25, %v7494_v10  ;;  %v631_v43 = vrot.slane %v603_v26, %v7494_v10  ;;  %v289_v45 = vmul.f32 %v7518_v39, %v175_v22  ;;  %v290_v46 = vmul.f32 %v7526_v41, %v177_v23  ;;  %v717_v24 = vld [vmem:[#allocation7 + $0x1c2] ss:$8 sm:$0xf] }
  0x8b   :  { %v456_v47 = vadd.f32 %v455_v29, %v376_v18  ;;  %v632_v48 = vcombine.low %v610_v27, %v617_v30  ;;  %v633_v49 = vcombine.high %v610_v27, %v617_v30  ;;  %v291_v50 = vmul.f32 %v7508_v32, %v179_v28  ;;  %v715_v18 = vld [vmem:[#allocation7 + $0x1a2] ss:$8 sm:$0xf] }
  0x8c   :  { %v634_v51 = vcombine.low %v624_v38, %v631_v43  ;;  %v635_v52 = vcombine.high %v624_v38, %v631_v43  ;;  %v292_v53 = vmul.f32 %v7514_v34, %v181_v35  ;;  %v293_v54 = vmul.f32 %v7522_v40, %v183_v21  ;;  %v719_v25 = vld [vmem:[#allocation7 + $0x1e2] ss:$8 sm:$0xf] }
  0x8d   :  { %v457_v57 = vadd.f32 %v456_v47, %v378_v20  ;;  %v642_v58 = vrot.slane %v632_v48, %v7494_v10  ;;  %v649_v59 = vrot.slane %v633_v49, %v7494_v10  ;;  %v294_v60 = vmul.f32 %v7530_v42, %v185_v44  ;;  %v689_v49 = vld [vmem:[#allocation7 + $0x2] ss:$8 sm:$0xf] }
  0x8e   :  { %v656_v61 = vrot.slane %v634_v51, %v7494_v10  ;;  %v663_v62 = vrot.slane %v635_v52, %v7494_v10  ;;  %v379_v63 = vcombine.low %v287_v36, %v288_v37  ;;  %v380_v0 = vcombine.low %v289_v45, %v290_v46 }
  0x8f   :  { %458 = vadd.xlane.f32.xlu0 %v457_v57  ;;  %v381_v2 = vcombine.low %v291_v50, %v292_v53  ;;  %v382_v4 = vcombine.low %v293_v54, %v294_v60  ;;  %v728_v12 = vmul.f32 %v705_v55, %v7505_v31  ;;  %v729_v13 = vmul.f32 %v707_v56, %v7511_v33  ;;  %v691_v54 = vld [vmem:[#allocation7 + $0x22] ss:$8 sm:$0xf] }
  0x90   :  { %v664_v14 = vcombine.low %v642_v58, %v656_v61  ;;  %v665_v15 = vcombine.high %v642_v58, %v656_v61  ;;  %v666_v16 = vcombine.low %v649_v59, %v663_v62  ;;  %v667_v17 = vcombine.high %v649_v59, %v663_v62  ;;  %v693_v55 = vld [vmem:[#allocation7 + $0x42] ss:$8 sm:$0xf] }
  0x91   :  { %v389_v19 = vrot.slane %v379_v63, %v7494_v10  ;;  %v396_v20 = vrot.slane %v380_v0, %v7494_v10  ;;  %v403_v22 = vrot.slane %v381_v2, %v7494_v10  ;;  %v410_v23 = vrot.slane %v382_v4, %v7494_v10  ;;  %v695_v60 = vld [vmem:[#allocation7 + $0x62] ss:$8 sm:$0xf] }
  0x92   :  { %v681_v26 = vadd.f32 %v666_v16, %v664_v14  ;;  %v730_v27 = vmul.f32 %v709_v1, %v7518_v39  ;;  %v731_v28 = vmul.f32 %v711_v5, %v7526_v41  ;;  %v732_v29 = vmul.f32 %v713_v11, %v7508_v32  ;;  %v697_v61 = vld [vmem:[#allocation7 + $0x82] ss:$8 sm:$0xf] }
  0x93   :  { %v411_v30 = vcombine.low %v389_v19, %v396_v20  ;;  %v412_v35 = vcombine.high %v389_v19, %v396_v20  ;;  %v413_v21 = vcombine.low %v403_v22, %v410_v23  ;;  %v414_v36 = vcombine.high %v403_v22, %v410_v23  ;;  %v699_v2 = vld [vmem:[#allocation7 + $0xa2] ss:$8 sm:$0xf] }
  0x94   :  { %v682_v37 = vadd.f32 %v681_v26, %v665_v15  ;;  %v733_v38 = vmul.f32 %v715_v18, %v7514_v34  ;;  %v734_v43 = vmul.f32 %v717_v24, %v7522_v40  ;;  %v735_v44 = vmul.f32 %v719_v25, %v7530_v42  ;;  %v701_v4 = vld [vmem:[#allocation7 + $0xc2] ss:$8 sm:$0xf]  ;;  %v925_v24 = vld [vmem:[#allocation7 + $0x103] ss:$8 sm:$0xf] }
  0x95   :  { %v421_v45 = vrot.slane %v411_v30, %v7494_v10  ;;  %v428_v46 = vrot.slane %v412_v35, %v7494_v10  ;;  %v435_v47 = vrot.slane %v413_v21, %v7494_v10  ;;  %v442_v48 = vrot.slane %v414_v36, %v7494_v10 }
  0x96   :  { %v683_v50 = vadd.f32 %v682_v37, %v667_v17  ;;  %v820_v51 = vcombine.low %v728_v12, %v729_v13  ;;  %v821_v52 = vcombine.low %v730_v27, %v731_v28  ;;  %v822_v53 = vcombine.low %v732_v29, %v733_v38  ;;  %v703_v17 = vld [vmem:[#allocation7 + $0xe2] ss:$8 sm:$0xf]  ;;  %v927_v29 = vld [vmem:[#allocation7 + $0x123] ss:$8 sm:$0xf] }
  0x97   :  { %v443_v56 = vcombine.low %v421_v45, %v435_v47  ;;  %v444_v57 = vcombine.high %v421_v45, %v435_v47  ;;  %v445_v58 = vcombine.low %v428_v46, %v442_v48  ;;  %v446_v59 = vcombine.high %v428_v46, %v442_v48 }
  0x98   :  { %684 = vadd.xlane.f32.xlu1 %v683_v50  ;;  %v823_v62 = vcombine.low %v734_v43, %v735_v44  ;;  %v830_v63 = vrot.slane %v820_v51, %v7494_v10  ;;  %v837_v0 = vrot.slane %v821_v52, %v7494_v10  ;;  %v844_v1 = vrot.slane %v822_v53, %v7494_v10  ;;  %v929_v44 = vld [vmem:[#allocation7 + $0x143] ss:$8 sm:$0xf] }
  0x99   :  { %v460_v5 = vadd.f32 %v445_v58, %v443_v56  ;;  %v720_v11 = vmul.f32 %v689_v49, %v7505_v31  ;;  %v721_v12 = vmul.f32 %v691_v54, %v7511_v33  ;;  %v722_v13 = vmul.f32 %v693_v55, %v7518_v39  ;;  %v931_v49 = vld [vmem:[#allocation7 + $0x163] ss:$8 sm:$0xf] }
  0x9a   :  { %v851_v14 = vrot.slane %v823_v62, %v7494_v10  ;;  %v852_v15 = vcombine.low %v830_v63, %v837_v0  ;;  %v853_v16 = vcombine.high %v830_v63, %v837_v0  ;;  %v723_v18 = vmul.f32 %v695_v60, %v7526_v41  ;;  %v933_v50 = vld [vmem:[#allocation7 + $0x183] ss:$8 sm:$0xf] }
  0x9b   :  { %v461_v19 = vadd.f32 %v460_v5, %v444_v57  ;;  %v724_v20 = vmul.f32 %v697_v61, %v7508_v32  ;;  %v725_v22 = vmul.f32 %v699_v2, %v7514_v34  ;;  %v726_v23 = vmul.f32 %v701_v4, %v7522_v40  ;;  %v935_v56 = vld [vmem:[#allocation7 + $0x1a3] ss:$8 sm:$0xf] }
  0x9c   :  { %v854_v25 = vcombine.low %v844_v1, %v851_v14  ;;  %v855_v26 = vcombine.high %v844_v1, %v851_v14  ;;  %v862_v27 = vrot.slane %v852_v15, %v7494_v10  ;;  %v869_v28 = vrot.slane %v853_v16, %v7494_v10  ;;  %v937_v61 = vld [vmem:[#allocation7 + $0x1c3] ss:$8 sm:$0xf] }
  0x9d   :  { %v462_v30 = vadd.f32 %v461_v19, %v446_v59  ;;  %v727_v35 = vmul.f32 %v703_v17, %v7530_v42  ;;  %v752_v21 = vcombine.low %v720_v11, %v721_v12  ;;  %v753_v36 = vcombine.low %v722_v13, %v723_v18  ;;  %v939_v62 = vld [vmem:[#allocation7 + $0x1e3] ss:$8 sm:$0xf] }
  0x9e   :  { %v876_v37 = vrot.slane %v854_v25, %v7494_v10  ;;  %v883_v38 = vrot.slane %v855_v26, %v7494_v10  ;;  %v754_v43 = vcombine.low %v724_v20, %v725_v22  ;;  %v948_v45 = vmul.f32 %v925_v24, %v7505_v31  ;;  %v909_v13 = vld [vmem:[#allocation7 + $0x3] ss:$8 sm:$0xf] }
  0x9f   :  { %463 = vadd.xlane.f32.xlu0 %v462_v30  ;;  %v755_v46 = vcombine.low %v726_v23, %v727_v35  ;;  %v762_v47 = vrot.slane %v752_v21, %v7494_v10  ;;  %v769_v48 = vrot.slane %v753_v36, %v7494_v10  ;;  %v949_v51 = vmul.f32 %v927_v29, %v7511_v33  ;;  %v911_v23 = vld [vmem:[#allocation7 + $0x23] ss:$8 sm:$0xf] }
  0xa0   :  { %v884_v52 = vcombine.low %v862_v27, %v876_v37  ;;  %v885_v53 = vcombine.high %v862_v27, %v876_v37  ;;  %v886_v54 = vcombine.low %v869_v28, %v883_v38  ;;  %v887_v55 = vcombine.high %v869_v28, %v883_v38  ;;  %v913_v24 = vld [vmem:[#allocation7 + $0x43] ss:$8 sm:$0xf] }
  0xa1   :  { %v776_v57 = vrot.slane %v754_v43, %v7494_v10  ;;  %v783_v58 = vrot.slane %v755_v46, %v7494_v10  ;;  %v784_v59 = vcombine.low %v762_v47, %v769_v48  ;;  %v785_v60 = vcombine.high %v762_v47, %v769_v48  ;;  %v915_v28 = vld [vmem:[#allocation7 + $0x63] ss:$8 sm:$0xf] }
  0xa2   :  { %v901_v63 = vadd.f32 %v886_v54, %v884_v52  ;;  %v950_v0 = vmul.f32 %v929_v44, %v7518_v39  ;;  %v951_v1 = vmul.f32 %v931_v49, %v7526_v41  ;;  %v952_v2 = vmul.f32 %v933_v50, %v7508_v32  ;;  %v917_v29 = vld [vmem:[#allocation7 + $0x83] ss:$8 sm:$0xf] }
  0xa3   :  { %v786_v4 = vcombine.low %v776_v57, %v783_v58  ;;  %v787_v5 = vcombine.high %v776_v57, %v783_v58  ;;  %v794_v11 = vrot.slane %v784_v59, %v7494_v10  ;;  %v801_v12 = vrot.slane %v785_v60, %v7494_v10  ;;  %v919_v38 = vld [vmem:[#allocation7 + $0xa3] ss:$8 sm:$0xf] }
  0xa4   :  { %v902_v14 = vadd.f32 %v901_v63, %v885_v53  ;;  %v953_v15 = vmul.f32 %v935_v56, %v7514_v34  ;;  %v954_v16 = vmul.f32 %v937_v61, %v7522_v40  ;;  %v955_v17 = vmul.f32 %v939_v62, %v7530_v42  ;;  %v921_v43 = vld [vmem:[#allocation7 + $0xc3] ss:$8 sm:$0xf]  ;;  %v1145_v61 = vld [vmem:[#allocation7 + $0x104] ss:$8 sm:$0xf] }
  0xa5   :  { %v808_v18 = vrot.slane %v786_v4, %v7494_v10  ;;  %v815_v19 = vrot.slane %v787_v5, %v7494_v10  ;;  %v1040_v20 = vcombine.low %v948_v45, %v949_v51  ;;  %v1041_v22 = vcombine.low %v950_v0, %v951_v1  ;;  %v923_v48 = vld [vmem:[#allocation7 + $0xe3] ss:$8 sm:$0xf]  ;;  %v1147_v62 = vld [vmem:[#allocation7 + $0x124] ss:$8 sm:$0xf] }
  0xa6   :  { %v903_v25 = vadd.f32 %v902_v14, %v887_v55  ;;  %v1042_v26 = vcombine.low %v952_v2, %v953_v15  ;;  %v1043_v27 = vcombine.low %v954_v16, %v955_v17  ;;  %v940_v30 = vmul.f32 %v909_v13, %v7505_v31  ;;  %v1149_v63 = vld [vmem:[#allocation7 + $0x144] ss:$8 sm:$0xf] }
  0xa7   :  { %v816_v35 = vcombine.low %v794_v11, %v808_v18  ;;  %v817_v21 = vcombine.high %v794_v11, %v808_v18  ;;  %v818_v36 = vcombine.low %v801_v12, %v815_v19  ;;  %v819_v37 = vcombine.high %v801_v12, %v815_v19  ;;  %v1151_v14 = vld [vmem:[#allocation7 + $0x164] ss:$8 sm:$0xf] }
  0xa8   :  { %904 = vadd.xlane.f32.xlu1 %v903_v25  ;;  %v1050_v44 = vrot.slane %v1040_v20, %v7494_v10  ;;  %v1057_v45 = vrot.slane %v1041_v22, %v7494_v10  ;;  %v1064_v46 = vrot.slane %v1042_v26, %v7494_v10  ;;  %v1071_v47 = vrot.slane %v1043_v27, %v7494_v10  ;;  %v1153_v15 = vld [vmem:[#allocation7 + $0x184] ss:$8 sm:$0xf] }
  0xa9   :  { %v896_v49 = vadd.f32 %v818_v36, %v816_v35  ;;  %v941_v50 = vmul.f32 %v911_v23, %v7511_v33  ;;  %v942_v51 = vmul.f32 %v913_v24, %v7518_v39  ;;  %v943_v52 = vmul.f32 %v915_v28, %v7526_v41  ;;  %v1155_v16 = vld [vmem:[#allocation7 + $0x1a4] ss:$8 sm:$0xf] }
  0xaa   :  { %v1072_v53 = vcombine.low %v1050_v44, %v1057_v45  ;;  %v1073_v54 = vcombine.high %v1050_v44, %v1057_v45  ;;  %v1074_v55 = vcombine.low %v1064_v46, %v1071_v47  ;;  %v1075_v56 = vcombine.high %v1064_v46, %v1071_v47  ;;  %v1157_v26 = vld [vmem:[#allocation7 + $0x1c4] ss:$8 sm:$0xf] }
  0xab   :  { %v897_v57 = vadd.f32 %v896_v49, %v817_v21  ;;  %v944_v58 = vmul.f32 %v917_v29, %v7508_v32  ;;  %v945_v59 = vmul.f32 %v919_v38, %v7514_v34  ;;  %v946_v60 = vmul.f32 %v921_v43, %v7522_v40  ;;  %v1159_v27 = vld [vmem:[#allocation7 + $0x1e4] ss:$8 sm:$0xf] }
  0xac   :  { %v1082_v0 = vrot.slane %v1072_v53, %v7494_v10  ;;  %v1089_v1 = vrot.slane %v1073_v54, %v7494_v10  ;;  %v1096_v2 = vrot.slane %v1074_v55, %v7494_v10  ;;  %v1103_v4 = vrot.slane %v1075_v56, %v7494_v10  ;;  %v1129_v43 = vld [vmem:[#allocation7 + $0x4] ss:$8 sm:$0xf] }
  0xad   :  { %v898_v5 = vadd.f32 %v897_v57, %v819_v37  ;;  %v947_v11 = vmul.f32 %v923_v48, %v7530_v42  ;;  %v972_v12 = vcombine.low %v940_v30, %v941_v50  ;;  %v973_v13 = vcombine.low %v942_v51, %v943_v52  ;;  %v1131_v44 = vld [vmem:[#allocation7 + $0x24] ss:$8 sm:$0xf] }
  0xae   :  { %v1104_v17 = vcombine.low %v1082_v0, %v1096_v2  ;;  %v1105_v18 = vcombine.high %v1082_v0, %v1096_v2  ;;  %v1106_v19 = vcombine.low %v1089_v1, %v1103_v4  ;;  %v1107_v20 = vcombine.high %v1089_v1, %v1103_v4  ;;  %v1133_v53 = vld [vmem:[#allocation7 + $0x44] ss:$8 sm:$0xf] }
  0xaf   :  { %899 = vadd.xlane.f32.xlu0 %v898_v5  ;;  %v974_v22 = vcombine.low %v944_v58, %v945_v59  ;;  %v975_v23 = vcombine.low %v946_v60, %v947_v11  ;;  %v982_v24 = vrot.slane %v972_v12, %v7494_v10  ;;  %v989_v25 = vrot.slane %v973_v13, %v7494_v10  ;;  %v1135_v58 = vld [vmem:[#allocation7 + $0x64] ss:$8 sm:$0xf] }
  0xb0   :  { %v1121_v28 = vadd.f32 %v1106_v19, %v1104_v17  ;;  %v1168_v29 = vmul.f32 %v1145_v61, %v7505_v31  ;;  %v1169_v30 = vmul.f32 %v1147_v62, %v7511_v33  ;;  %v1170_v35 = vmul.f32 %v1149_v63, %v7518_v39  ;;  %v1137_v59 = vld [vmem:[#allocation7 + $0x84] ss:$8 sm:$0xf] }
  0xb1   :  { %v996_v21 = vrot.slane %v974_v22, %v7494_v10  ;;  %v1003_v36 = vrot.slane %v975_v23, %v7494_v10  ;;  %v1004_v37 = vcombine.low %v982_v24, %v989_v25  ;;  %v1005_v38 = vcombine.high %v982_v24, %v989_v25  ;;  %v1139_v60 = vld [vmem:[#allocation7 + $0xa4] ss:$8 sm:$0xf] }
  0xb2   :  { %v1122_v45 = vadd.f32 %v1121_v28, %v1105_v18  ;;  %v1171_v46 = vmul.f32 %v1151_v14, %v7526_v41  ;;  %v1172_v47 = vmul.f32 %v1153_v15, %v7508_v32  ;;  %v1173_v48 = vmul.f32 %v1155_v16, %v7514_v34  ;;  %v1141_v4 = vld [vmem:[#allocation7 + $0xc4] ss:$8 sm:$0xf] }
  0xb3   :  { %v1006_v49 = vcombine.low %v996_v21, %v1003_v36  ;;  %v1007_v50 = vcombine.high %v996_v21, %v1003_v36  ;;  %v1014_v51 = vrot.slane %v1004_v37, %v7494_v10  ;;  %v1021_v52 = vrot.slane %v1005_v38, %v7494_v10  ;;  %v1143_v5 = vld [vmem:[#allocation7 + $0xe4] ss:$8 sm:$0xf]  ;;  %v1365_v37 = vld [vmem:[#allocation7 + $0x105] ss:$8 sm:$0xf] }
  0xb4   :  { %v1123_v54 = vadd.f32 %v1122_v45, %v1107_v20  ;;  %v1174_v55 = vmul.f32 %v1157_v26, %v7522_v40  ;;  %v1175_v56 = vmul.f32 %v1159_v27, %v7530_v42  ;;  %v1260_v57 = vcombine.low %v1168_v29, %v1169_v30  ;;  %v1367_v38 = vld [vmem:[#allocation7 + $0x125] ss:$8 sm:$0xf] }
  0xb5   :  { %v1028_v61 = vrot.slane %v1006_v49, %v7494_v10  ;;  %v1035_v62 = vrot.slane %v1007_v50, %v7494_v10  ;;  %v1261_v63 = vcombine.low %v1170_v35, %v1171_v46  ;;  %v1262_v0 = vcombine.low %v1172_v47, %v1173_v48 }
  0xb6   :  { %1124 = vadd.xlane.f32.xlu1 %v1123_v54  ;;  %v1263_v1 = vcombine.low %v1174_v55, %v1175_v56  ;;  %v1270_v2 = vrot.slane %v1260_v57, %v7494_v10  ;;  %v1160_v11 = vmul.f32 %v1129_v43, %v7505_v31  ;;  %v1161_v12 = vmul.f32 %v1131_v44, %v7511_v33  ;;  %v1369_v43 = vld [vmem:[#allocation7 + $0x145] ss:$8 sm:$0xf] }
  0xb7   :  { %v1036_v13 = vcombine.low %v1014_v51, %v1028_v61  ;;  %v1037_v14 = vcombine.high %v1014_v51, %v1028_v61  ;;  %v1038_v15 = vcombine.low %v1021_v52, %v1035_v62  ;;  %v1039_v16 = vcombine.high %v1021_v52, %v1035_v62  ;;  %v1371_v52 = vld [vmem:[#allocation7 + $0x165] ss:$8 sm:$0xf] }
  0xb8   :  { %v1277_v17 = vrot.slane %v1261_v63, %v7494_v10  ;;  %v1284_v18 = vrot.slane %v1262_v0, %v7494_v10  ;;  %v1291_v19 = vrot.slane %v1263_v1, %v7494_v10  ;;  %v1162_v20 = vmul.f32 %v1133_v53, %v7518_v39  ;;  %v1373_v53 = vld [vmem:[#allocation7 + $0x185] ss:$8 sm:$0xf] }
  0xb9   :  { %v1116_v22 = vadd.f32 %v1038_v15, %v1036_v13  ;;  %v1163_v23 = vmul.f32 %v1135_v58, %v7526_v41  ;;  %v1164_v24 = vmul.f32 %v1137_v59, %v7508_v32  ;;  %v1165_v25 = vmul.f32 %v1139_v60, %v7514_v34  ;;  %v1375_v54 = vld [vmem:[#allocation7 + $0x1a5] ss:$8 sm:$0xf] }
  0xba   :  { %v1292_v26 = vcombine.low %v1270_v2, %v1277_v17  ;;  %v1293_v27 = vcombine.high %v1270_v2, %v1277_v17  ;;  %v1294_v28 = vcombine.low %v1284_v18, %v1291_v19  ;;  %v1295_v29 = vcombine.high %v1284_v18, %v1291_v19  ;;  %v1377_v63 = vld [vmem:[#allocation7 + $0x1c5] ss:$8 sm:$0xf] }
  0xbb   :  { %v1117_v30 = vadd.f32 %v1116_v22, %v1037_v14  ;;  %v1166_v35 = vmul.f32 %v1141_v4, %v7522_v40  ;;  %v1167_v21 = vmul.f32 %v1143_v5, %v7530_v42  ;;  %v1192_v36 = vcombine.low %v1160_v11, %v1161_v12  ;;  %v1379_v0 = vld [vmem:[#allocation7 + $0x1e5] ss:$8 sm:$0xf] }
  0xbc   :  { %v1302_v44 = vrot.slane %v1292_v26, %v7494_v10  ;;  %v1309_v45 = vrot.slane %v1293_v27, %v7494_v10  ;;  %v1316_v46 = vrot.slane %v1294_v28, %v7494_v10  ;;  %v1323_v47 = vrot.slane %v1295_v29, %v7494_v10  ;;  %v1349_v19 = vld [vmem:[#allocation7 + $0x5] ss:$8 sm:$0xf] }
  0xbd   :  { %v1118_v48 = vadd.f32 %v1117_v30, %v1039_v16  ;;  %v1193_v49 = vcombine.low %v1162_v20, %v1163_v23  ;;  %v1194_v50 = vcombine.low %v1164_v24, %v1165_v25  ;;  %v1195_v51 = vcombine.low %v1166_v35, %v1167_v21  ;;  %v1351_v20 = vld [vmem:[#allocation7 + $0x25] ss:$8 sm:$0xf] }
  0xbe   :  { %v1324_v55 = vcombine.low %v1302_v44, %v1316_v46  ;;  %v1325_v56 = vcombine.high %v1302_v44, %v1316_v46  ;;  %v1326_v57 = vcombine.low %v1309_v45, %v1323_v47  ;;  %v1327_v58 = vcombine.high %v1309_v45, %v1323_v47  ;;  %v1353_v22 = vld [vmem:[#allocation7 + $0x45] ss:$8 sm:$0xf] }
  0xbf   :  { %1119 = vadd.xlane.f32.xlu0 %v1118_v48  ;;  %v1202_v59 = vrot.slane %v1192_v36, %v7494_v10  ;;  %v1209_v60 = vrot.slane %v1193_v49, %v7494_v10  ;;  %v1216_v61 = vrot.slane %v1194_v50, %v7494_v10  ;;  %v1223_v62 = vrot.slane %v1195_v51, %v7494_v10  ;;  %v1355_v27 = vld [vmem:[#allocation7 + $0x65] ss:$8 sm:$0xf] }
  0xc0   :  { %v1341_v1 = vadd.f32 %v1326_v57, %v1324_v55  ;;  %v1388_v2 = vmul.f32 %v1365_v37, %v7505_v31  ;;  %v1389_v4 = vmul.f32 %v1367_v38, %v7511_v33  ;;  %v1390_v5 = vmul.f32 %v1369_v43, %v7518_v39  ;;  %v1357_v21 = vld [vmem:[#allocation7 + $0x85] ss:$8 sm:$0xf] }
  0xc1   :  { %v1224_v11 = vcombine.low %v1202_v59, %v1209_v60  ;;  %v1225_v12 = vcombine.high %v1202_v59, %v1209_v60  ;;  %v1226_v13 = vcombine.low %v1216_v61, %v1223_v62  ;;  %v1227_v14 = vcombine.high %v1216_v61, %v1223_v62  ;;  %v1359_v36 = vld [vmem:[#allocation7 + $0xa5] ss:$8 sm:$0xf] }
  0xc2   :  { %v1342_v15 = vadd.f32 %v1341_v1, %v1325_v56  ;;  %v1391_v16 = vmul.f32 %v1371_v52, %v7526_v41  ;;  %v1392_v17 = vmul.f32 %v1373_v53, %v7508_v32  ;;  %v1393_v18 = vmul.f32 %v1375_v54, %v7514_v34  ;;  %v1361_v37 = vld [vmem:[#allocation7 + $0xc5] ss:$8 sm:$0xf] }
  0xc3   :  { %v1234_v23 = vrot.slane %v1224_v11, %v7494_v10  ;;  %v1241_v24 = vrot.slane %v1225_v12, %v7494_v10  ;;  %v1248_v25 = vrot.slane %v1226_v13, %v7494_v10  ;;  %v1255_v26 = vrot.slane %v1227_v14, %v7494_v10  ;;  %v1363_v50 = vld [vmem:[#allocation7 + $0xe5] ss:$8 sm:$0xf]  ;;  %v1585_v13 = vld [vmem:[#allocation7 + $0x106] ss:$8 sm:$0xf] }
  0xc4   :  { %v1343_v28 = vadd.f32 %v1342_v15, %v1327_v58  ;;  %v1394_v29 = vmul.f32 %v1377_v63, %v7522_v40  ;;  %v1395_v30 = vmul.f32 %v1379_v0, %v7530_v42  ;;  %v1480_v35 = vcombine.low %v1388_v2, %v1389_v4  ;;  %v1587_v14 = vld [vmem:[#allocation7 + $0x126] ss:$8 sm:$0xf] }
  0xc5   :  { %v1256_v38 = vcombine.low %v1234_v23, %v1248_v25  ;;  %v1257_v43 = vcombine.high %v1234_v23, %v1248_v25  ;;  %v1258_v44 = vcombine.low %v1241_v24, %v1255_v26  ;;  %v1259_v45 = vcombine.high %v1241_v24, %v1255_v26  ;;  %v1589_v15 = vld [vmem:[#allocation7 + $0x146] ss:$8 sm:$0xf] }
  0xc6   :  { %1344 = vadd.xlane.f32.xlu1 %v1343_v28  ;;  %v1481_v46 = vcombine.low %v1390_v5, %v1391_v16  ;;  %v1482_v47 = vcombine.low %v1392_v17, %v1393_v18  ;;  %v1483_v48 = vcombine.low %v1394_v29, %v1395_v30  ;;  %v1490_v49 = vrot.slane %v1480_v35, %v7494_v10  ;;  %v1591_v25 = vld [vmem:[#allocation7 + $0x166] ss:$8 sm:$0xf] }
  0xc7   :  { %v1336_v51 = vadd.f32 %v1258_v44, %v1256_v38  ;;  %v1380_v52 = vmul.f32 %v1349_v19, %v7505_v31  ;;  %v1381_v53 = vmul.f32 %v1351_v20, %v7511_v33  ;;  %v1382_v54 = vmul.f32 %v1353_v22, %v7518_v39  ;;  %v1593_v26 = vld [vmem:[#allocation7 + $0x186] ss:$8 sm:$0xf] }
  0xc8   :  { %v1497_v55 = vrot.slane %v1481_v46, %v7494_v10  ;;  %v1504_v56 = vrot.slane %v1482_v47, %v7494_v10  ;;  %v1511_v57 = vrot.slane %v1483_v48, %v7494_v10  ;;  %v1383_v58 = vmul.f32 %v1355_v27, %v7526_v41  ;;  %v1595_v27 = vld [vmem:[#allocation7 + $0x1a6] ss:$8 sm:$0xf] }
  0xc9   :  { %v1337_v59 = vadd.f32 %v1336_v51, %v1257_v43  ;;  %v1384_v60 = vmul.f32 %v1357_v21, %v7508_v32  ;;  %v1385_v61 = vmul.f32 %v1359_v36, %v7514_v34  ;;  %v1386_v62 = vmul.f32 %v1361_v37, %v7522_v40  ;;  %v1597_v21 = vld [vmem:[#allocation7 + $0x1c6] ss:$8 sm:$0xf] }
  0xca   :  { %v1512_v63 = vcombine.low %v1490_v49, %v1497_v55  ;;  %v1513_v0 = vcombine.high %v1490_v49, %v1497_v55  ;;  %v1514_v1 = vcombine.low %v1504_v56, %v1511_v57  ;;  %v1515_v2 = vcombine.high %v1504_v56, %v1511_v57  ;;  %v1599_v36 = vld [vmem:[#allocation7 + $0x1e6] ss:$8 sm:$0xf] }
  0xcb   :  { %v1338_v4 = vadd.f32 %v1337_v59, %v1259_v45  ;;  %v1387_v5 = vmul.f32 %v1363_v50, %v7530_v42  ;;  %v1412_v11 = vcombine.low %v1380_v52, %v1381_v53  ;;  %v1413_v12 = vcombine.low %v1382_v54, %v1383_v58  ;;  %v1569_v57 = vld [vmem:[#allocation7 + $0x6] ss:$8 sm:$0xf] }
  0xcc   :  { %v1522_v16 = vrot.slane %v1512_v63, %v7494_v10  ;;  %v1529_v17 = vrot.slane %v1513_v0, %v7494_v10  ;;  %v1536_v18 = vrot.slane %v1514_v1, %v7494_v10  ;;  %v1543_v19 = vrot.slane %v1515_v2, %v7494_v10  ;;  %v1571_v58 = vld [vmem:[#allocation7 + $0x26] ss:$8 sm:$0xf] }
  0xcd   :  { %1339 = vadd.xlane.f32.xlu0 %v1338_v4  ;;  %v1414_v20 = vcombine.low %v1384_v60, %v1385_v61  ;;  %v1415_v22 = vcombine.low %v1386_v62, %v1387_v5  ;;  %v1422_v23 = vrot.slane %v1412_v11, %v7494_v10  ;;  %v1429_v24 = vrot.slane %v1413_v12, %v7494_v10  ;;  %v1573_v59 = vld [vmem:[#allocation7 + $0x46] ss:$8 sm:$0xf] }
  0xce   :  { %v1544_v28 = vcombine.low %v1522_v16, %v1536_v18  ;;  %v1545_v29 = vcombine.high %v1522_v16, %v1536_v18  ;;  %v1546_v30 = vcombine.low %v1529_v17, %v1543_v19  ;;  %v1547_v35 = vcombine.high %v1529_v17, %v1543_v19  ;;  %v1575_v0 = vld [vmem:[#allocation7 + $0x66] ss:$8 sm:$0xf] }
  0xcf   :  { %v1436_v37 = vrot.slane %v1414_v20, %v7494_v10  ;;  %v1443_v38 = vrot.slane %v1415_v22, %v7494_v10  ;;  %v1444_v43 = vcombine.low %v1422_v23, %v1429_v24  ;;  %v1445_v44 = vcombine.high %v1422_v23, %v1429_v24  ;;  %v1577_v11 = vld [vmem:[#allocation7 + $0x86] ss:$8 sm:$0xf] }
  0xd0   :  { %v1561_v45 = vadd.f32 %v1546_v30, %v1544_v28  ;;  %v1608_v46 = vmul.f32 %v1585_v13, %v7505_v31  ;;  %v1609_v47 = vmul.f32 %v1587_v14, %v7511_v33  ;;  %v1610_v48 = vmul.f32 %v1589_v15, %v7518_v39  ;;  %v1579_v12 = vld [vmem:[#allocation7 + $0xa6] ss:$8 sm:$0xf]  ;;  %v1805_v28 = vld [vmem:[#allocation7 + $0x107] ss:$8 sm:$0xf] }
  0xd1   :  { %v1446_v49 = vcombine.low %v1436_v37, %v1443_v38  ;;  %v1447_v50 = vcombine.high %v1436_v37, %v1443_v38  ;;  %v1454_v51 = vrot.slane %v1444_v43, %v7494_v10  ;;  %v1461_v52 = vrot.slane %v1445_v44, %v7494_v10  ;;  %v1581_v13 = vld [vmem:[#allocation7 + $0xc6] ss:$8 sm:$0xf] }
  0xd2   :  { %v1562_v53 = vadd.f32 %v1561_v45, %v1545_v29  ;;  %v1611_v54 = vmul.f32 %v1591_v25, %v7526_v41  ;;  %v1612_v55 = vmul.f32 %v1593_v26, %v7508_v32  ;;  %v1613_v56 = vmul.f32 %v1595_v27, %v7514_v34  ;;  %v1583_v23 = vld [vmem:[#allocation7 + $0xe6] ss:$8 sm:$0xf] }
  0xd3   :  { %v1468_v60 = vrot.slane %v1446_v49, %v7494_v10  ;;  %v1475_v61 = vrot.slane %v1447_v50, %v7494_v10  ;;  %v1614_v62 = vmul.f32 %v1597_v21, %v7522_v40  ;;  %v1615_v63 = vmul.f32 %v1599_v36, %v7530_v42  ;;  %v1807_v36 = vld [vmem:[#allocation7 + $0x127] ss:$8 sm:$0xf] }
  0xd4   :  { %v1563_v1 = vadd.f32 %v1562_v53, %v1547_v35  ;;  %v1700_v2 = vcombine.low %v1608_v46, %v1609_v47  ;;  %v1701_v4 = vcombine.low %v1610_v48, %v1611_v54  ;;  %v1702_v5 = vcombine.low %v1612_v55, %v1613_v56  ;;  %v1809_v53 = vld [vmem:[#allocation7 + $0x147] ss:$8 sm:$0xf] }
  0xd5   :  { %v1476_v14 = vcombine.low %v1454_v51, %v1468_v60  ;;  %v1477_v15 = vcombine.high %v1454_v51, %v1468_v60  ;;  %v1478_v16 = vcombine.low %v1461_v52, %v1475_v61  ;;  %v1479_v17 = vcombine.high %v1461_v52, %v1475_v61  ;;  %v1811_v54 = vld [vmem:[#allocation7 + $0x167] ss:$8 sm:$0xf] }
  0xd6   :  { %1564 = vadd.xlane.f32.xlu1 %v1563_v1  ;;  %v1703_v18 = vcombine.low %v1614_v62, %v1615_v63  ;;  %v1710_v19 = vrot.slane %v1700_v2, %v7494_v10  ;;  %v1717_v20 = vrot.slane %v1701_v4, %v7494_v10  ;;  %v1724_v22 = vrot.slane %v1702_v5, %v7494_v10  ;;  %v1813_v55 = vld [vmem:[#allocation7 + $0x187] ss:$8 sm:$0xf] }
  0xd7   :  { %v1556_v24 = vadd.f32 %v1478_v16, %v1476_v14  ;;  %v1600_v25 = vmul.f32 %v1569_v57, %v7505_v31  ;;  %v1601_v26 = vmul.f32 %v1571_v58, %v7511_v33  ;;  %v1602_v27 = vmul.f32 %v1573_v59, %v7518_v39  ;;  %v1815_v63 = vld [vmem:[#allocation7 + $0x1a7] ss:$8 sm:$0xf] }
  0xd8   :  { %v1731_v29 = vrot.slane %v1703_v18, %v7494_v10  ;;  %v1732_v30 = vcombine.low %v1710_v19, %v1717_v20  ;;  %v1733_v35 = vcombine.high %v1710_v19, %v1717_v20  ;;  %v1603_v21 = vmul.f32 %v1575_v0, %v7526_v41  ;;  %v1817_v0 = vld [vmem:[#allocation7 + $0x1c7] ss:$8 sm:$0xf] }
  0xd9   :  { %v1557_v37 = vadd.f32 %v1556_v24, %v1477_v15  ;;  %v1604_v38 = vmul.f32 %v1577_v11, %v7508_v32  ;;  %v1605_v43 = vmul.f32 %v1579_v12, %v7514_v34  ;;  %v1606_v44 = vmul.f32 %v1581_v13, %v7522_v40  ;;  %v1819_v1 = vld [vmem:[#allocation7 + $0x1e7] ss:$8 sm:$0xf] }
  0xda   :  { %v1734_v45 = vcombine.low %v1724_v22, %v1731_v29  ;;  %v1735_v46 = vcombine.high %v1724_v22, %v1731_v29  ;;  %v1742_v47 = vrot.slane %v1732_v30, %v7494_v10  ;;  %v1749_v48 = vrot.slane %v1733_v35, %v7494_v10  ;;  %v1791_v35 = vld [vmem:[#allocation7 + $0x27] ss:$8 sm:$0xf] }
  0xdb   :  { %v1558_v49 = vadd.f32 %v1557_v37, %v1479_v17  ;;  %v1607_v50 = vmul.f32 %v1583_v23, %v7530_v42  ;;  %v1632_v51 = vcombine.low %v1600_v25, %v1601_v26  ;;  %v1633_v52 = vcombine.low %v1602_v27, %v1603_v21  ;;  %v1789_v17 = vld [vmem:[#allocation7 + $0x7] ss:$8 sm:$0xf] }
  0xdc   :  { %v1756_v56 = vrot.slane %v1734_v45, %v7494_v10  ;;  %v1763_v57 = vrot.slane %v1735_v46, %v7494_v10  ;;  %v1634_v58 = vcombine.low %v1604_v38, %v1605_v43  ;;  %v1828_v59 = vmul.f32 %v1805_v28, %v7505_v31  ;;  %v1793_v21 = vld [vmem:[#allocation7 + $0x47] ss:$8 sm:$0xf] }
  0xdd   :  { %1559 = vadd.xlane.f32.xlu0 %v1558_v49  ;;  %v1635_v60 = vcombine.low %v1606_v44, %v1607_v50  ;;  %v1642_v61 = vrot.slane %v1632_v51, %v7494_v10  ;;  %v1649_v62 = vrot.slane %v1633_v52, %v7494_v10  ;;  %v1829_v2 = vmul.f32 %v1807_v36, %v7511_v33  ;;  %v1795_v36 = vld [vmem:[#allocation7 + $0x67] ss:$8 sm:$0xf] }
  0xde   :  { %v1764_v4 = vcombine.low %v1742_v47, %v1756_v56  ;;  %v1765_v5 = vcombine.high %v1742_v47, %v1756_v56  ;;  %v1766_v11 = vcombine.low %v1749_v48, %v1763_v57  ;;  %v1767_v12 = vcombine.high %v1749_v48, %v1763_v57  ;;  %v1797_v48 = vld [vmem:[#allocation7 + $0x87] ss:$8 sm:$0xf] }
  0xdf   :  { %v1656_v13 = vrot.slane %v1634_v58, %v7494_v10  ;;  %v1663_v14 = vrot.slane %v1635_v60, %v7494_v10  ;;  %v1664_v15 = vcombine.low %v1642_v61, %v1649_v62  ;;  %v1665_v16 = vcombine.high %v1642_v61, %v1649_v62  ;;  %v1799_v49 = vld [vmem:[#allocation7 + $0xa7] ss:$8 sm:$0xf] }
  0xe0   :  { %v1781_v18 = vadd.f32 %v1766_v11, %v1764_v4  ;;  %v1830_v19 = vmul.f32 %v1809_v53, %v7518_v39  ;;  %v1831_v20 = vmul.f32 %v1811_v54, %v7526_v41  ;;  %v1832_v22 = vmul.f32 %v1813_v55, %v7508_v32  ;;  %v1801_v50 = vld [vmem:[#allocation7 + $0xc7] ss:$8 sm:$0xf] }
  0xe1   :  { %v1666_v23 = vcombine.low %v1656_v13, %v1663_v14  ;;  %v1667_v24 = vcombine.high %v1656_v13, %v1663_v14  ;;  %v1674_v25 = vrot.slane %v1664_v15, %v7494_v10  ;;  %v1681_v26 = vrot.slane %v1665_v16, %v7494_v10  ;;  %v1803_v60 = vld [vmem:[#allocation7 + $0xe7] ss:$8 sm:$0xf] }
  0xe2   :  { %v1782_v27 = vadd.f32 %v1781_v18, %v1765_v5  ;;  %v1833_v28 = vmul.f32 %v1815_v63, %v7514_v34  ;;  %v1834_v29 = vmul.f32 %v1817_v0, %v7522_v40  ;;  %v1835_v30 = vmul.f32 %v1819_v1, %v7530_v42 }
  0xe3   :  { %v1688_v37 = vrot.slane %v1666_v23, %v7494_v10  ;;  %v1695_v38 = vrot.slane %v1667_v24, %v7494_v10  ;;  %v1920_v43 = vcombine.low %v1828_v59, %v1829_v2  ;;  %v1921_v44 = vcombine.low %v1830_v19, %v1831_v20 }
  0xe4   :  { %v1783_v45 = vadd.f32 %v1782_v27, %v1767_v12  ;;  %v1922_v46 = vcombine.low %v1832_v22, %v1833_v28  ;;  %v1923_v47 = vcombine.low %v1834_v29, %v1835_v30  ;;  %v1820_v51 = vmul.f32 %v1789_v17, %v7505_v31 }
  0xe5   :  { %v1696_v52 = vcombine.low %v1674_v25, %v1688_v37  ;;  %v1697_v53 = vcombine.high %v1674_v25, %v1688_v37  ;;  %v1698_v54 = vcombine.low %v1681_v26, %v1695_v38  ;;  %v1699_v55 = vcombine.high %v1681_v26, %v1695_v38 }
  0xe6   :  { %1784 = vadd.xlane.f32.xlu1 %v1783_v45  ;;  %v1930_v56 = vrot.slane %v1920_v43, %v7494_v10  ;;  %v1937_v57 = vrot.slane %v1921_v44, %v7494_v10  ;;  %v1944_v58 = vrot.slane %v1922_v46, %v7494_v10  ;;  %v1951_v59 = vrot.slane %v1923_v47, %v7494_v10 }
  0xe7   :  { %v1776_v61 = vadd.f32 %v1698_v54, %v1696_v52  ;;  %v1821_v62 = vmul.f32 %v1791_v35, %v7511_v33  ;;  %v1822_v63 = vmul.f32 %v1793_v21, %v7518_v39  ;;  %v1823_v31 = vmul.f32 %v1795_v36, %v7526_v41  ;;  %v6555_v52 = vld [vmem:[#allocation9 + $0x2e4] ss:$16 sps:$4 sm:$0xff]   ;;  %v6558_v54 = vld [vmem:[#allocation9 + $0x2e0] ss:$16 sps:$4 sm:$0xff]  }
  0xe8   :  { %v1952_v0 = vcombine.low %v1930_v56, %v1937_v57  ;;  %v1953_v1 = vcombine.high %v1930_v56, %v1937_v57  ;;  %v1954_v2 = vcombine.low %v1944_v58, %v1951_v59  ;;  %v1955_v4 = vcombine.high %v1944_v58, %v1951_v59  ;;  %4571 = vmatprep.subr.bf16.mxu1 %v6555_v52  ;;  %v6561_v56 = vld [vmem:[#allocation9 + $0x2c4] ss:$16 sps:$4 sm:$0xff]   ;;  %v6564_v57 = vld [vmem:[#allocation9 + $0x2c0] ss:$16 sps:$4 sm:$0xff]  }
  0xe9   :  { %v1777_v5 = vadd.f32 %v1776_v61, %v1697_v53  ;;  %v1824_v11 = vmul.f32 %v1797_v48, %v7508_v32  ;;  %v1825_v12 = vmul.f32 %v1799_v49, %v7514_v34  ;;  %v1826_v13 = vmul.f32 %v1801_v50, %v7522_v40  ;;  %v6557_v53 = vld [vmem:[#allocation9 + $0xe0] ss:$16 sps:$4 sm:$0xff]   ;;  %4572 = vmatpush1.bf16.msra.mxu1 %v6558_v54  ;;  %v6565_v58 = vld [vmem:[#allocation9 + $0xa4] ss:$16 sps:$4 sm:$0xff]  }
  0xea   :  { %v1962_v14 = vrot.slane %v1952_v0, %v7494_v10  ;;  %v1969_v15 = vrot.slane %v1953_v1, %v7494_v10  ;;  %v1976_v33 = vrot.slane %v1954_v2, %v7494_v10  ;;  %v1983_v39 = vrot.slane %v1955_v4, %v7494_v10  ;;  %4573 = vmatprep.subr.bf16.mxu1 %v6561_v56  ;;  %v6567_v59 = vld [vmem:[#allocation9 + $0x2a4] ss:$16 sps:$4 sm:$0xff]   ;;  %v6570_v61 = vld [vmem:[#allocation9 + $0x2a0] ss:$16 sps:$4 sm:$0xff]  }
  0xeb   :  { %v1778_v41 = vadd.f32 %v1777_v5, %v1699_v55  ;;  %v1827_v16 = vmul.f32 %v1803_v60, %v7530_v42  ;;  %v1852_v17 = vcombine.low %v1820_v51, %v1821_v62  ;;  %v1853_v18 = vcombine.low %v1822_v63, %v1823_v31  ;;  %v6553_v51 = vld [vmem:[#allocation9 + $0xe4] ss:$16 sps:$4 sm:$0xff]   ;;  %v6569_v60 = vld [vmem:[#allocation9 + $0xa0] ss:$16 sps:$4 sm:$0xff]  }
  0xec   :  { %v1984_v19 = vcombine.low %v1962_v14, %v1976_v33  ;;  %v1985_v20 = vcombine.high %v1962_v14, %v1976_v33  ;;  %v1986_v32 = vcombine.low %v1969_v15, %v1983_v39  ;;  %v1854_v34 = vcombine.low %v1824_v11, %v1825_v12  ;;  %v6559_v55 = vld [vmem:[#allocation9 + $0xc4] ss:$16 sps:$4 sm:$0xff]   ;;  %4528 = vmatprep.subr.bf16.mxu0 %v6553_v51  ;;  %v6575_v31 = vld [vmem:[#allocation9 + $0x80] ss:$16 sps:$4 sm:$0xff]  }
  0xed   :  { %1779 = vadd.xlane.f32.xlu0 %v1778_v41  ;;  %v1855_v22 = vcombine.low %v1826_v13, %v1827_v16  ;;  %v1862_v40 = vrot.slane %v1852_v17, %v7494_v10  ;;  %v1869_v23 = vrot.slane %v1853_v18, %v7494_v10  ;;  %v1987_v24 = vcombine.high %v1969_v15, %v1983_v39  ;;  %v6571_v62 = vld [vmem:[#allocation9 + $0x84] ss:$16 sps:$4 sm:$0xff]   ;;  %v6576_v0 = vld [vmem:[#allocation9 + $0x280] ss:$16 sps:$4 sm:$0xff]  }
  0xee   :  { %v2001_v25 = vadd.f32 %v1986_v32, %v1984_v19  ;;  %v1876_v26 = vrot.slane %v1854_v34, %v7494_v10  ;;  %4529 = vmatpush1.bf16.msra.mxu0 %v6557_v53  ;;  %4574 = vmatpush1.bf16.msra.mxu1 %v6564_v57  ;;  %v6573_v63 = vld [vmem:[#allocation9 + $0x284] ss:$16 sps:$4 sm:$0xff]   ;;  %v6581_v4 = vld [vmem:[#allocation9 + $0x60] ss:$16 sps:$4 sm:$0xff]  }
  0xef   :  { %v1883_v27 = vrot.slane %v1855_v22, %v7494_v10  ;;  %v1884_v28 = vcombine.low %v1862_v40, %v1869_v23  ;;  %v1885_v42 = vcombine.high %v1862_v40, %v1869_v23  ;;  %4530 = vmatprep.subr.bf16.mxu0 %v6559_v55  ;;  %4575 = vmatprep.subr.bf16.mxu1 %v6567_v59  ;;  %v6577_v1 = vld [vmem:[#allocation9 + $0x64] ss:$16 sps:$4 sm:$0xff]   ;;  %v6582_v5 = vld [vmem:[#allocation9 + $0x260] ss:$16 sps:$4 sm:$0xff]  }
  0xf0   :  { %v2002_v29 = vadd.f32 %v2001_v25, %v1985_v20  ;;  %v6579_v2 = vld [vmem:[#allocation9 + $0x264] ss:$16 sps:$4 sm:$0xff]   ;;  %v6587_v13 = vld [vmem:[#allocation9 + $0x40] ss:$16 sps:$4 sm:$0xff]  }
  0xf1   :  { %v1886_v30 = vcombine.low %v1876_v26, %v1883_v27  ;;  %v1887_v35 = vcombine.high %v1876_v26, %v1883_v27  ;;  %v1894_v21 = vrot.slane %v1884_v28, %v7494_v10  ;;  %v1901_v36 = vrot.slane %v1885_v42, %v7494_v10  ;;  %v6583_v11 = vld [vmem:[#allocation9 + $0x44] ss:$16 sps:$4 sm:$0xff]   ;;  %v6588_v14 = vld [vmem:[#allocation9 + $0x240] ss:$16 sps:$4 sm:$0xff]  }
  0xf2   :  { %v2003_v37 = vadd.f32 %v2002_v29, %v1987_v24  ;;  %4576 = vmatpush1.bf16.msra.mxu1 %v6570_v61  ;;  %v6585_v12 = vld [vmem:[#allocation9 + $0x244] ss:$16 sps:$4 sm:$0xff]   ;;  %v6593_v39 = vld [vmem:[#allocation9 + $0x20] ss:$16 sps:$4 sm:$0xff]  }
  0xf3   :  { %v1908_v38 = vrot.slane %v1886_v30, %v7494_v10  ;;  %v1915_v43 = vrot.slane %v1887_v35, %v7494_v10  ;;  %v6563_v10 = vld [vmem:[#allocation9 + $0xc0] ss:$16 sps:$4 sm:$0xff]   ;;  %4577 = vmatprep.subr.bf16.mxu1 %v6573_v63  ;;  %v6589_v15 = vld [vmem:[#allocation9 + $0x24] ss:$16 sps:$4 sm:$0xff]  }
  0xf4   :  { %2004 = vadd.xlane.f32.xlu1 %v2003_v37  ;;  %4531 = vmatpush1.bf16.msra.mxu0 %v6563_v10  ;;  %v6591_v33 = vld [vmem:[#allocation9 + $0x224] ss:$16 sps:$4 sm:$0xff]   ;;  %v6594_v41 = vld [vmem:[#allocation9 + $0x220] ss:$16 sps:$4 sm:$0xff]  }
  0xf5   :  { %v1916_v44 = vcombine.low %v1894_v21, %v1908_v38  ;;  %v1917_v45 = vcombine.high %v1894_v21, %v1908_v38  ;;  %v1918_v46 = vcombine.low %v1901_v36, %v1915_v43  ;;  %v1919_v47 = vcombine.high %v1901_v36, %v1915_v43  ;;  %4532 = vmatprep.subr.bf16.mxu0 %v6565_v58  ;;  %v6595_v16 = vld [vmem:[#allocation9 + $0x4] ss:$16 sps:$4 sm:$0xff]   ;;  %v6599_v18 = vld [vmem:[#allocation9] ss:$16 sps:$4 sm:$0xff]  }
  0xf6   :  { %4578 = vmatpush1.bf16.msra.mxu1 %v6576_v0  ;;  %v6597_v17 = vld [vmem:[#allocation9 + $0x204] ss:$16 sps:$4 sm:$0xff]   ;;  %v6600_v19 = vld [vmem:[#allocation9 + $0x200] ss:$16 sps:$4 sm:$0xff]  }
  0xf7   :  { %v1996_v48 = vadd.f32 %v1918_v46, %v1916_v44  ;;  %4579 = vmatprep.subr.bf16.mxu1 %v6579_v2  ;;  %v6601_v20 = vld [vmem:[#allocation9 + $0x1e4] ss:$16 sps:$4 sm:$0xff]   ;;  %v6605_v34 = vld [vmem:[#allocation9 + $0x1e0] ss:$16 sps:$4 sm:$0xff]  }
  0xf8   :  { %4533 = vmatpush1.bf16.msra.mxu0 %v6569_v60  ;;  %v6603_v32 = vld [vmem:[#allocation9 + $0x3e4] ss:$16 sps:$4 sm:$0xff]   ;;  %v6606_v22 = vld [vmem:[#allocation9 + $0x3e0] ss:$16 sps:$4 sm:$0xff]  }
  0xf9   :  { %v1997_v49 = vadd.f32 %v1996_v48, %v1917_v45  ;;  %4534 = vmatprep.subr.bf16.mxu0 %v6571_v62  ;;  %v6607_v40 = vld [vmem:[#allocation9 + $0x1c4] ss:$16 sps:$4 sm:$0xff]   ;;  %v6611_v24 = vld [vmem:[#allocation9 + $0x1c0] ss:$16 sps:$4 sm:$0xff]  }
  0xfa   :  { %4580 = vmatpush1.bf16.msra.mxu1 %v6582_v5  ;;  %v6609_v23 = vld [vmem:[#allocation9 + $0x3c4] ss:$16 sps:$4 sm:$0xff]   ;;  %v6612_v25 = vld [vmem:[#allocation9 + $0x3c0] ss:$16 sps:$4 sm:$0xff]  }
  0xfb   :  { %v1998_v50 = vadd.f32 %v1997_v49, %v1919_v47  ;;  %4581 = vmatprep.subr.bf16.mxu1 %v6585_v12  ;;  %v6613_v26 = vld [vmem:[#allocation9 + $0x1a4] ss:$16 sps:$4 sm:$0xff]   ;;  %v6617_v28 = vld [vmem:[#allocation9 + $0x1a0] ss:$16 sps:$4 sm:$0xff]  }
  0xfc   :  { %4535 = vmatpush1.bf16.msra.mxu0 %v6575_v31  ;;  %v6615_v27 = vld [vmem:[#allocation9 + $0x3a4] ss:$16 sps:$4 sm:$0xff]   ;;  %v6618_v42 = vld [vmem:[#allocation9 + $0x3a0] ss:$16 sps:$4 sm:$0xff]   ;;  %v465_v31 = vstv %s8892_s11 }
  0xfd   :  { %1999 = vadd.xlane.f32.xlu0 %v1998_v50  ;;  %4536 = vmatprep.subr.bf16.mxu0 %v6577_v1  ;;  %v6619_v29 = vld [vmem:[#allocation9 + $0x184] ss:$16 sps:$4 sm:$0xff]   ;;  %v6623_v35 = vld [vmem:[#allocation9 + $0x180] ss:$16 sps:$4 sm:$0xff]  }
  0xfe   :  { %4582 = vmatpush1.bf16.msra.mxu1 %v6588_v14  ;;  %v6621_v30 = vld [vmem:[#allocation9 + $0x384] ss:$16 sps:$4 sm:$0xff]   ;;  %v6624_v21 = vld [vmem:[#allocation9 + $0x380] ss:$16 sps:$4 sm:$0xff]  }
  0xff   :  { %4583 = vmatprep.subr.bf16.mxu1 %v6591_v33  ;;  %v6625_v36 = vld [vmem:[#allocation9 + $0x164] ss:$16 sps:$4 sm:$0xff]   ;;  %v6629_v38 = vld [vmem:[#allocation9 + $0x160] ss:$16 sps:$4 sm:$0xff]  }
 0x100   :  { %4537 = vmatpush1.bf16.msra.mxu0 %v6581_v4  ;;  %v6627_v37 = vld [vmem:[#allocation9 + $0x364] ss:$16 sps:$4 sm:$0xff]   ;;  %v6630_v43 = vld [vmem:[#allocation9 + $0x360] ss:$16 sps:$4 sm:$0xff]  }
 0x101   :  { %4538 = vmatprep.subr.bf16.mxu0 %v6583_v11  ;;  %v6631_v44 = vld [vmem:[#allocation9 + $0x144] ss:$16 sps:$4 sm:$0xff]   ;;  %v6635_v46 = vld [vmem:[#allocation9 + $0x140] ss:$16 sps:$4 sm:$0xff]  }
 0x102   :  { %4584 = vmatpush1.bf16.msra.mxu1 %v6594_v41  ;;  %v6633_v45 = vld [vmem:[#allocation9 + $0x344] ss:$16 sps:$4 sm:$0xff]   ;;  %v6636_v47 = vld [vmem:[#allocation9 + $0x340] ss:$16 sps:$4 sm:$0xff]  }
 0x103   :  { %4585 = vmatprep.subr.bf16.mxu1 %v6597_v17  ;;  %v6637_v48 = vld [vmem:[#allocation9 + $0x124] ss:$16 sps:$4 sm:$0xff]   ;;  %v6641_v50 = vld [vmem:[#allocation9 + $0x120] ss:$16 sps:$4 sm:$0xff]  }
 0x104   :  { %4539 = vmatpush1.bf16.msra.mxu0 %v6587_v13  ;;  %v6639_v49 = vld [vmem:[#allocation9 + $0x324] ss:$16 sps:$4 sm:$0xff]   ;;  %v6642_v51 = vld [vmem:[#allocation9 + $0x320] ss:$16 sps:$4 sm:$0xff]  }
 0x105   :  { %4540 = vmatprep.subr.bf16.mxu0 %v6589_v15  ;;  %v6643_v52 = vld [vmem:[#allocation9 + $0x104] ss:$16 sps:$4 sm:$0xff]   ;;  %v6647_v54 = vld [vmem:[#allocation9 + $0x100] ss:$16 sps:$4 sm:$0xff]  }
 0x106   :  { %4586 = vmatpush1.bf16.msra.mxu1 %v6600_v19  ;;  %v6645_v53 = vld [vmem:[#allocation9 + $0x304] ss:$16 sps:$4 sm:$0xff]   ;;  %v6648_v55 = vld [vmem:[#allocation9 + $0x300] ss:$16 sps:$4 sm:$0xff]  }
 0x107   :  { %4587 = vmatprep.subr.bf16.mxu1 %v6603_v32 }
 0x108   :  { %4541 = vmatpush1.bf16.msra.mxu0 %v6593_v39 }
 0x109   :  { %4542 = vmatprep.subr.bf16.mxu0 %v6595_v16 }
 0x10a   :  { %4588 = vmatpush2.bf16.msra.mxu1 %v6606_v22 }
 0x10b   :  { %4589 = vmatprep.subr.bf16.mxu1 %v6609_v23 }
 0x10c   :  { %4543 = vmatpush1.bf16.msra.mxu0 %v6599_v18 }
 0x10d   :  { %4544 = vmatprep.subr.bf16.mxu0 %v6601_v20 }
 0x10e   :  { %4590 = vmatpush2.bf16.msra.mxu1 %v6612_v25 }
 0x10f   :  { %4591 = vmatprep.subr.bf16.mxu1 %v6615_v27 }
 0x110   :  { %4545 = vmatpush2.bf16.msra.mxu0 %v6605_v34 }
 0x111   :  { %4546 = vmatprep.subr.bf16.mxu0 %v6607_v40 }
 0x112   :  { %4592 = vmatpush2.bf16.msra.mxu1 %v6618_v42 }
 0x113   :  { %4593 = vmatprep.subr.bf16.mxu1 %v6621_v30  ;;  %v680_v56 = vpop.xlane.xlu1 %679 }
 0x114   :  { %4547 = vmatpush2.bf16.msra.mxu0 %v6611_v24  ;;  %v686_v41 = vadd.f32 %v680_v56, %v465_v31 }
 0x115   :  { %4548 = vmatprep.subr.bf16.mxu0 %v6613_v26 }
 0x116   :  { %4594 = vmatpush2.bf16.msra.mxu1 %v6624_v21 }
 0x117   :  { %4595 = vmatprep.subr.bf16.mxu1 %v6627_v37 }
 0x118   :  { %4549 = vmatpush2.bf16.msra.mxu0 %v6617_v28  ;;  %v459_v57 = vpop.xlane.xlu0 %458 }
 0x119   :  { %4550 = vmatprep.subr.bf16.mxu0 %v6619_v29  ;;  %v466_v16 = vadd.f32 %v465_v31, %v459_v57 }
 0x11a   :  { %4596 = vmatpush2.bf16.msra.mxu1 %v6630_v43 }
 0x11b   :  { %4597 = vmatprep.subr.bf16.mxu1 %v6633_v45  ;;  %v2008_v34 = vmax.f32 %v466_v16, %v686_v41 }
 0x11c   :  { %4551 = vmatpush2.bf16.msra.mxu0 %v6623_v35 }
 0x11d   :  { %4552 = vmatprep.subr.bf16.mxu0 %v6625_v36 }
 0x11e   :  { %4598 = vmatpush2.bf16.msra.mxu1 %v6636_v47 }
 0x11f   :  { %4599 = vmatprep.subr.bf16.mxu1 %v6639_v49 }
 0x120   :  { %4553 = vmatpush2.bf16.msra.mxu0 %v6629_v38 }
 0x121   :  { %4554 = vmatprep.subr.bf16.mxu0 %v6631_v44  ;;  %v685_v10 = vpop.xlane.xlu1 %684 }
 0x122   :  { %4600 = vmatpush2.bf16.msra.mxu1 %v6642_v51  ;;  %v687_v0 = vadd.f32 %v685_v10, %v465_v31 }
 0x123   :  { %4601 = vmatprep.subr.bf16.mxu1 %v6645_v53 }
 0x124   :  { %4555 = vmatpush2.bf16.msra.mxu0 %v6635_v46 }
 0x125   :  { %4556 = vmatprep.subr.bf16.mxu0 %v6637_v48 }
 0x126   :  { %4602 = vmatpush2.bf16.msra.mxu1 %v6648_v55 }
 0x128   :  { %4557 = vmatpush2.bf16.msra.mxu0 %v6641_v50  ;;  %v464_v59 = vpop.xlane.xlu0 %463 }
 0x129   :  { %4558 = vmatprep.subr.bf16.mxu0 %v6643_v52  ;;  %v467_v1 = vadd.f32 %v465_v31, %v464_v59 }
 0x12b   :  { %v2009_v5 = vmax.f32 %v467_v1, %v687_v0 }
 0x12c   :  { %4559 = vmatpush2.bf16.msra.mxu0 %v6647_v54 }
 0x131   :  { %v905_v58 = vpop.xlane.xlu1 %904 }
 0x132   :  { %v907_v4 = vadd.f32 %v905_v58, %v465_v31 }
 0x134   :  { %v2011_v13 = vmax.f32 %v2009_v5, %v907_v4 }
 0x138   :  { %v900_v61 = vpop.xlane.xlu0 %899 }
 0x139   :  { %v906_v20 = vadd.f32 %v900_v61, %v465_v31 }
 0x13b   :  { %v2010_v25 = vmax.f32 %v2008_v34, %v906_v20 }
 0x13f   :  { %v1125_v60 = vpop.xlane.xlu1 %1124 }
 0x140   :  { %v1127_v11 = vadd.f32 %v1125_v60, %v465_v31 }
 0x142   :  { %v2013_v33 = vmax.f32 %v2011_v13, %v1127_v11  ;;  %v7792_v13 = vsub.s32 4, %v7476_v3 }
 0x148   :  { %v1120_v63 = vpop.xlane.xlu0 %1119 }
 0x149   :  { %v1126_v22 = vadd.f32 %v1120_v63, %v465_v31 }
 0x14b   :  { %v2012_v42 = vmax.f32 %v2010_v25, %v1126_v22 }
 0x14f   :  { %v1345_v62 = vpop.xlane.xlu1 %1344 }
 0x150   :  { %v1347_v14 = vadd.f32 %v1345_v62, %v465_v31 }
 0x152   :  { %v2015_v17 = vmax.f32 %v2013_v33, %v1347_v14  ;;  %v7798_v33 = vsub.s32 6, %v7476_v3 }
 0x156   :  { %v1340_v12 = vpop.xlane.xlu0 %1339 }
 0x157   :  { %v1346_v26 = vadd.f32 %v1340_v12, %v465_v31 }
 0x159   :  { %v2014_v36 = vmax.f32 %v2012_v42, %v1346_v26 }
 0x15f   :  { %v1565_v2 = vpop.xlane.xlu1 %1564 }
 0x160   :  { %v1567_v39 = vadd.f32 %v1565_v2, %v465_v31 }
 0x162   :  { %v2017_v32 = vmax.f32 %v2015_v17, %v1567_v39 }
 0x166   :  { %v1560_v18 = vpop.xlane.xlu0 %1559 }
 0x167   :  { %v1566_v29 = vadd.f32 %v1560_v18, %v465_v31 }
 0x169   :  { %v2016_v46 = vmax.f32 %v2014_v36, %v1566_v29  ;;  %v7043_v36 = vld [vmem:[#allocation7 + $0x140] ss:$8 sm:$0xf] }
 0x16f   :  { %v1785_v15 = vpop.xlane.xlu1 %1784 }
 0x170   :  { %v1787_v19 = vadd.f32 %v1785_v15, %v465_v31 }
 0x172   :  { %v2019_v23 = vmax.f32 %v2017_v32, %v1787_v19 }
 0x176   :  { %v1780_v27 = vpop.xlane.xlu0 %1779 }
 0x177   :  { %v1786_v37 = vadd.f32 %v1780_v27, %v465_v31 }
 0x179   :  { %v2018_v51 = vmax.f32 %v2016_v46, %v1786_v37 }
 0x17d   :  { %v2005_v40 = vpop.xlane.xlu1 %2004 }
 0x17e   :  { %v2007_v24 = vadd.f32 %v2005_v40, %v465_v31 }
 0x180   :  { %v2021_v28 = vmax.f32 %v2019_v23, %v2007_v24 }
 0x182   :  { %v2023_v30 = vsub.f32 %v467_v1, %v2021_v28  ;;  %v2029_v35 = vsub.f32 %v687_v0, %v2021_v28  ;;  %v2035_v21 = vsub.f32 %v907_v4, %v2021_v28  ;;  %v2041_v38 = vsub.f32 %v1127_v11, %v2021_v28 }
 0x183   :  { %v2047_v45 = vsub.f32 %v1347_v14, %v2021_v28  ;;  %v2053_v48 = vsub.f32 %v1567_v39, %v2021_v28  ;;  %v2059_v49 = vsub.f32 %v1787_v19, %v2021_v28  ;;  %v2065_v56 = vsub.f32 %v2007_v24, %v2021_v28  ;;  %v7041_v28 = vld [vmem:[#allocation7 + $0x100] ss:$8 sm:$0xf] }
 0x184   :  { %v2026_v43 = vmul.f32 1.442695, %v2023_v30  ;;  %v2032_v44 = vmul.f32 1.442695, %v2029_v35  ;;  %v2038_v47 = vmul.f32 1.442695, %v2035_v21 }
 0x185   :  { %v2044_v52 = vmul.f32 1.442695, %v2041_v38  ;;  %v2050_v54 = vmul.f32 1.442695, %v2047_v45  ;;  %v2056_v55 = vmul.f32 1.442695, %v2053_v48 }
 0x186   :  { %6985 = vpow2.f32 %v2026_v43  ;;  %v2000_v50 = vpop.xlane.xlu0 %1999  ;;  %v2062_v57 = vmul.f32 1.442695, %v2059_v49  ;;  %v2068_v63 = vmul.f32 1.442695, %v2065_v56  ;;  %v7795_v14 = vsub.s32 5, %v7476_v3 }
 0x187   :  { %6987 = vpow2.f32 %v2032_v44  ;;  %v2006_v53 = vadd.f32 %v2000_v50, %v465_v31  ;;  %v7801_v39 = vsub.s32 7, %v7476_v3  ;;  %v7044_v38 = vld [vmem:[#allocation7 + $0x160] ss:$8 sm:$0xf] }
 0x188   :  { %6989 = vpow2.f32 %v2038_v47  ;;  %v7045_v44 = vld [vmem:[#allocation7 + $0x180] ss:$8 sm:$0xf] }
 0x189   :  { %v2020_v10 = vmax.f32 %v2018_v51, %v2006_v53  ;;  %6991 = vpow2.f32 %v2044_v52  ;;  %v7046_v47 = vld [vmem:[#allocation7 + $0x1a0] ss:$8 sm:$0xf] }
 0x18a   :  { %6993 = vpow2.f32 %v2050_v54  ;;  %v7047_v49 = vld [vmem:[#allocation7 + $0x1c0] ss:$8 sm:$0xf] }
 0x18b   :  { %v2022_v58 = vsub.f32 %v466_v16, %v2020_v10  ;;  %v2028_v59 = vsub.f32 %v686_v41, %v2020_v10  ;;  %v2034_v60 = vsub.f32 %v906_v20, %v2020_v10  ;;  %v2040_v61 = vsub.f32 %v1126_v22, %v2020_v10  ;;  %v7048_v51 = vld [vmem:[#allocation7 + $0x1e0] ss:$8 sm:$0xf] }
 0x18c   :  { %v2046_v62 = vsub.f32 %v1346_v26, %v2020_v10  ;;  %6995 = vpow2.f32 %v2056_v55  ;;  %v2052_v31 = vsub.f32 %v1566_v29, %v2020_v10  ;;  %v2058_v5 = vsub.f32 %v1786_v37, %v2020_v10  ;;  %v7042_v29 = vld [vmem:[#allocation7 + $0x120] ss:$8 sm:$0xf] }
 0x18d   :  { %v2024_v0 = vmul.f32 1.442695, %v2022_v58  ;;  %v2030_v1 = vmul.f32 1.442695, %v2028_v59  ;;  %6997 = vpow2.f32 %v2062_v57  ;;  %v2036_v2 = vmul.f32 1.442695, %v2034_v60 }
 0x18e   :  { %v2042_v4 = vmul.f32 1.442695, %v2040_v61  ;;  %v2048_v11 = vmul.f32 1.442695, %v2046_v62  ;;  %v2064_v12 = vsub.f32 %v2006_v53, %v2020_v10  ;;  %v2054_v15 = vmul.f32 1.442695, %v2052_v31 }
 0x18f   :  { %6999 = vpow2.f32 %v2024_v0  ;;  %v2060_v16 = vmul.f32 1.442695, %v2058_v5  ;;  %v7061_v62 = vld [vmem:[#allocation7 + $0x41] ss:$8 sm:$0xf] }
 0x190   :  { %7001 = vpow2.f32 %v2030_v1  ;;  %v2066_v18 = vmul.f32 1.442695, %v2064_v12  ;;  %v7062_v60 = vld [vmem:[#allocation7 + $0x61] ss:$8 sm:$0xf] }
 0x191   :  { %7003 = vpow2.f32 %v2068_v63  ;;  %v7063_v57 = vld [vmem:[#allocation7 + $0x81] ss:$8 sm:$0xf] }
 0x192   :  { %7005 = vpow2.f32 %v2036_v2 }
 0x193   :  { %v6986_v41 = vpop.eup %6985  ;;  %7007 = vpow2.f32 %v2042_v4 }
 0x194   :  { %v7803_v17 = vpop.eup %6987  ;;  %7009 = vpow2.f32 %v2048_v11  ;;  %v2125_v19 = vrot.slane %v6986_v41, %v7482_v6  ;;  %v2129_v20 = vrot.slane %v6986_v41, %v7485_v7  ;;  %v2133_v34 = vrot.slane %v6986_v41, %v7488_v8 }
 0x195   :  { %v2071_v32 = vadd.f32 %v7803_v17, %v6986_v41  ;;  %v2137_v22 = vrot.slane %v6986_v41, %v7491_v9  ;;  %v2141_v3 = vrot.slane %v6986_v41, %v7792_v13  ;;  %v7811_v40 = vpop.eup %6989  ;;  %7011 = vpow2.f32 %v2054_v15  ;;  %v7049_v15 = vld [vmem:[#allocation7 + $0x101] ss:$8 sm:$0xf] }
 0x196   :  { %v2145_v23 = vrot.slane %v6986_v41, %v7795_v14  ;;  %v2149_v24 = vrot.slane %v6986_v41, %v7798_v33  ;;  %v2153_v25 = vrot.slane %v6986_v41, %v7801_v39  ;;  %7013 = vpow2.f32 %v2060_v16  ;;  %v7817_v27 = vpop.eup %6991 }
 0x197   :  { %v2073_v26 = vadd.f32 %v7811_v40, %v2071_v32  ;;  %7015 = vpow2.f32 %v2066_v18  ;;  %v7819_v42 = vmul.f32 %v7041_v28, %v2125_v19  ;;  %v7821_v30 = vmul.f32 %v7042_v29, %v2129_v20  ;;  %v7823_v35 = vpop.eup %6993  ;;  %v7050_v20 = vld [vmem:[#allocation7 + $0x121] ss:$8 sm:$0xf] }
 0x198   :  { %8910 = vst [vmem:[#allocation24_spill] sm:$0xff] %v7823_v35  ;;  %v7826_v37 = vmul.f32 %v7043_v36, %v2133_v34  ;;  %v7828_v43 = vmul.f32 %v7044_v38, %v2137_v22  ;;  %v7830_v45 = vmul.f32 %v7045_v44, %v2141_v3  ;;  %v7834_v48 = vmul.f32 %v7046_v47, %v2145_v23  ;;  %v7051_v34 = vld [vmem:[#allocation7 + $0x141] ss:$8 sm:$0xf] }
 0x199   :  { %v2075_v21 = vadd.f32 %v7817_v27, %v2073_v26  ;;  %v7832_v46 = vpop.eup %6995  ;;  %v7836_v50 = vmul.f32 %v7047_v49, %v2149_v24  ;;  %v7838_v52 = vmul.f32 %v7048_v51, %v2153_v25  ;;  %v2223_v53 = vrot.slane %v7803_v17, %v7482_v6  ;;  %v7052_v26 = vld [vmem:[#allocation7] ss:$8 sm:$0xf] }
 0x19a   :  { %8911 = vst [vmem:[#allocation25_spill] sm:$0xff] %v7832_v46  ;;  %v7842_v54 = vpop.eup %6997  ;;  %v2227_v56 = vrot.slane %v7803_v17, %v7485_v7  ;;  %v2231_v10 = vrot.slane %v7803_v17, %v7488_v8  ;;  %v7053_v36 = vld [vmem:[#allocation7 + $0x20] ss:$8 sm:$0xf] }
 0x19b   :  { %8912 = vst [vmem:[#allocation26_spill] sm:$0xff] %v7842_v54  ;;  %v2077_v55 = vadd.f32 %v7823_v35, %v2075_v21  ;;  %v7878_v41 = vmul.f32 %v7049_v15, %v2223_v53  ;;  %v7054_v44 = vld [vmem:[#allocation7 + $0x40] ss:$8 sm:$0xf] }
 0x19c   :  { %v7851_v58 = vpop.eup %6999  ;;  %v7885_v32 = vmul.f32 %v7050_v20, %v2227_v56  ;;  %v7887_v22 = vmul.f32 %v7051_v34, %v2231_v10  ;;  %v7055_v49 = vld [vmem:[#allocation7 + $0x60] ss:$8 sm:$0xf] }
 0x19d   :  { %v7861_v63 = vpop.eup %7001  ;;  %v2079_v0 = vadd.f32 %v7832_v46, %v2077_v55  ;;  %v2093_v1 = vrot.slane %v7851_v58, %v7482_v6  ;;  %v2097_v2 = vrot.slane %v7851_v58, %v7485_v7  ;;  %v2101_v31 = vrot.slane %v7851_v58, %v7488_v8  ;;  %v7056_v55 = vld [vmem:[#allocation7 + $0x80] ss:$8 sm:$0xf]  ;;  %v7065_v46 = vld [vmem:[#allocation7 + $0xa1] ss:$8 sm:$0xf] }
 0x19e   :  { %v7870_v4 = vpop.eup %7003  ;;  %v2070_v5 = vadd.f32 %v7861_v63, %v7851_v58  ;;  %v2105_v11 = vrot.slane %v7851_v58, %v7491_v9  ;;  %v2109_v12 = vrot.slane %v7851_v58, %v7792_v13  ;;  %v2113_v19 = vrot.slane %v7851_v58, %v7795_v14  ;;  %v7057_v34 = vld [vmem:[#allocation7 + $0xa0] ss:$8 sm:$0xf] }
 0x19f   :  { %8913 = vst [vmem:[#allocation27_spill] sm:$0xff] %v7870_v4  ;;  %v7880_v16 = vpop.eup %7005  ;;  %v2081_v18 = vadd.f32 %v7842_v54, %v2079_v0  ;;  %v2117_v24 = vrot.slane %v7851_v58, %v7798_v33  ;;  %v2121_v25 = vrot.slane %v7851_v58, %v7801_v39  ;;  %v2170_v28 = vmul.f32 %v7052_v26, %v2093_v1  ;;  %v7058_v26 = vld [vmem:[#allocation7 + $0xc0] ss:$8 sm:$0xf] }
 0x1a0   :  { %v7889_v3 = vpop.eup %7007  ;;  %v2072_v23 = vadd.f32 %v7880_v16, %v2070_v5  ;;  %v2171_v38 = vmul.f32 %v7053_v36, %v2097_v2  ;;  %v2172_v47 = vmul.f32 %v7054_v44, %v2101_v31  ;;  %v2173_v51 = vmul.f32 %v7055_v49, %v2105_v11  ;;  %v7059_v36 = vld [vmem:[#allocation7 + $0x1] ss:$8 sm:$0xf]  ;;  %v7064_v54 = vld [vmem:[#allocation7 + $0xe0] ss:$8 sm:$0xf] }
 0x1a1   :  { %v7896_v29 = vpop.eup %7009  ;;  %v2083_v21 = vadd.f32 %v7870_v4, %v2081_v18  ;;  %v2174_v56 = vmul.f32 %v7056_v55, %v2109_v12  ;;  %v2191_v10 = vrot.slane %v7861_v63, %v7482_v6  ;;  %v2195_v58 = vrot.slane %v7861_v63, %v7485_v7  ;;  %v7060_v49 = vld [vmem:[#allocation7 + $0x21] ss:$8 sm:$0xf] }
 0x1a2   :  { %8914 = vst [vmem:[#allocation28_spill] sm:$0xff] %v7896_v29  ;;  %v2074_v53 = vadd.f32 %v7889_v3, %v2072_v23  ;;  %v7904_v0 = vpop.eup %7011  ;;  %v2199_v1 = vrot.slane %v7861_v63, %v7488_v8  ;;  %v2203_v2 = vrot.slane %v7861_v63, %v7491_v9  ;;  %v2207_v31 = vrot.slane %v7861_v63, %v7792_v13 }
 0x1a3   :  { %7017 = vrcp.f32 %v2083_v21  ;;  %v7912_v5 = vpop.eup %7013  ;;  %v2211_v12 = vrot.slane %v7861_v63, %v7795_v14  ;;  %v2215_v15 = vrot.slane %v7861_v63, %v7798_v33  ;;  %v2219_v18 = vrot.slane %v7861_v63, %v7801_v39 }
 0x1a4   :  { %8915 = vst [vmem:[#allocation29_spill] sm:$0xff] %v7912_v5  ;;  %v2076_v11 = vadd.f32 %v7896_v29, %v2074_v53  ;;  %v7921_v20 = vpop.eup %7015  ;;  %v2175_v23 = vmul.f32 %v7057_v34, %v2113_v19  ;;  %v2176_v21 = vmul.f32 %v7058_v26, %v2117_v24  ;;  %v2268_v44 = vmul.f32 %v7059_v36, %v2191_v10  ;;  %v7066_v29 = vld [vmem:[#allocation7 + $0xc1] ss:$8 sm:$0xf] }
 0x1a5   :  { %8916 = vst [vmem:[#allocation30_spill] sm:$0xff] %v7921_v20  ;;  %v2269_v55 = vmul.f32 %v7060_v49, %v2195_v58  ;;  %v2270_v61 = vmul.f32 %v7061_v62, %v2199_v1  ;;  %v2271_v59 = vmul.f32 %v7062_v60, %v2203_v2  ;;  %v2272_v4 = vmul.f32 %v7063_v57, %v2207_v31  ;;  %v7067_v34 = vld [vmem:[#allocation7 + $0xe1] ss:$8 sm:$0xf]  ;;  %v6651_v49 = vld [vmem:[#allocation9 + $0xec] ss:$16 sps:$4 sm:$0xff]  }
 0x1a6   :  { %v2078_v53 = vadd.f32 %v7904_v0, %v2076_v11  ;;  %v2177_v63 = vmul.f32 %v7064_v54, %v2121_v25  ;;  %v2273_v35 = vmul.f32 %v7065_v46, %v2211_v12  ;;  %v2274_v19 = vmul.f32 %v7066_v29, %v2215_v15  ;;  %v7068_v26 = vld [vmem:[#allocation7 + $0x161] ss:$8 sm:$0xf]  ;;  %4614 = vmatprep.subr.bf16.mxu0 %v6651_v49 }
 0x1a7   :  { %v2275_v24 = vmul.f32 %v7067_v34, %v2219_v18  ;;  %v8917_v58 = vrot.slane %v7803_v17, %v7491_v9  ;;  %v7069_v62 = vld [vmem:[#allocation7 + $0x181] ss:$8 sm:$0xf]  ;;  %v8918_v60 = vrot.slane %v7803_v17, %v7792_v13  ;;  %v8919_v46 = vrot.slane %v7803_v17, %v7795_v14 }
 0x1a8   :  { %v2080_v10 = vadd.f32 %v7912_v5, %v2078_v53  ;;  %v7070_v1 = vld [vmem:[#allocation7 + $0x1a1] ss:$8 sm:$0xf]  ;;  %v8920_v29 = vrot.slane %v7803_v17, %v7798_v33  ;;  %v8921_v12 = vrot.slane %v7803_v17, %v7801_v39  ;;  %v7940_v18 = vadd.f32 %v2268_v44, %v2170_v28  ;;  %v7083_v5 = vld [vmem:[#allocation7 + $0x142] ss:$8 sm:$0xf] }
 0x1a9   :  { %v2279_v11 = vmul.f32 %v7068_v26, %v8917_v58  ;;  %v2280_v57 = vmul.f32 %v7069_v62, %v8918_v60  ;;  %v2281_v54 = vmul.f32 %v7070_v1, %v8919_v46  ;;  %v7071_v25 = vld [vmem:[#allocation7 + $0x1c1] ss:$8 sm:$0xf]  ;;  %v7942_v36 = vadd.f32 %v2269_v55, %v2171_v38  ;;  %v6654_v62 = vld [vmem:[#allocation9 + $0x2ec] ss:$16 sps:$4 sm:$0xff]  }
 0x1aa   :  { %v2282_v2 = vmul.f32 %v7071_v25, %v8920_v29  ;;  %v7072_v31 = vld [vmem:[#allocation7 + $0x1e1] ss:$8 sm:$0xf]  ;;  %v2082_v53 = vadd.f32 %v7921_v20, %v2080_v10  ;;  %v7945_v34 = vadd.f32 %v2270_v61, %v2172_v47  ;;  %v7947_v26 = vadd.f32 %v2271_v59, %v2173_v51  ;;  %4657 = vmatprep.subr.bf16.mxu1 %v6654_v62  ;;  %v7074_v10 = vld [vmem:[#allocation7 + $0x22] ss:$8 sm:$0xf] }
 0x1ab   :  { %v2283_v15 = vmul.f32 %v7072_v31, %v8921_v12  ;;  %v7949_v58 = vadd.f32 %v2272_v4, %v2174_v56  ;;  %v7951_v60 = vadd.f32 %v2273_v35, %v2175_v23  ;;  %v7953_v1 = vadd.f32 %v2274_v19, %v2176_v21  ;;  %v7073_v19 = vld [vmem:[#allocation7 + $0x2] ss:$8 sm:$0xf] }
 0x1ac   :  { %v7955_v17 = vadd.f32 %v2275_v24, %v2177_v63  ;;  %v7959_v28 = vadd.f32 %v7878_v41, %v7819_v42  ;;  %7019 = vrcp.f32 %v2082_v53  ;;  %v7963_v61 = vadd.f32 %v7885_v32, %v7821_v30  ;;  %v7077_v29 = vld [vmem:[#allocation7 + $0x82] ss:$8 sm:$0xf] }
 0x1ad   :  { %v7967_v59 = vadd.f32 %v7887_v22, %v7826_v37  ;;  %v7970_v35 = vadd.f32 %v2279_v11, %v7828_v43  ;;  %v7973_v4 = vadd.f32 %v2280_v57, %v7830_v45  ;;  %v7976_v42 = vadd.f32 %v2281_v54, %v7834_v48  ;;  %v7075_v57 = vld [vmem:[#allocation7 + $0x42] ss:$8 sm:$0xf] }
 0x1ae   :  { %v7979_v41 = vadd.f32 %v2282_v2, %v7836_v50  ;;  %v7982_v30 = vadd.f32 %v2283_v15, %v7838_v52  ;;  %v2305_v37 = vrot.slane %v7880_v16, %v7482_v6  ;;  %v2309_v43 = vrot.slane %v7880_v16, %v7485_v7  ;;  %v7076_v54 = vld [vmem:[#allocation7 + $0x62] ss:$8 sm:$0xf] }
 0x1af   :  { %v2313_v32 = vrot.slane %v7880_v16, %v7488_v8  ;;  %v2317_v45 = vrot.slane %v7880_v16, %v7491_v9  ;;  %v2321_v48 = vrot.slane %v7880_v16, %v7792_v13  ;;  %v2325_v50 = vrot.slane %v7880_v16, %v7795_v14  ;;  %v7078_v31 = vld [vmem:[#allocation7 + $0xa2] ss:$8 sm:$0xf] }
 0x1b0   :  { %v2329_v52 = vrot.slane %v7880_v16, %v7798_v33  ;;  %v2333_v22 = vrot.slane %v7880_v16, %v7801_v39  ;;  %v7018_v38 = vpop.eup %7017  ;;  %v2337_v47 = vrot.slane %v7811_v40, %v7482_v6  ;;  %v2341_v51 = vrot.slane %v7811_v40, %v7485_v7  ;;  %v7079_v15 = vld [vmem:[#allocation7 + $0xc2] ss:$8 sm:$0xf] }
 0x1b1   :  { %v2345_v56 = vrot.slane %v7811_v40, %v7488_v8  ;;  %v2349_v23 = vrot.slane %v7811_v40, %v7491_v9  ;;  %v2353_v21 = vrot.slane %v7811_v40, %v7792_v13  ;;  %v2357_v44 = vrot.slane %v7811_v40, %v7795_v14  ;;  %v7080_v53 = vld [vmem:[#allocation7 + $0xe2] ss:$8 sm:$0xf] }
 0x1b2   :  { %v2361_v16 = vrot.slane %v7811_v40, %v7798_v33  ;;  %v2365_v55 = vrot.slane %v7811_v40, %v7801_v39  ;;  %v8016_v63 = vmul.f32 0.125, %v7018_v38  ;;  %v2382_v24 = vmul.f32 %v7073_v19, %v2305_v37  ;;  %v7081_v20 = vld [vmem:[#allocation7 + $0x102] ss:$8 sm:$0xf] }
 0x1b3   :  { %v2383_v11 = vmul.f32 %v7074_v10, %v2309_v43  ;;  %v2384_v46 = vmul.f32 %v7075_v57, %v2313_v32  ;;  %v2385_v25 = vmul.f32 %v7076_v54, %v2317_v45  ;;  %v2386_v2 = vmul.f32 %v7077_v29, %v2321_v48  ;;  %v7082_v38 = vld [vmem:[#allocation7 + $0x122] ss:$8 sm:$0xf] }
 0x1b4   :  { %8922 = vst [vmem:[#allocation31_spill] sm:$0xff] %v8016_v63  ;;  %v2387_v12 = vmul.f32 %v7078_v31, %v2325_v50  ;;  %v2388_v49 = vmul.f32 %v7079_v15, %v2329_v52  ;;  %v2389_v62 = vmul.f32 %v7080_v53, %v2333_v22  ;;  %v2390_v40 = vmul.f32 %v7081_v20, %v2337_v47  ;;  %v7084_v19 = vld [vmem:[#allocation7 + $0x162] ss:$8 sm:$0xf] }
 0x1b5   :  { %v2391_v63 = vmul.f32 %v7082_v38, %v2341_v51  ;;  %v2392_v37 = vmul.f32 %v7083_v5, %v2345_v56  ;;  %v2393_v43 = vmul.f32 %v7084_v19, %v2349_v23  ;;  %v7085_v10 = vld [vmem:[#allocation7 + $0x182] ss:$8 sm:$0xf]  ;;  %v8019_v52 = vadd.f32 %v2382_v24, %v7940_v18  ;;  %v7093_v38 = vld [vmem:[#allocation7 + $0x83] ss:$8 sm:$0xf] }
 0x1b6   :  { %v2394_v32 = vmul.f32 %v7085_v10, %v2353_v21  ;;  %v7086_v57 = vld [vmem:[#allocation7 + $0x1a2] ss:$8 sm:$0xf]  ;;  %v8022_v22 = vadd.f32 %v2383_v11, %v7942_v36  ;;  %v8025_v20 = vadd.f32 %v2384_v46, %v7945_v34  ;;  %v8028_v5 = vadd.f32 %v2385_v25, %v7947_v26  ;;  %v7094_v19 = vld [vmem:[#allocation7 + $0xa3] ss:$8 sm:$0xf] }
 0x1b7   :  { %v2395_v45 = vmul.f32 %v7086_v57, %v2357_v44  ;;  %v7087_v54 = vld [vmem:[#allocation7 + $0x1c2] ss:$8 sm:$0xf]  ;;  %v8031_v47 = vadd.f32 %v2386_v2, %v7949_v58  ;;  %v8034_v51 = vadd.f32 %v2387_v12, %v7951_v60  ;;  %v8037_v56 = vadd.f32 %v2388_v49, %v7953_v1  ;;  %v7089_v2 = vld [vmem:[#allocation7 + $0x3] ss:$8 sm:$0xf] }
 0x1b8   :  { %v2396_v48 = vmul.f32 %v7087_v54, %v2361_v16  ;;  %v7088_v29 = vld [vmem:[#allocation7 + $0x1e2] ss:$8 sm:$0xf]  ;;  %v8040_v18 = vadd.f32 %v2389_v62, %v7955_v17  ;;  %v8043_v36 = vadd.f32 %v2390_v40, %v7959_v28  ;;  %v8046_v34 = vadd.f32 %v2391_v63, %v7963_v61  ;;  %v7090_v12 = vld [vmem:[#allocation7 + $0x23] ss:$8 sm:$0xf] }
 0x1b9   :  { %v2397_v50 = vmul.f32 %v7088_v29, %v2365_v55  ;;  %v8049_v26 = vadd.f32 %v2392_v37, %v7967_v59  ;;  %v7020_v58 = vpop.eup %7019  ;;  %v8052_v23 = vadd.f32 %v2393_v43, %v7970_v35  ;;  %v8055_v60 = vadd.f32 %v2394_v32, %v7973_v4  ;;  %v7091_v49 = vld [vmem:[#allocation7 + $0x43] ss:$8 sm:$0xf] }
 0x1ba   :  { %v8058_v1 = vadd.f32 %v2395_v45, %v7976_v42  ;;  %v8061_v17 = vadd.f32 %v2396_v48, %v7979_v41  ;;  %v2419_v61 = vrot.slane %v7889_v3, %v7482_v6  ;;  %v2423_v59 = vrot.slane %v7889_v3, %v7485_v7  ;;  %v7092_v62 = vld [vmem:[#allocation7 + $0x63] ss:$8 sm:$0xf] }
 0x1bb   :  { %v8064_v28 = vadd.f32 %v2397_v50, %v7982_v30  ;;  %v2427_v35 = vrot.slane %v7889_v3, %v7488_v8  ;;  %v8072_v4 = vmul.f32 0.125, %v7020_v58  ;;  %v2431_v42 = vrot.slane %v7889_v3, %v7491_v9  ;;  %v7095_v10 = vld [vmem:[#allocation7 + $0xc3] ss:$8 sm:$0xf] }
 0x1bc   :  { %v2435_v41 = vrot.slane %v7889_v3, %v7792_v13  ;;  %v2439_v30 = vrot.slane %v7889_v3, %v7795_v14  ;;  %v2443_v21 = vrot.slane %v7889_v3, %v7798_v33  ;;  %v2447_v44 = vrot.slane %v7889_v3, %v7801_v39  ;;  %v7096_v57 = vld [vmem:[#allocation7 + $0xe3] ss:$8 sm:$0xf] }
 0x1bd   :  { %v2451_v16 = vrot.slane %v7817_v27, %v7482_v6  ;;  %v2455_v55 = vrot.slane %v7817_v27, %v7485_v7  ;;  %v2459_v63 = vrot.slane %v7817_v27, %v7488_v8  ;;  %v2463_v24 = vrot.slane %v7817_v27, %v7491_v9  ;;  %v7097_v54 = vld [vmem:[#allocation7 + $0x103] ss:$8 sm:$0xf] }
 0x1be   :  { %v2467_v11 = vrot.slane %v7817_v27, %v7792_v13  ;;  %v2471_v46 = vrot.slane %v7817_v27, %v7795_v14  ;;  %v2475_v3 = vrot.slane %v7817_v27, %v7798_v33  ;;  %v2479_v25 = vrot.slane %v7817_v27, %v7801_v39  ;;  %v7098_v29 = vld [vmem:[#allocation7 + $0x123] ss:$8 sm:$0xf] }
 0x1bf   :  { %v2496_v31 = vmul.f32 %v7089_v2, %v2419_v61  ;;  %v2497_v15 = vmul.f32 %v7090_v12, %v2423_v59  ;;  %v2498_v53 = vmul.f32 %v7091_v49, %v2427_v35  ;;  %v2499_v40 = vmul.f32 %v7092_v62, %v2431_v42  ;;  %v7099_v50 = vld [vmem:[#allocation7 + $0x143] ss:$8 sm:$0xf] }
 0x1c0   :  { %v2500_v37 = vmul.f32 %v7093_v38, %v2435_v41  ;;  %v2501_v43 = vmul.f32 %v7094_v19, %v2439_v30  ;;  %v2502_v32 = vmul.f32 %v7095_v10, %v2443_v21  ;;  %v2503_v45 = vmul.f32 %v7096_v57, %v2447_v44  ;;  %v7100_v61 = vld [vmem:[#allocation7 + $0x163] ss:$8 sm:$0xf]  ;;  %v7105_v10 = vld [vmem:[#allocation7 + $0x4] ss:$8 sm:$0xf] }
 0x1c1   :  { %v2504_v48 = vmul.f32 %v7097_v54, %v2451_v16  ;;  %v2505_v27 = vmul.f32 %v7098_v29, %v2455_v55  ;;  %v2506_v58 = vmul.f32 %v7099_v50, %v2459_v63  ;;  %v2507_v59 = vmul.f32 %v7100_v61, %v2463_v24  ;;  %v7101_v2 = vld [vmem:[#allocation7 + $0x183] ss:$8 sm:$0xf]  ;;  %v7106_v57 = vld [vmem:[#allocation7 + $0x24] ss:$8 sm:$0xf] }
 0x1c2   :  { %v2508_v35 = vmul.f32 %v7101_v2, %v2467_v11  ;;  %v7102_v12 = vld [vmem:[#allocation7 + $0x1a3] ss:$8 sm:$0xf]  ;;  %v8101_v21 = vadd.f32 %v2496_v31, %v8019_v52  ;;  %v8104_v44 = vadd.f32 %v2497_v15, %v8022_v22  ;;  %v8107_v16 = vadd.f32 %v2498_v53, %v8025_v20  ;;  %v7107_v54 = vld [vmem:[#allocation7 + $0x44] ss:$8 sm:$0xf] }
 0x1c3   :  { %v2509_v42 = vmul.f32 %v7102_v12, %v2471_v46  ;;  %v7103_v49 = vld [vmem:[#allocation7 + $0x1c3] ss:$8 sm:$0xf]  ;;  %v8110_v55 = vadd.f32 %v2499_v40, %v8028_v5  ;;  %v8113_v63 = vadd.f32 %v2500_v37, %v8031_v47  ;;  %v8116_v24 = vadd.f32 %v2501_v43, %v8034_v51  ;;  %v7108_v29 = vld [vmem:[#allocation7 + $0x64] ss:$8 sm:$0xf] }
 0x1c4   :  { %v2510_v41 = vmul.f32 %v7103_v49, %v2475_v3  ;;  %v7104_v62 = vld [vmem:[#allocation7 + $0x1e3] ss:$8 sm:$0xf]  ;;  %v8119_v11 = vadd.f32 %v2502_v32, %v8037_v56  ;;  %v8122_v52 = vadd.f32 %v2503_v45, %v8040_v18  ;;  %v8125_v22 = vadd.f32 %v2504_v48, %v8043_v36  ;;  %v7109_v50 = vld [vmem:[#allocation7 + $0x84] ss:$8 sm:$0xf] }
 0x1c5   :  { %v2511_v30 = vmul.f32 %v7104_v62, %v2479_v25  ;;  %v8128_v20 = vadd.f32 %v2505_v27, %v8046_v34  ;;  %v8131_v5 = vadd.f32 %v2506_v58, %v8049_v26  ;;  %v8134_v47 = vadd.f32 %v2507_v59, %v8052_v23  ;;  %v8923_v34 = vld [vmem:[#allocation28_spill] sm:$0xff] }
 0x1c6   :  { %v8137_v51 = vadd.f32 %v2508_v35, %v8055_v60  ;;  %v8140_v56 = vadd.f32 %v2509_v42, %v8058_v1  ;;  %v8143_v18 = vadd.f32 %v2510_v41, %v8061_v17  ;;  %v2533_v46 = vrot.slane %v8923_v34, %v7482_v6  ;;  %v8924_v25 = vld [vmem:[#allocation24_spill] sm:$0xff] }
 0x1c7   :  { %v8146_v36 = vadd.f32 %v2511_v30, %v8064_v28  ;;  %v2537_v26 = vrot.slane %v8923_v34, %v7485_v7  ;;  %v2541_v23 = vrot.slane %v8923_v34, %v7488_v8  ;;  %v2545_v60 = vrot.slane %v8923_v34, %v7491_v9  ;;  %v7110_v61 = vld [vmem:[#allocation7 + $0xa4] ss:$8 sm:$0xf] }
 0x1c8   :  { %v2549_v1 = vrot.slane %v8923_v34, %v7792_v13  ;;  %v2553_v17 = vrot.slane %v8923_v34, %v7795_v14  ;;  %v2557_v28 = vrot.slane %v8923_v34, %v7798_v33  ;;  %v2561_v3 = vrot.slane %v8923_v34, %v7801_v39  ;;  %v7111_v2 = vld [vmem:[#allocation7 + $0xc4] ss:$8 sm:$0xf] }
 0x1c9   :  { %v2565_v31 = vrot.slane %v8924_v25, %v7482_v6  ;;  %v2569_v15 = vrot.slane %v8924_v25, %v7485_v7  ;;  %v2573_v53 = vrot.slane %v8924_v25, %v7488_v8  ;;  %v2577_v40 = vrot.slane %v8924_v25, %v7491_v9  ;;  %v7112_v12 = vld [vmem:[#allocation7 + $0xe4] ss:$8 sm:$0xf] }
 0x1ca   :  { %v2581_v38 = vrot.slane %v8924_v25, %v7792_v13  ;;  %v2585_v37 = vrot.slane %v8924_v25, %v7795_v14  ;;  %v2589_v19 = vrot.slane %v8924_v25, %v7798_v33  ;;  %v2593_v43 = vrot.slane %v8924_v25, %v7801_v39  ;;  %v7113_v49 = vld [vmem:[#allocation7 + $0x104] ss:$8 sm:$0xf] }
 0x1cb   :  { %v2610_v32 = vmul.f32 %v7105_v10, %v2533_v46  ;;  %v2611_v45 = vmul.f32 %v7106_v57, %v2537_v26  ;;  %v2612_v48 = vmul.f32 %v7107_v54, %v2541_v23  ;;  %v2613_v27 = vmul.f32 %v7108_v29, %v2545_v60  ;;  %v7114_v62 = vld [vmem:[#allocation7 + $0x124] ss:$8 sm:$0xf] }
 0x1cc   :  { %v2614_v58 = vmul.f32 %v7109_v50, %v2549_v1  ;;  %v2615_v59 = vmul.f32 %v7110_v61, %v2553_v17  ;;  %v2616_v35 = vmul.f32 %v7111_v2, %v2557_v28  ;;  %v2617_v42 = vmul.f32 %v7112_v12, %v2561_v3  ;;  %v7115_v34 = vld [vmem:[#allocation7 + $0x144] ss:$8 sm:$0xf]  ;;  %v7121_v61 = vld [vmem:[#allocation7 + $0x5] ss:$8 sm:$0xf] }
 0x1cd   :  { %v2618_v41 = vmul.f32 %v7113_v49, %v2565_v31  ;;  %v2619_v30 = vmul.f32 %v7114_v62, %v2569_v15  ;;  %v2620_v46 = vmul.f32 %v7115_v34, %v2573_v53  ;;  %v7116_v25 = vld [vmem:[#allocation7 + $0x164] ss:$8 sm:$0xf]  ;;  %v8181_v28 = vadd.f32 %v2610_v32, %v8101_v21  ;;  %v7122_v2 = vld [vmem:[#allocation7 + $0x25] ss:$8 sm:$0xf] }
 0x1ce   :  { %v2621_v26 = vmul.f32 %v7116_v25, %v2577_v40  ;;  %v7117_v10 = vld [vmem:[#allocation7 + $0x184] ss:$8 sm:$0xf]  ;;  %v8184_v3 = vadd.f32 %v2611_v45, %v8104_v44  ;;  %v8187_v31 = vadd.f32 %v2612_v48, %v8107_v16  ;;  %v8190_v15 = vadd.f32 %v2613_v27, %v8110_v55  ;;  %v7123_v12 = vld [vmem:[#allocation7 + $0x45] ss:$8 sm:$0xf] }
 0x1cf   :  { %v2622_v23 = vmul.f32 %v7117_v10, %v2581_v38  ;;  %v7118_v57 = vld [vmem:[#allocation7 + $0x1a4] ss:$8 sm:$0xf]  ;;  %v8193_v53 = vadd.f32 %v2614_v58, %v8113_v63  ;;  %v8196_v40 = vadd.f32 %v2615_v59, %v8116_v24  ;;  %v8199_v38 = vadd.f32 %v2616_v35, %v8119_v11  ;;  %v7124_v49 = vld [vmem:[#allocation7 + $0x65] ss:$8 sm:$0xf] }
 0x1d0   :  { %v2623_v60 = vmul.f32 %v7118_v57, %v2585_v37  ;;  %v7119_v54 = vld [vmem:[#allocation7 + $0x1c4] ss:$8 sm:$0xf]  ;;  %v8202_v21 = vadd.f32 %v2617_v42, %v8122_v52  ;;  %v8205_v44 = vadd.f32 %v2618_v41, %v8125_v22  ;;  %v8208_v16 = vadd.f32 %v2619_v30, %v8128_v20  ;;  %v7125_v62 = vld [vmem:[#allocation7 + $0x85] ss:$8 sm:$0xf] }
 0x1d1   :  { %v2624_v1 = vmul.f32 %v7119_v54, %v2589_v19  ;;  %v7120_v29 = vld [vmem:[#allocation7 + $0x1e4] ss:$8 sm:$0xf]  ;;  %v8211_v55 = vadd.f32 %v2620_v46, %v8131_v5  ;;  %v8214_v63 = vadd.f32 %v2621_v26, %v8134_v47  ;;  %v8217_v24 = vadd.f32 %v2622_v23, %v8137_v51  ;;  %v7126_v34 = vld [vmem:[#allocation7 + $0xa5] ss:$8 sm:$0xf] }
 0x1d2   :  { %v2625_v17 = vmul.f32 %v7120_v29, %v2593_v43  ;;  %v8220_v11 = vadd.f32 %v2623_v60, %v8140_v56  ;;  %v2647_v20 = vrot.slane %v7904_v0, %v7482_v6  ;;  %v2651_v5 = vrot.slane %v7904_v0, %v7485_v7  ;;  %v8925_v19 = vld [vmem:[#allocation25_spill] sm:$0xff] }
 0x1d3   :  { %v8223_v52 = vadd.f32 %v2624_v1, %v8143_v18  ;;  %v2655_v47 = vrot.slane %v7904_v0, %v7488_v8  ;;  %v2659_v51 = vrot.slane %v7904_v0, %v7491_v9  ;;  %v2663_v56 = vrot.slane %v7904_v0, %v7792_v13  ;;  %v7127_v25 = vld [vmem:[#allocation7 + $0xc5] ss:$8 sm:$0xf] }
 0x1d4   :  { %v8226_v22 = vadd.f32 %v2625_v17, %v8146_v36  ;;  %v2667_v18 = vrot.slane %v7904_v0, %v7795_v14  ;;  %v2671_v36 = vrot.slane %v7904_v0, %v7798_v33  ;;  %v2675_v37 = vrot.slane %v7904_v0, %v7801_v39  ;;  %v7128_v10 = vld [vmem:[#allocation7 + $0xe5] ss:$8 sm:$0xf] }
 0x1d5   :  { %v2679_v43 = vrot.slane %v8925_v19, %v7482_v6  ;;  %v2683_v32 = vrot.slane %v8925_v19, %v7485_v7  ;;  %v2687_v45 = vrot.slane %v8925_v19, %v7488_v8  ;;  %v2691_v48 = vrot.slane %v8925_v19, %v7491_v9  ;;  %v7129_v57 = vld [vmem:[#allocation7 + $0x105] ss:$8 sm:$0xf] }
 0x1d6   :  { %v2695_v27 = vrot.slane %v8925_v19, %v7792_v13  ;;  %v2699_v50 = vrot.slane %v8925_v19, %v7795_v14  ;;  %v2703_v0 = vrot.slane %v8925_v19, %v7798_v33  ;;  %v2707_v58 = vrot.slane %v8925_v19, %v7801_v39  ;;  %v7130_v54 = vld [vmem:[#allocation7 + $0x125] ss:$8 sm:$0xf] }
 0x1d7   :  { %v2724_v59 = vmul.f32 %v7121_v61, %v2647_v20  ;;  %v2725_v35 = vmul.f32 %v7122_v2, %v2651_v5  ;;  %v2726_v42 = vmul.f32 %v7123_v12, %v2655_v47  ;;  %v2727_v41 = vmul.f32 %v7124_v49, %v2659_v51  ;;  %v7131_v29 = vld [vmem:[#allocation7 + $0x145] ss:$8 sm:$0xf] }
 0x1d8   :  { %v2728_v30 = vmul.f32 %v7125_v62, %v2663_v56  ;;  %v2729_v46 = vmul.f32 %v7126_v34, %v2667_v18  ;;  %v2730_v26 = vmul.f32 %v7127_v25, %v2671_v36  ;;  %v2731_v23 = vmul.f32 %v7128_v10, %v2675_v37  ;;  %v7132_v20 = vld [vmem:[#allocation7 + $0x165] ss:$8 sm:$0xf] }
 0x1d9   :  { %v2732_v60 = vmul.f32 %v7129_v57, %v2679_v43  ;;  %v2733_v1 = vmul.f32 %v7130_v54, %v2683_v32  ;;  %v2734_v17 = vmul.f32 %v7131_v29, %v2687_v45  ;;  %v2735_v5 = vmul.f32 %v7132_v20, %v2691_v48  ;;  %v7133_v19 = vld [vmem:[#allocation7 + $0x185] ss:$8 sm:$0xf] }
 0x1da   :  { %v2736_v47 = vmul.f32 %v7133_v19, %v2695_v27  ;;  %v7134_v61 = vld [vmem:[#allocation7 + $0x1a5] ss:$8 sm:$0xf]  ;;  %v8261_v36 = vadd.f32 %v2724_v59, %v8181_v28  ;;  %v8264_v37 = vadd.f32 %v2725_v35, %v8184_v3  ;;  %v8267_v43 = vadd.f32 %v2726_v42, %v8187_v31 }
 0x1db   :  { %v2737_v51 = vmul.f32 %v7134_v61, %v2699_v50  ;;  %v7135_v2 = vld [vmem:[#allocation7 + $0x1c5] ss:$8 sm:$0xf]  ;;  %v8270_v32 = vadd.f32 %v2727_v41, %v8190_v15  ;;  %v8273_v45 = vadd.f32 %v2728_v30, %v8193_v53  ;;  %v8276_v48 = vadd.f32 %v2729_v46, %v8196_v40  ;;  %v7137_v46 = vld [vmem:[#allocation7 + $0x6] ss:$8 sm:$0xf] }
 0x1dc   :  { %v2738_v56 = vmul.f32 %v7135_v2, %v2703_v0  ;;  %v7136_v12 = vld [vmem:[#allocation7 + $0x1e5] ss:$8 sm:$0xf]  ;;  %v8279_v27 = vadd.f32 %v2730_v26, %v8199_v38  ;;  %v8282_v28 = vadd.f32 %v2731_v23, %v8202_v21  ;;  %v8285_v3 = vadd.f32 %v2732_v60, %v8205_v44  ;;  %v7138_v26 = vld [vmem:[#allocation7 + $0x26] ss:$8 sm:$0xf] }
 0x1dd   :  { %v2739_v18 = vmul.f32 %v7136_v12, %v2707_v58  ;;  %v8288_v31 = vadd.f32 %v2733_v1, %v8208_v16  ;;  %v8291_v15 = vadd.f32 %v2734_v17, %v8211_v55  ;;  %v8294_v53 = vadd.f32 %v2735_v5, %v8214_v63  ;;  %v8926_v16 = vld [vmem:[#allocation29_spill] sm:$0xff]  ;;  %v8927_v58 = vld [vmem:[#allocation26_spill] sm:$0xff] }
 0x1de   :  { %v8297_v40 = vadd.f32 %v2736_v47, %v8217_v24  ;;  %v8300_v38 = vadd.f32 %v2737_v51, %v8220_v11  ;;  %v8303_v21 = vadd.f32 %v2738_v56, %v8223_v52  ;;  %v2761_v50 = vrot.slane %v8926_v16, %v7482_v6  ;;  %v7139_v23 = vld [vmem:[#allocation7 + $0x46] ss:$8 sm:$0xf] }
 0x1df   :  { %v8306_v44 = vadd.f32 %v2739_v18, %v8226_v22  ;;  %v2765_v55 = vrot.slane %v8926_v16, %v7485_v7  ;;  %v2769_v63 = vrot.slane %v8926_v16, %v7488_v8  ;;  %v2773_v24 = vrot.slane %v8926_v16, %v7491_v9  ;;  %v7140_v60 = vld [vmem:[#allocation7 + $0x66] ss:$8 sm:$0xf] }
 0x1e0   :  { %v2777_v11 = vrot.slane %v8926_v16, %v7792_v13  ;;  %v2781_v52 = vrot.slane %v8926_v16, %v7795_v14  ;;  %v2785_v22 = vrot.slane %v8926_v16, %v7798_v33  ;;  %v2789_v0 = vrot.slane %v8926_v16, %v7801_v39  ;;  %v7141_v1 = vld [vmem:[#allocation7 + $0x86] ss:$8 sm:$0xf] }
 0x1e1   :  { %v2793_v59 = vrot.slane %v8927_v58, %v7482_v6  ;;  %v2797_v35 = vrot.slane %v8927_v58, %v7485_v7  ;;  %v2801_v42 = vrot.slane %v8927_v58, %v7488_v8  ;;  %v2805_v49 = vrot.slane %v8927_v58, %v7491_v9  ;;  %v7142_v17 = vld [vmem:[#allocation7 + $0xa6] ss:$8 sm:$0xf] }
 0x1e2   :  { %v2809_v41 = vrot.slane %v8927_v58, %v7792_v13  ;;  %v2813_v62 = vrot.slane %v8927_v58, %v7795_v14  ;;  %v2817_v30 = vrot.slane %v8927_v58, %v7798_v33  ;;  %v2821_v34 = vrot.slane %v8927_v58, %v7801_v39  ;;  %v7143_v5 = vld [vmem:[#allocation7 + $0xc6] ss:$8 sm:$0xf] }
 0x1e3   :  { %v2838_v25 = vmul.f32 %v7137_v46, %v2761_v50  ;;  %v2839_v10 = vmul.f32 %v7138_v26, %v2765_v55  ;;  %v2840_v57 = vmul.f32 %v7139_v23, %v2769_v63  ;;  %v2841_v54 = vmul.f32 %v7140_v60, %v2773_v24  ;;  %v7144_v47 = vld [vmem:[#allocation7 + $0xe6] ss:$8 sm:$0xf] }
 0x1e4   :  { %v2842_v29 = vmul.f32 %v7141_v1, %v2777_v11  ;;  %v2843_v20 = vmul.f32 %v7142_v17, %v2781_v52  ;;  %v2844_v19 = vmul.f32 %v7143_v5, %v2785_v22  ;;  %v2845_v61 = vmul.f32 %v7144_v47, %v2789_v0  ;;  %v7145_v51 = vld [vmem:[#allocation7 + $0x106] ss:$8 sm:$0xf] }
 0x1e5   :  { %v2846_v2 = vmul.f32 %v7145_v51, %v2793_v59  ;;  %v7146_v56 = vld [vmem:[#allocation7 + $0x126] ss:$8 sm:$0xf]  ;;  %v8341_v22 = vadd.f32 %v2838_v25, %v8261_v36  ;;  %v8344_v0 = vadd.f32 %v2839_v10, %v8264_v37  ;;  %v8347_v59 = vadd.f32 %v2840_v57, %v8267_v43 }
 0x1e6   :  { %v2847_v12 = vmul.f32 %v7146_v56, %v2797_v35  ;;  %v7147_v18 = vld [vmem:[#allocation7 + $0x146] ss:$8 sm:$0xf]  ;;  %v8350_v35 = vadd.f32 %v2841_v54, %v8270_v32  ;;  %v8362_v36 = vadd.f32 %v2845_v61, %v8282_v28  ;;  %v7155_v61 = vld [vmem:[#allocation7 + $0x47] ss:$8 sm:$0xf] }
 0x1e7   :  { %v2848_v16 = vmul.f32 %v7147_v18, %v2801_v42  ;;  %v7148_v50 = vld [vmem:[#allocation7 + $0x166] ss:$8 sm:$0xf]  ;;  %v8353_v42 = vadd.f32 %v2842_v29, %v8273_v45  ;;  %v8365_v37 = vadd.f32 %v2846_v2, %v8285_v3  ;;  %v7156_v2 = vld [vmem:[#allocation7 + $0x67] ss:$8 sm:$0xf] }
 0x1e8   :  { %v2849_v55 = vmul.f32 %v7148_v50, %v2805_v49  ;;  %v7149_v58 = vld [vmem:[#allocation7 + $0x186] ss:$8 sm:$0xf]  ;;  %v8356_v49 = vadd.f32 %v2843_v20, %v8276_v48  ;;  %v8368_v43 = vadd.f32 %v2847_v12, %v8288_v31  ;;  %v7153_v20 = vld [vmem:[#allocation7 + $0x7] ss:$8 sm:$0xf] }
 0x1e9   :  { %v2850_v63 = vmul.f32 %v7149_v58, %v2809_v41  ;;  %v7150_v46 = vld [vmem:[#allocation7 + $0x1a6] ss:$8 sm:$0xf]  ;;  %v8359_v41 = vadd.f32 %v2844_v19, %v8279_v27  ;;  %v8371_v32 = vadd.f32 %v2848_v16, %v8291_v15  ;;  %v7154_v19 = vld [vmem:[#allocation7 + $0x27] ss:$8 sm:$0xf] }
 0x1ea   :  { %v2851_v24 = vmul.f32 %v7150_v46, %v2813_v62  ;;  %v7151_v26 = vld [vmem:[#allocation7 + $0x1c6] ss:$8 sm:$0xf]  ;;  %v8374_v45 = vadd.f32 %v2849_v55, %v8294_v53  ;;  %v7157_v12 = vld [vmem:[#allocation7 + $0x87] ss:$8 sm:$0xf] }
 0x1eb   :  { %v2852_v11 = vmul.f32 %v7151_v26, %v2817_v30  ;;  %v7152_v23 = vld [vmem:[#allocation7 + $0x1e6] ss:$8 sm:$0xf]  ;;  %v8377_v48 = vadd.f32 %v2850_v63, %v8297_v40  ;;  %v7158_v16 = vld [vmem:[#allocation7 + $0xa7] ss:$8 sm:$0xf] }
 0x1ec   :  { %v2853_v52 = vmul.f32 %v7152_v23, %v2821_v34  ;;  %v8380_v27 = vadd.f32 %v2851_v24, %v8300_v38  ;;  %v8928_v31 = vld [vmem:[#allocation30_spill] sm:$0xff]  ;;  %v8929_v34 = vld [vmem:[#allocation27_spill] sm:$0xff] }
 0x1ed   :  { %v8383_v28 = vadd.f32 %v2852_v11, %v8303_v21  ;;  %v2875_v62 = vrot.slane %v8928_v31, %v7482_v6  ;;  %v2879_v15 = vrot.slane %v8928_v31, %v7485_v7  ;;  %v2883_v53 = vrot.slane %v8928_v31, %v7488_v8  ;;  %v7159_v55 = vld [vmem:[#allocation7 + $0xc7] ss:$8 sm:$0xf] }
 0x1ee   :  { %v8386_v3 = vadd.f32 %v2853_v52, %v8306_v44  ;;  %v2887_v40 = vrot.slane %v8928_v31, %v7491_v9  ;;  %v2891_v38 = vrot.slane %v8928_v31, %v7792_v13  ;;  %v2895_v21 = vrot.slane %v8928_v31, %v7795_v14  ;;  %v7160_v63 = vld [vmem:[#allocation7 + $0xe7] ss:$8 sm:$0xf] }
 0x1ef   :  { %v2899_v44 = vrot.slane %v8928_v31, %v7798_v33  ;;  %v2903_v30 = vrot.slane %v8928_v31, %v7801_v39  ;;  %v2907_v25 = vrot.slane %v8929_v34, %v7482_v6  ;;  %v2911_v10 = vrot.slane %v8929_v34, %v7485_v7  ;;  %v7161_v24 = vld [vmem:[#allocation7 + $0x107] ss:$8 sm:$0xf] }
 0x1f0   :  { %v2915_v57 = vrot.slane %v8929_v34, %v7488_v8  ;;  %v2919_v60 = vrot.slane %v8929_v34, %v7491_v9  ;;  %v2923_v54 = vrot.slane %v8929_v34, %v7792_v13  ;;  %v2927_v1 = vrot.slane %v8929_v34, %v7795_v14  ;;  %v7162_v11 = vld [vmem:[#allocation7 + $0x127] ss:$8 sm:$0xf] }
 0x1f1   :  { %v2931_v29 = vrot.slane %v8929_v34, %v7798_v33  ;;  %v2935_v17 = vrot.slane %v8929_v34, %v7801_v39  ;;  %v2952_v5 = vmul.f32 %v7153_v20, %v2875_v62  ;;  %v2953_v47 = vmul.f32 %v7154_v19, %v2879_v15  ;;  %v7163_v52 = vld [vmem:[#allocation7 + $0x147] ss:$8 sm:$0xf] }
 0x1f2   :  { %v2954_v51 = vmul.f32 %v7155_v61, %v2883_v53  ;;  %v2955_v56 = vmul.f32 %v7156_v2, %v2887_v40  ;;  %v2956_v18 = vmul.f32 %v7157_v12, %v2891_v38  ;;  %v2957_v50 = vmul.f32 %v7158_v16, %v2895_v21  ;;  %v7164_v62 = vld [vmem:[#allocation7 + $0x167] ss:$8 sm:$0xf] }
 0x1f3   :  { %v2958_v58 = vmul.f32 %v7159_v55, %v2899_v44  ;;  %v2959_v46 = vmul.f32 %v7160_v63, %v2903_v30  ;;  %v2960_v26 = vmul.f32 %v7161_v24, %v2907_v25  ;;  %v2961_v23 = vmul.f32 %v7162_v11, %v2911_v10  ;;  %v7165_v34 = vld [vmem:[#allocation7 + $0x187] ss:$8 sm:$0xf] }
 0x1f4   :  { %v2962_v31 = vmul.f32 %v7163_v52, %v2915_v57  ;;  %v2963_v15 = vmul.f32 %v7164_v62, %v2919_v60  ;;  %v2964_v53 = vmul.f32 %v7165_v34, %v2923_v54  ;;  %v7166_v20 = vld [vmem:[#allocation7 + $0x1a7] ss:$8 sm:$0xf]  ;;  %v2968_v44 = vadd.f32 %v2952_v5, %v8341_v22 }
 0x1f5   :  { %v2965_v40 = vmul.f32 %v7166_v20, %v2927_v1  ;;  %v7167_v19 = vld [vmem:[#allocation7 + $0x1c7] ss:$8 sm:$0xf]  ;;  %v2969_v30 = vadd.f32 %v2953_v47, %v8344_v0  ;;  %v2970_v25 = vadd.f32 %v2954_v51, %v8347_v59  ;;  %v2971_v10 = vadd.f32 %v2955_v56, %v8350_v35 }
 0x1f6   :  { %v2966_v38 = vmul.f32 %v7167_v19, %v2931_v29  ;;  %v7168_v61 = vld [vmem:[#allocation7 + $0x1e7] ss:$8 sm:$0xf]  ;;  %v2972_v57 = vadd.f32 %v2956_v18, %v8353_v42  ;;  %v2973_v60 = vadd.f32 %v2957_v50, %v8356_v49  ;;  %v2974_v54 = vadd.f32 %v2958_v58, %v8359_v41 }
 0x1f7   :  { %v2967_v21 = vmul.f32 %v7168_v61, %v2935_v17  ;;  %v2975_v1 = vadd.f32 %v2959_v46, %v8362_v36  ;;  %v2976_v29 = vadd.f32 %v2960_v26, %v8365_v37  ;;  %v2977_v17 = vadd.f32 %v2961_v23, %v8368_v43 }
 0x1f8   :  { %v2978_v22 = vadd.f32 %v2962_v31, %v8371_v32  ;;  %v2979_v0 = vadd.f32 %v2963_v15, %v8374_v45  ;;  %v2993_v59 = vrot.slane %v8072_v4, %v7485_v7  ;;  %v2997_v35 = vrot.slane %v8072_v4, %v7488_v8  ;;  %v8930_v32 = vld [vmem:[#allocation31_spill] sm:$0xff] }
 0x1f9   :  { %v2980_v42 = vadd.f32 %v2964_v53, %v8377_v48  ;;  %v2981_v49 = vadd.f32 %v2965_v40, %v8380_v27  ;;  %v2982_v41 = vadd.f32 %v2966_v38, %v8383_v28  ;;  %v2983_v36 = vadd.f32 %v2967_v21, %v8386_v3 }
 0x1fa   :  { %v2989_v37 = vrot.slane %v8072_v4, %v7482_v6  ;;  %v3001_v43 = vrot.slane %v8072_v4, %v7491_v9  ;;  %v3025_v45 = vrot.slane %v8930_v32, %v7485_v7  ;;  %v3029_v5 = vrot.slane %v8930_v32, %v7488_v8 }
 0x1fb   :  { %v3005_v48 = vrot.slane %v8072_v4, %v7792_v13  ;;  %v3009_v27 = vrot.slane %v8072_v4, %v7795_v14  ;;  %v3013_v28 = vrot.slane %v8072_v4, %v7798_v33  ;;  %v3017_v3 = vrot.slane %v8072_v4, %v7801_v39 }
 0x1fc   :  { %v3021_v47 = vrot.slane %v8930_v32, %v7482_v6  ;;  %v3033_v51 = vrot.slane %v8930_v32, %v7491_v9  ;;  %v8460_v2 = vmul.f32 %v2993_v59, %v2969_v30  ;;  %v8462_v56 = vmul.f32 %v2997_v35, %v2970_v25 }
 0x1fd   :  { %v3037_v12 = vrot.slane %v8930_v32, %v7792_v13  ;;  %v3041_v18 = vrot.slane %v8930_v32, %v7795_v14  ;;  %v3045_v16 = vrot.slane %v8930_v32, %v7798_v33  ;;  %v3049_v4 = vrot.slane %v8930_v32, %v7801_v39 }
 0x1fe   :  { %v8472_v50 = vmul.f32 %v2989_v37, %v2968_v44  ;;  %v8474_v55 = vmul.f32 %v3001_v43, %v2971_v10  ;;  %v8476_v58 = vmul.f32 %v3025_v45, %v2977_v17  ;;  %v8478_v63 = vmul.f32 %v3029_v5, %v2978_v22 }
 0x1ff   :  { %v8480_v46 = vmul.f32 %v3005_v48, %v2972_v57  ;;  %v8482_v24 = vmul.f32 %v3009_v27, %v2973_v60  ;;  %v8484_v26 = vmul.f32 %v3013_v28, %v2974_v54  ;;  %v8486_v11 = vmul.f32 %v3017_v3, %v2975_v1 }
 0x200   :  { %v8488_v23 = vmul.f32 %v3021_v47, %v2976_v29  ;;  %v8490_v52 = vmul.f32 %v3033_v51, %v2979_v0  ;;  %v3121_v31 = vrot.slane %v8460_v2, %v7485_v7  ;;  %v3137_v62 = vrot.slane %v8462_v56, %v7485_v7 }
 0x201   :  { %v8496_v15 = vmul.f32 %v3037_v12, %v2980_v42  ;;  %v8498_v34 = vmul.f32 %v3041_v18, %v2981_v49  ;;  %v8500_v53 = vmul.f32 %v3045_v16, %v2982_v41  ;;  %v8502_v20 = vmul.f32 %v3049_v4, %v2983_v36 }
 0x202   :  { %v3105_v40 = vrot.slane %v8472_v50, %v7485_v7  ;;  %v3153_v19 = vrot.slane %v8474_v55, %v7485_v7  ;;  %v3249_v38 = vrot.slane %v8476_v58, %v7485_v7  ;;  %v3265_v61 = vrot.slane %v8478_v63, %v7485_v7 }
 0x203   :  { %v3169_v21 = vrot.slane %v8480_v46, %v7485_v7  ;;  %v3185_v44 = vrot.slane %v8482_v24, %v7485_v7  ;;  %v3201_v30 = vrot.slane %v8484_v26, %v7485_v7  ;;  %v3217_v25 = vrot.slane %v8486_v11, %v7485_v7 }
 0x204   :  { %v3233_v10 = vrot.slane %v8488_v23, %v7485_v7  ;;  %v3281_v57 = vrot.slane %v8490_v52, %v7485_v7  ;;  %v3423_v60 = vpack.c.bf16 %v3121_v31, %v3121_v31  ;;  %v3427_v54 = vpack.c.bf16 %v3137_v62, %v3137_v62 }
 0x205   :  { %v3297_v1 = vrot.slane %v8496_v15, %v7485_v7  ;;  %v3313_v29 = vrot.slane %v8498_v34, %v7485_v7  ;;  %v3329_v17 = vrot.slane %v8500_v53, %v7485_v7  ;;  %v3345_v22 = vrot.slane %v8502_v20, %v7485_v7 }
 0x206   :  { %v3419_v0 = vpack.c.bf16 %v3105_v40, %v3105_v40  ;;  %v3431_v59 = vpack.c.bf16 %v3153_v19, %v3153_v19  ;;  %v3455_v35 = vpack.c.bf16 %v3249_v38, %v3249_v38  ;;  %v3459_v42 = vpack.c.bf16 %v3265_v61, %v3265_v61 }
 0x207   :  { %v3435_v49 = vpack.c.bf16 %v3169_v21, %v3169_v21  ;;  %v3439_v41 = vpack.c.bf16 %v3185_v44, %v3185_v44  ;;  %v3443_v36 = vpack.c.bf16 %v3201_v30, %v3201_v30  ;;  %v3447_v37 = vpack.c.bf16 %v3217_v25, %v3217_v25 }
 0x208   :  { %v3451_v43 = vpack.c.bf16 %v3233_v10, %v3233_v10  ;;  %v3463_v32 = vpack.c.bf16 %v3281_v57, %v3281_v57  ;;  %v3702_v45 = vunpack.c.l.b16 %v3423_v60  ;;  %v3706_v5 = vunpack.c.l.b16 %v3427_v54 }
 0x209   :  { %v3467_v48 = vpack.c.bf16 %v3297_v1, %v3297_v1  ;;  %v3471_v27 = vpack.c.bf16 %v3313_v29, %v3313_v29  ;;  %v3475_v28 = vpack.c.bf16 %v3329_v17, %v3329_v17  ;;  %v3479_v3 = vpack.c.bf16 %v3345_v22, %v3345_v22 }
 0x20a   :  { %v3698_v47 = vunpack.c.l.b16 %v3419_v0  ;;  %v3710_v51 = vunpack.c.l.b16 %v3431_v59  ;;  %v3734_v12 = vunpack.c.l.b16 %v3455_v35  ;;  %v3738_v18 = vunpack.c.l.b16 %v3459_v42 }
 0x20b   :  { %v3714_v16 = vunpack.c.l.b16 %v3435_v49  ;;  %v3718_v4 = vunpack.c.l.b16 %v3439_v41  ;;  %v3722_v31 = vunpack.c.l.b16 %v3443_v36  ;;  %v3726_v62 = vunpack.c.l.b16 %v3447_v37 }
 0x20c   :  { %v3730_v40 = vunpack.c.l.b16 %v3451_v43  ;;  %v3742_v19 = vunpack.c.l.b16 %v3463_v32  ;;  %v3782_v38 = vrot.slane %v3702_v45, 7  ;;  %v3784_v61 = vrot.slane %v3706_v5, 6 }
 0x20d   :  { %v3746_v21 = vunpack.c.l.b16 %v3467_v48  ;;  %v3750_v44 = vunpack.c.l.b16 %v3471_v27  ;;  %v3754_v30 = vunpack.c.l.b16 %v3475_v28  ;;  %v3758_v25 = vunpack.c.l.b16 %v3479_v3 }
 0x20e   :  { %v3783_v10 = vsel %vm3762_vm0, %v3782_v38, %v3698_v47  ;;  %v3786_v57 = vrot.slane %v3710_v51, 5  ;;  %v3838_v60 = vrot.slane %v3734_v12, 7  ;;  %v3840_v54 = vrot.slane %v3738_v18, 6 }
 0x20f   :  { %v3785_v1 = vsel %vm3765_vm1, %v3784_v61, %v3783_v10  ;;  %v3788_v29 = vrot.slane %v3714_v16, 4  ;;  %v3790_v17 = vrot.slane %v3718_v4, 3  ;;  %v3792_v22 = vrot.slane %v3722_v31, 2 }
 0x210   :  { %v3787_v0 = vsel %vm3768_vm2, %v3786_v57, %v3785_v1  ;;  %v3794_v59 = vrot.slane %v3726_v62, 1  ;;  %v3839_v35 = vsel %vm3762_vm0, %v3838_v60, %v3730_v40  ;;  %v3842_v42 = vrot.slane %v3742_v19, 5 }
 0x211   :  { %v3789_v49 = vsel %vm3771_vm3, %v3788_v29, %v3787_v0  ;;  %v3841_v41 = vsel %vm3765_vm1, %v3840_v54, %v3839_v35  ;;  %v3844_v36 = vrot.slane %v3746_v21, 4  ;;  %v3846_v37 = vrot.slane %v3750_v44, 3 }
 0x212   :  { %v3791_v43 = vsel %vm3774_vm4, %v3790_v17, %v3789_v49  ;;  %v3843_v32 = vsel %vm3768_vm2, %v3842_v42, %v3841_v41  ;;  %v3848_v45 = vrot.slane %v3754_v30, 2  ;;  %v3850_v5 = vrot.slane %v3758_v25, 1 }
 0x213   :  { %v3793_v48 = vsel %vm3777_vm5, %v3792_v22, %v3791_v43  ;;  %v3845_v27 = vsel %vm3771_vm3, %v3844_v36, %v3843_v32  ;;  %v3113_v28 = vrot.slane %v8472_v50, %v7491_v9  ;;  %v3129_v3 = vrot.slane %v8460_v2, %v7491_v9 }
 0x214   :  { %v3795_v47 = vsel %vm3780_vm6, %v3794_v59, %v3793_v48  ;;  %v3847_v51 = vsel %vm3774_vm4, %v3846_v37, %v3845_v27  ;;  %v3145_v12 = vrot.slane %v8462_v56, %v7491_v9  ;;  %v3161_v18 = vrot.slane %v8474_v55, %v7491_v9 }
 0x215   :  { %v3849_v16 = vsel %vm3777_vm5, %v3848_v45, %v3847_v51  ;;  %v3177_v4 = vrot.slane %v8480_v46, %v7491_v9  ;;  %v3193_v31 = vrot.slane %v8482_v24, %v7491_v9  ;;  %v3257_v62 = vrot.slane %v8476_v58, %v7491_v9 }
 0x216   :  { %v3851_v40 = vsel %vm3780_vm6, %v3850_v5, %v3849_v16  ;;  %v3209_v19 = vrot.slane %v8484_v26, %v7491_v9  ;;  %v3225_v38 = vrot.slane %v8486_v11, %v7491_v9  ;;  %v3273_v61 = vrot.slane %v8478_v63, %v7491_v9 }
 0x217   :  { %v8566_v21 = vpack.c.b16 %v3851_v40, %v3795_v47  ;;  %v3241_v44 = vrot.slane %v8488_v23, %v7491_v9  ;;  %v3289_v30 = vrot.slane %v8490_v52, %v7491_v9  ;;  %v3425_v25 = vpack.c.bf16 %v3129_v3, %v3129_v3 }
 0x218   :  { %v3305_v10 = vrot.slane %v8496_v15, %v7491_v9  ;;  %v3321_v57 = vrot.slane %v8498_v34, %v7491_v9  ;;  %v3337_v60 = vrot.slane %v8500_v53, %v7491_v9  ;;  %v3429_v54 = vpack.c.bf16 %v3145_v12, %v3145_v12 }
 0x219   :  { %4560 = vmatprep.mubr.bf16.mxu0 %v8566_v21  ;;  %v3353_v1 = vrot.slane %v8502_v20, %v7491_v9  ;;  %v3421_v29 = vpack.c.bf16 %v3113_v28, %v3113_v28  ;;  %v3433_v17 = vpack.c.bf16 %v3161_v18, %v3161_v18  ;;  %v3457_v22 = vpack.c.bf16 %v3257_v62, %v3257_v62 }
 0x21a   :  { %v3437_v0 = vpack.c.bf16 %v3177_v4, %v3177_v4  ;;  %v3441_v59 = vpack.c.bf16 %v3193_v31, %v3193_v31  ;;  %v3445_v35 = vpack.c.bf16 %v3209_v19, %v3209_v19  ;;  %v3461_v42 = vpack.c.bf16 %v3273_v61, %v3273_v61 }
 0x21b   :  { %v3449_v49 = vpack.c.bf16 %v3225_v38, %v3225_v38  ;;  %v3453_v41 = vpack.c.bf16 %v3241_v44, %v3241_v44  ;;  %v3465_v36 = vpack.c.bf16 %v3289_v30, %v3289_v30  ;;  %v3704_v37 = vunpack.c.l.b16 %v3425_v25 }
 0x21c   :  { %v3469_v43 = vpack.c.bf16 %v3305_v10, %v3305_v10  ;;  %v3473_v32 = vpack.c.bf16 %v3321_v57, %v3321_v57  ;;  %v3477_v45 = vpack.c.bf16 %v3337_v60, %v3337_v60  ;;  %v3708_v5 = vunpack.c.l.b16 %v3429_v54 }
 0x21d   :  { %v3481_v48 = vpack.c.bf16 %v3353_v1, %v3353_v1  ;;  %v3700_v27 = vunpack.c.l.b16 %v3421_v29  ;;  %v3712_v3 = vunpack.c.l.b16 %v3433_v17  ;;  %v3736_v47 = vunpack.c.l.b16 %v3457_v22 }
 0x21e   :  { %v3716_v51 = vunpack.c.l.b16 %v3437_v0  ;;  %v3720_v28 = vunpack.c.l.b16 %v3441_v59  ;;  %v3724_v12 = vunpack.c.l.b16 %v3445_v35  ;;  %v3740_v18 = vunpack.c.l.b16 %v3461_v42 }
 0x21f   :  { %v3728_v16 = vunpack.c.l.b16 %v3449_v49  ;;  %v3744_v4 = vunpack.c.l.b16 %v3465_v36  ;;  %v3810_v31 = vrot.slane %v3704_v37, 7  ;;  %v3812_v62 = vrot.slane %v3708_v5, 6 }
 0x220   :  { %v3732_v40 = vunpack.c.l.b16 %v3453_v41  ;;  %v3748_v19 = vunpack.c.l.b16 %v3469_v43  ;;  %v3752_v38 = vunpack.c.l.b16 %v3473_v32  ;;  %v3756_v61 = vunpack.c.l.b16 %v3477_v45 }
 0x221   :  { %v3811_v44 = vsel %vm3762_vm0, %v3810_v31, %v3700_v27  ;;  %v3814_v30 = vrot.slane %v3712_v3, 5  ;;  %v3866_v25 = vrot.slane %v3736_v47, 7  ;;  %v3868_v10 = vrot.slane %v3740_v18, 6 }
 0x222   :  { %v3760_v57 = vunpack.c.l.b16 %v3481_v48  ;;  %v3813_v60 = vsel %vm3765_vm1, %v3812_v62, %v3811_v44  ;;  %v3816_v54 = vrot.slane %v3716_v51, 4  ;;  %v3818_v1 = vrot.slane %v3720_v28, 3 }
 0x223   :  { %v3815_v29 = vsel %vm3768_vm2, %v3814_v30, %v3813_v60  ;;  %v3820_v17 = vrot.slane %v3724_v12, 2  ;;  %v3867_v22 = vsel %vm3762_vm0, %v3866_v25, %v3732_v40  ;;  %v3870_v0 = vrot.slane %v3744_v4, 5 }
 0x224   :  { %v3817_v59 = vsel %vm3771_vm3, %v3816_v54, %v3815_v29  ;;  %v3822_v35 = vrot.slane %v3728_v16, 1  ;;  %v3869_v42 = vsel %vm3765_vm1, %v3868_v10, %v3867_v22  ;;  %v3872_v49 = vrot.slane %v3748_v19, 4 }
 0x225   :  { %v3819_v41 = vsel %vm3774_vm4, %v3818_v1, %v3817_v59  ;;  %v3871_v36 = vsel %vm3768_vm2, %v3870_v0, %v3869_v42  ;;  %v3874_v37 = vrot.slane %v3752_v38, 3  ;;  %v3876_v43 = vrot.slane %v3756_v61, 2 }
 0x226   :  { %v3821_v32 = vsel %vm3777_vm5, %v3820_v17, %v3819_v41  ;;  %v3873_v45 = vsel %vm3771_vm3, %v3872_v49, %v3871_v36  ;;  %v3878_v5 = vrot.slane %v3760_v57, 1  ;;  %v3101_v48 = vrot.slane %v8472_v50, %v7482_v6 }
 0x227   :  { %v3823_v27 = vsel %vm3780_vm6, %v3822_v35, %v3821_v32  ;;  %v3875_v3 = vsel %vm3774_vm4, %v3874_v37, %v3873_v45  ;;  %v3117_v47 = vrot.slane %v8460_v2, %v7482_v6  ;;  %v3133_v51 = vrot.slane %v8462_v56, %v7482_v6 }
 0x228   :  { %v3877_v28 = vsel %vm3777_vm5, %v3876_v43, %v3875_v3  ;;  %v3149_v12 = vrot.slane %v8474_v55, %v7482_v6  ;;  %v3165_v18 = vrot.slane %v8480_v46, %v7482_v6  ;;  %v3181_v16 = vrot.slane %v8482_v24, %v7482_v6 }
 0x229   :  { %v3879_v4 = vsel %vm3780_vm6, %v3878_v5, %v3877_v28  ;;  %v3197_v31 = vrot.slane %v8484_v26, %v7482_v6  ;;  %v3245_v62 = vrot.slane %v8476_v58, %v7482_v6  ;;  %v3261_v40 = vrot.slane %v8478_v63, %v7482_v6 }
 0x22a   :  { %v8613_v19 = vpack.c.b16 %v3879_v4, %v3823_v27  ;;  %v3213_v38 = vrot.slane %v8486_v11, %v7482_v6  ;;  %v3229_v61 = vrot.slane %v8488_v23, %v7482_v6  ;;  %v3277_v44 = vrot.slane %v8490_v52, %v7482_v6 }
 0x22b   :  { %v3293_v30 = vrot.slane %v8496_v15, %v7482_v6  ;;  %v3309_v25 = vrot.slane %v8498_v34, %v7482_v6  ;;  %v3422_v10 = vpack.c.bf16 %v3117_v47, %v3117_v47  ;;  %v3426_v57 = vpack.c.bf16 %v3133_v51, %v3133_v51 }
 0x22c   :  { %4603 = vmatprep.mubr.bf16.mxu1 %v8613_v19  ;;  %v3325_v60 = vrot.slane %v8500_v53, %v7482_v6  ;;  %v3341_v54 = vrot.slane %v8502_v20, %v7482_v6  ;;  %v3418_v1 = vpack.c.bf16 %v3101_v48, %v3101_v48  ;;  %v3430_v29 = vpack.c.bf16 %v3149_v12, %v3149_v12 }
 0x22d   :  { %v3434_v17 = vpack.c.bf16 %v3165_v18, %v3165_v18  ;;  %v3438_v22 = vpack.c.bf16 %v3181_v16, %v3181_v16  ;;  %v3454_v0 = vpack.c.bf16 %v3245_v62, %v3245_v62  ;;  %v3458_v59 = vpack.c.bf16 %v3261_v40, %v3261_v40 }
 0x22e   :  { %v3442_v35 = vpack.c.bf16 %v3197_v31, %v3197_v31  ;;  %v3446_v42 = vpack.c.bf16 %v3213_v38, %v3213_v38  ;;  %v3450_v49 = vpack.c.bf16 %v3229_v61, %v3229_v61  ;;  %v3462_v41 = vpack.c.bf16 %v3277_v44, %v3277_v44 }
 0x22f   :  { %v3466_v36 = vpack.c.bf16 %v3293_v30, %v3293_v30  ;;  %v3470_v37 = vpack.c.bf16 %v3309_v25, %v3309_v25  ;;  %v3701_v43 = vunpack.c.l.b16 %v3422_v10  ;;  %v3705_v32 = vunpack.c.l.b16 %v3426_v57 }
 0x230   :  { %v3474_v45 = vpack.c.bf16 %v3325_v60, %v3325_v60  ;;  %v3478_v5 = vpack.c.bf16 %v3341_v54, %v3341_v54  ;;  %v3697_v27 = vunpack.c.l.b16 %v3418_v1  ;;  %v3709_v3 = vunpack.c.l.b16 %v3430_v29 }
 0x231   :  { %v3713_v47 = vunpack.c.l.b16 %v3434_v17  ;;  %v3717_v51 = vunpack.c.l.b16 %v3438_v22  ;;  %v3733_v48 = vunpack.c.l.b16 %v3454_v0  ;;  %v3737_v28 = vunpack.c.l.b16 %v3458_v59 }
 0x232   :  { %v3721_v12 = vunpack.c.l.b16 %v3442_v35  ;;  %v3725_v18 = vunpack.c.l.b16 %v3446_v42  ;;  %v3741_v16 = vunpack.c.l.b16 %v3462_v41  ;;  %v3761_v4 = vrot.slane %v3701_v43, 7 }
 0x233   :  { %v3729_v31 = vunpack.c.l.b16 %v3450_v49  ;;  %v3745_v62 = vunpack.c.l.b16 %v3466_v36  ;;  %v3749_v40 = vunpack.c.l.b16 %v3470_v37  ;;  %v3764_v38 = vrot.slane %v3705_v32, 6 }
 0x234   :  { %v3753_v61 = vunpack.c.l.b16 %v3474_v45  ;;  %v3763_v44 = vsel %vm3762_vm0, %v3761_v4, %v3697_v27  ;;  %v3767_v30 = vrot.slane %v3709_v3, 5  ;;  %v3824_v25 = vrot.slane %v3733_v48, 7 }
 0x235   :  { %v3757_v10 = vunpack.c.l.b16 %v3478_v5  ;;  %v3766_v57 = vsel %vm3765_vm1, %v3764_v38, %v3763_v44  ;;  %v3770_v60 = vrot.slane %v3713_v47, 4  ;;  %v3826_v54 = vrot.slane %v3737_v28, 6 }
 0x236   :  { %v3769_v1 = vsel %vm3768_vm2, %v3767_v30, %v3766_v57  ;;  %v3773_v29 = vrot.slane %v3717_v51, 3  ;;  %v3825_v17 = vsel %vm3762_vm0, %v3824_v25, %v3729_v31  ;;  %v3828_v22 = vrot.slane %v3741_v16, 5  ;;  %v6655_v25 = vld [vmem:[#allocation9 + $0xc8] ss:$16 sps:$4 sm:$0xff]  }
 0x237   :  { %v3772_v0 = vsel %vm3771_vm3, %v3770_v60, %v3769_v1  ;;  %v3776_v59 = vrot.slane %v3721_v12, 2  ;;  %v3827_v35 = vsel %vm3765_vm1, %v3826_v54, %v3825_v17  ;;  %v3830_v42 = vrot.slane %v3745_v62, 4 }
 0x238   :  { %v3775_v49 = vsel %vm3774_vm4, %v3773_v29, %v3772_v0  ;;  %v3779_v41 = vrot.slane %v3725_v18, 1  ;;  %v3829_v36 = vsel %vm3768_vm2, %v3828_v22, %v3827_v35  ;;  %v3832_v37 = vrot.slane %v3749_v40, 3  ;;  %v6649_v18 = vld [vmem:[#allocation9 + $0xe8] ss:$16 sps:$4 sm:$0xff]  }
 0x239   :  { %v3778_v43 = vsel %vm3777_vm5, %v3776_v59, %v3775_v49  ;;  %v3831_v32 = vsel %vm3771_vm3, %v3830_v42, %v3829_v36  ;;  %v3834_v45 = vrot.slane %v3753_v61, 2  ;;  %v3836_v5 = vrot.slane %v3757_v10, 1 }
 0x23a   :  { %v3781_v27 = vsel %vm3780_vm6, %v3779_v41, %v3778_v43  ;;  %v3833_v3 = vsel %vm3774_vm4, %v3832_v37, %v3831_v32  ;;  %v3125_v47 = vrot.slane %v8460_v2, %v7488_v8  ;;  %v3141_v51 = vrot.slane %v8462_v56, %v7488_v8  ;;  %v6661_v41 = vld [vmem:[#allocation9 + $0xa8] ss:$16 sps:$4 sm:$0xff]   ;;  %v6669_v32 = vld [vmem:[#allocation9 + $0x8c] ss:$16 sps:$4 sm:$0xff]  }
 0x23b   :  { %v3835_v48 = vsel %vm3777_vm5, %v3834_v45, %v3833_v3  ;;  %v3109_v28 = vrot.slane %v8472_v50, %v7488_v8  ;;  %v3157_v12 = vrot.slane %v8474_v55, %v7488_v8  ;;  %v3173_v4 = vrot.slane %v8480_v46, %v7488_v8 }
 0x23c   :  { %v3837_v16 = vsel %vm3780_vm6, %v3836_v5, %v3835_v48  ;;  %v3253_v2 = vrot.slane %v8476_v58, %v7488_v8  ;;  %v3269_v56 = vrot.slane %v8478_v63, %v7488_v8  ;;  %v3189_v50 = vrot.slane %v8482_v24, %v7488_v8  ;;  %v6657_v63 = vld [vmem:[#allocation9 + $0xcc] ss:$16 sps:$4 sm:$0xff]  }
 0x23d   :  { %v8658_v31 = vpack.c.b16 %v3837_v16, %v3781_v27  ;;  %v3205_v55 = vrot.slane %v8484_v26, %v7488_v8  ;;  %v3285_v62 = vrot.slane %v8490_v52, %v7488_v8  ;;  %v3221_v46 = vrot.slane %v8486_v11, %v7488_v8 }
 0x23e   :  { %v3301_v58 = vrot.slane %v8496_v15, %v7488_v8  ;;  %v3424_v40 = vpack.c.bf16 %v3125_v47, %v3125_v47  ;;  %v3428_v38 = vpack.c.bf16 %v3141_v51, %v3141_v51  ;;  %v3237_v24 = vrot.slane %v8488_v23, %v7488_v8  ;;  %v6663_v23 = vld [vmem:[#allocation9 + $0xac] ss:$16 sps:$4 sm:$0xff]  }
 0x23f   :  { %4561 = vmatmul.mubr.bf16.vlgmr.msra.gmra.mxu0 %v8658_v31  ;;  %v3317_v26 = vrot.slane %v8498_v34, %v7488_v8  ;;  %v3333_v52 = vrot.slane %v8500_v53, %v7488_v8  ;;  %v3349_v11 = vrot.slane %v8502_v20, %v7488_v8  ;;  %v3420_v61 = vpack.c.bf16 %v3109_v28, %v3109_v28 }
 0x240   :  { %v3432_v44 = vpack.c.bf16 %v3157_v12, %v3157_v12  ;;  %v3456_v15 = vpack.c.bf16 %v3253_v2, %v3253_v2  ;;  %v3460_v30 = vpack.c.bf16 %v3269_v56, %v3269_v56  ;;  %4615 = vmatpush1.bf16.msra.mxu0 %v6649_v18  ;;  %v3436_v10 = vpack.c.bf16 %v3173_v4, %v3173_v4  ;;  %v6667_v2 = vld [vmem:[#allocation9 + $0x88] ss:$16 sps:$4 sm:$0xff]  }
 0x241   :  { %v3440_v57 = vpack.c.bf16 %v3189_v50, %v3189_v50  ;;  %v3444_v60 = vpack.c.bf16 %v3205_v55, %v3205_v55  ;;  %v3464_v54 = vpack.c.bf16 %v3285_v62, %v3285_v62  ;;  %4646 = vmatprep.mubr.bf16.mxu0 %v8566_v21  ;;  %v3448_v34 = vpack.c.bf16 %v3221_v46, %v3221_v46  ;;  %v6675_v46 = vld [vmem:[#allocation9 + $0x6c] ss:$16 sps:$4 sm:$0xff]  }
 0x242   :  { %v3468_v1 = vpack.c.bf16 %v3301_v58, %v3301_v58  ;;  %v3703_v29 = vunpack.c.l.b16 %v3424_v40  ;;  %v3707_v53 = vunpack.c.l.b16 %v3428_v38  ;;  %4616 = vmatprep.subr.bf16.mxu0 %v6657_v63  ;;  %v3452_v17 = vpack.c.bf16 %v3237_v24, %v3237_v24 }
 0x243   :  { %v3472_v20 = vpack.c.bf16 %v3317_v26, %v3317_v26  ;;  %v3476_v22 = vpack.c.bf16 %v3333_v52, %v3333_v52  ;;  %v3480_v0 = vpack.c.bf16 %v3349_v11, %v3349_v11  ;;  %v3699_v59 = vunpack.c.l.b16 %v3420_v61 }
 0x244   :  { %v3711_v35 = vunpack.c.l.b16 %v3432_v44  ;;  %v3735_v42 = vunpack.c.l.b16 %v3456_v15  ;;  %v3739_v49 = vunpack.c.l.b16 %v3460_v30  ;;  %4617 = vmatpush1.bf16.msra.mxu0 %v6655_v25  ;;  %v3715_v36 = vunpack.c.l.b16 %v3436_v10  ;;  %v6673_v25 = vld [vmem:[#allocation9 + $0x68] ss:$16 sps:$4 sm:$0xff]  }
 0x245   :  { %v3719_v37 = vunpack.c.l.b16 %v3440_v57  ;;  %v3723_v43 = vunpack.c.l.b16 %v3444_v60  ;;  %v3743_v21 = vunpack.c.l.b16 %v3464_v54  ;;  %4618 = vmatprep.subr.bf16.mxu0 %v6663_v23  ;;  %v3727_v45 = vunpack.c.l.b16 %v3448_v34  ;;  %v6681_v54 = vld [vmem:[#allocation9 + $0x4c] ss:$16 sps:$4 sm:$0xff]  }
 0x246   :  { %v3747_v5 = vunpack.c.l.b16 %v3468_v1  ;;  %v3796_v27 = vrot.slane %v3703_v29, 7  ;;  %v3798_v3 = vrot.slane %v3707_v53, 6  ;;  %v3731_v47 = vunpack.c.l.b16 %v3452_v17  ;;  %v6652_v1 = vld [vmem:[#allocation9 + $0x2e8] ss:$16 sps:$4 sm:$0xff]   ;;  %v6660_v17 = vld [vmem:[#allocation9 + $0x2cc] ss:$16 sps:$4 sm:$0xff]  }
 0x247   :  { %v3751_v51 = vunpack.c.l.b16 %v3472_v20  ;;  %v3755_v48 = vunpack.c.l.b16 %v3476_v22  ;;  %v3852_v28 = vrot.slane %v3735_v42, 7  ;;  %v3759_v12 = vunpack.c.l.b16 %v3480_v0  ;;  %v6679_v20 = vld [vmem:[#allocation9 + $0x48] ss:$16 sps:$4 sm:$0xff]   ;;  %v6687_v22 = vld [vmem:[#allocation9 + $0x2c] ss:$16 sps:$4 sm:$0xff]  }
 0x248   :  { %v3797_v18 = vsel %vm3762_vm0, %v3796_v27, %v3699_v59  ;;  %v3800_v16 = vrot.slane %v3711_v35, 5  ;;  %v3854_v4 = vrot.slane %v3739_v49, 6  ;;  %4619 = vmatpush1.bf16.msra.mxu0 %v6661_v41  ;;  %v3802_v50 = vrot.slane %v3715_v36, 4  ;;  %v6658_v0 = vld [vmem:[#allocation9 + $0x2c8] ss:$16 sps:$4 sm:$0xff]  }
 0x249   :  { %v3799_v56 = vsel %vm3765_vm1, %v3798_v3, %v3797_v18  ;;  %v3853_v55 = vsel %vm3762_vm0, %v3852_v28, %v3731_v47  ;;  %v3856_v62 = vrot.slane %v3743_v21, 5  ;;  %4620 = vmatprep.subr.bf16.mxu0 %v6669_v32  ;;  %v3804_v40 = vrot.slane %v3719_v37, 3  ;;  %v6666_v59 = vld [vmem:[#allocation9 + $0x2ac] ss:$16 sps:$4 sm:$0xff]   ;;  %v6685_v35 = vld [vmem:[#allocation9 + $0x28] ss:$16 sps:$4 sm:$0xff]  }
 0x24a   :  { %v3801_v58 = vsel %vm3768_vm2, %v3800_v16, %v3799_v56  ;;  %v3855_v38 = vsel %vm3765_vm1, %v3854_v4, %v3853_v55  ;;  %v3858_v63 = vrot.slane %v3747_v5, 4  ;;  %v3806_v26 = vrot.slane %v3723_v43, 2  ;;  %v6693_v42 = vld [vmem:[#allocation9 + $0xc] ss:$16 sps:$4 sm:$0xff]   ;;  %v6664_v49 = vld [vmem:[#allocation9 + $0x2a8] ss:$16 sps:$4 sm:$0xff]  }
 0x24b   :  { %v3803_v24 = vsel %vm3771_vm3, %v3802_v50, %v3801_v58  ;;  %v3857_v52 = vsel %vm3768_vm2, %v3856_v62, %v3855_v38  ;;  %v3860_v11 = vrot.slane %v3751_v51, 3  ;;  %v3808_v44 = vrot.slane %v3727_v45, 1  ;;  %v6672_v41 = vld [vmem:[#allocation9 + $0x28c] ss:$16 sps:$4 sm:$0xff]   ;;  %v6691_v36 = vld [vmem:[#allocation9 + $0x8] ss:$16 sps:$4 sm:$0xff]  }
 0x24c   :  { %v3805_v61 = vsel %vm3774_vm4, %v3804_v40, %v3803_v24  ;;  %v3859_v15 = vsel %vm3771_vm3, %v3858_v63, %v3857_v52  ;;  %v3862_v30 = vrot.slane %v3755_v48, 2  ;;  %4621 = vmatpush1.bf16.msra.mxu0 %v6667_v2  ;;  %v3864_v60 = vrot.slane %v3759_v12, 1  ;;  %v6699_v37 = vld [vmem:[#allocation9 + $0x1ec] ss:$16 sps:$4 sm:$0xff]   ;;  %v6670_v43 = vld [vmem:[#allocation9 + $0x288] ss:$16 sps:$4 sm:$0xff]  }
 0x24d   :  { %v3807_v10 = vsel %vm3777_vm5, %v3806_v26, %v3805_v61  ;;  %v3861_v57 = vsel %vm3774_vm4, %v3860_v11, %v3859_v15  ;;  %4622 = vmatprep.subr.bf16.mxu0 %v6675_v46  ;;  %v6678_v21 = vld [vmem:[#allocation9 + $0x26c] ss:$16 sps:$4 sm:$0xff]   ;;  %v6676_v45 = vld [vmem:[#allocation9 + $0x268] ss:$16 sps:$4 sm:$0xff]  }
 0x24e   :  { %v3809_v23 = vsel %vm3780_vm6, %v3808_v44, %v3807_v10  ;;  %v3863_v34 = vsel %vm3777_vm5, %v3862_v30, %v3861_v57  ;;  %v6705_v32 = vld [vmem:[#allocation9 + $0x1cc] ss:$16 sps:$4 sm:$0xff]   ;;  %v6703_v27 = vld [vmem:[#allocation9 + $0x1c8] ss:$16 sps:$4 sm:$0xff]  }
 0x24f   :  { %v3865_v29 = vsel %vm3780_vm6, %v3864_v60, %v3863_v34  ;;  %v6684_v5 = vld [vmem:[#allocation9 + $0x24c] ss:$16 sps:$4 sm:$0xff]   ;;  %v6682_v47 = vld [vmem:[#allocation9 + $0x248] ss:$16 sps:$4 sm:$0xff]  }
 0x250   :  { %v8694_v53 = vpack.c.b16 %v3865_v29, %v3809_v23  ;;  %4623 = vmatpush1.bf16.msra.mxu0 %v6673_v25  ;;  %v6711_v3 = vld [vmem:[#allocation9 + $0x1ac] ss:$16 sps:$4 sm:$0xff]   ;;  %v6709_v48 = vld [vmem:[#allocation9 + $0x1a8] ss:$16 sps:$4 sm:$0xff]  }
 0x251   :  { %4624 = vmatprep.subr.bf16.mxu0 %v6681_v54  ;;  %v6690_v51 = vld [vmem:[#allocation9 + $0x22c] ss:$16 sps:$4 sm:$0xff]   ;;  %v6688_v12 = vld [vmem:[#allocation9 + $0x228] ss:$16 sps:$4 sm:$0xff]  }
 0x252   :  { %4604 = vmatmul.mubr.bf16.vlgmr.msra.gmra.mxu1 %v8694_v53  ;;  %v6717_v28 = vld [vmem:[#allocation9 + $0x18c] ss:$16 sps:$4 sm:$0xff]   ;;  %v6715_v16 = vld [vmem:[#allocation9 + $0x188] ss:$16 sps:$4 sm:$0xff]  }
 0x253   :  { %4658 = vmatpush1.bf16.msra.mxu1 %v6652_v1  ;;  %4689 = vmatprep.mubr.bf16.mxu1 %v8613_v19  ;;  %v6697_v19 = vld [vmem:[#allocation9 + $0x1e8] ss:$16 sps:$4 sm:$0xff]   ;;  %v6696_v18 = vld [vmem:[#allocation9 + $0x20c] ss:$16 sps:$4 sm:$0xff]  }
 0x254   :  { %4659 = vmatprep.subr.bf16.mxu1 %v6660_v17  ;;  %4625 = vmatpush1.bf16.msra.mxu0 %v6679_v20  ;;  %v6723_v4 = vld [vmem:[#allocation9 + $0x16c] ss:$16 sps:$4 sm:$0xff]   ;;  %v6694_v2 = vld [vmem:[#allocation9 + $0x208] ss:$16 sps:$4 sm:$0xff]  }
 0x255   :  { %4626 = vmatprep.subr.bf16.mxu0 %v6687_v22  ;;  %v6702_v56 = vld [vmem:[#allocation9 + $0x3ec] ss:$16 sps:$4 sm:$0xff]   ;;  %v6721_v50 = vld [vmem:[#allocation9 + $0x168] ss:$16 sps:$4 sm:$0xff]  }
 0x256   :  { %v6729_v55 = vld [vmem:[#allocation9 + $0x14c] ss:$16 sps:$4 sm:$0xff]   ;;  %v6700_v62 = vld [vmem:[#allocation9 + $0x3e8] ss:$16 sps:$4 sm:$0xff]  }
 0x257   :  { %4660 = vmatpush1.bf16.msra.mxu1 %v6658_v0  ;;  %v6708_v46 = vld [vmem:[#allocation9 + $0x3cc] ss:$16 sps:$4 sm:$0xff]   ;;  %v6727_v58 = vld [vmem:[#allocation9 + $0x148] ss:$16 sps:$4 sm:$0xff]  }
 0x258   :  { %4661 = vmatprep.subr.bf16.mxu1 %v6666_v59  ;;  %4627 = vmatpush1.bf16.msra.mxu0 %v6685_v35  ;;  %v6735_v40 = vld [vmem:[#allocation9 + $0x12c] ss:$16 sps:$4 sm:$0xff]   ;;  %v6706_v38 = vld [vmem:[#allocation9 + $0x3c8] ss:$16 sps:$4 sm:$0xff]  }
 0x259   :  { %4628 = vmatprep.subr.bf16.mxu0 %v6693_v42  ;;  %v6714_v63 = vld [vmem:[#allocation9 + $0x3ac] ss:$16 sps:$4 sm:$0xff]   ;;  %v6733_v24 = vld [vmem:[#allocation9 + $0x128] ss:$16 sps:$4 sm:$0xff]  }
 0x25a   :  { %v6741_v26 = vld [vmem:[#allocation9 + $0x10c] ss:$16 sps:$4 sm:$0xff]   ;;  %v6712_v52 = vld [vmem:[#allocation9 + $0x3a8] ss:$16 sps:$4 sm:$0xff]  }
 0x25b   :  { %4662 = vmatpush1.bf16.msra.mxu1 %v6664_v49  ;;  %v6720_v11 = vld [vmem:[#allocation9 + $0x38c] ss:$16 sps:$4 sm:$0xff]   ;;  %v6739_v61 = vld [vmem:[#allocation9 + $0x108] ss:$16 sps:$4 sm:$0xff]  }
 0x25c   :  { %4663 = vmatprep.subr.bf16.mxu1 %v6672_v41  ;;  %4629 = vmatpush1.bf16.msra.mxu0 %v6691_v36  ;;  %v6718_v44 = vld [vmem:[#allocation9 + $0x388] ss:$16 sps:$4 sm:$0xff]   ;;  %v6726_v15 = vld [vmem:[#allocation9 + $0x36c] ss:$16 sps:$4 sm:$0xff]  }
 0x25d   :  { %4630 = vmatprep.subr.bf16.mxu0 %v6699_v37  ;;  %v6724_v30 = vld [vmem:[#allocation9 + $0x368] ss:$16 sps:$4 sm:$0xff]   ;;  %v6732_v25 = vld [vmem:[#allocation9 + $0x34c] ss:$16 sps:$4 sm:$0xff]  }
 0x25e   :  { %v6730_v10 = vld [vmem:[#allocation9 + $0x348] ss:$16 sps:$4 sm:$0xff]   ;;  %v6738_v57 = vld [vmem:[#allocation9 + $0x32c] ss:$16 sps:$4 sm:$0xff]  }
 0x25f   :  { %4664 = vmatpush1.bf16.msra.mxu1 %v6670_v43  ;;  %v6736_v60 = vld [vmem:[#allocation9 + $0x328] ss:$16 sps:$4 sm:$0xff]   ;;  %v6744_v54 = vld [vmem:[#allocation9 + $0x30c] ss:$16 sps:$4 sm:$0xff]  }
 0x260   :  { %4665 = vmatprep.subr.bf16.mxu1 %v6678_v21  ;;  %4631 = vmatpush2.bf16.msra.mxu0 %v6697_v19  ;;  %v6742_v23 = vld [vmem:[#allocation9 + $0x308] ss:$16 sps:$4 sm:$0xff]  }
 0x261   :  { %4632 = vmatprep.subr.bf16.mxu0 %v6705_v32 }
 0x263   :  { %4666 = vmatpush1.bf16.msra.mxu1 %v6676_v45 }
 0x264   :  { %4667 = vmatprep.subr.bf16.mxu1 %v6684_v5  ;;  %4633 = vmatpush2.bf16.msra.mxu0 %v6703_v27 }
 0x265   :  { %4634 = vmatprep.subr.bf16.mxu0 %v6711_v3 }
 0x267   :  { %4668 = vmatpush1.bf16.msra.mxu1 %v6682_v47 }
 0x268   :  { %4669 = vmatprep.subr.bf16.mxu1 %v6690_v51  ;;  %4635 = vmatpush2.bf16.msra.mxu0 %v6709_v48 }
 0x269   :  { %4636 = vmatprep.subr.bf16.mxu0 %v6717_v28 }
 0x26b   :  { %4670 = vmatpush1.bf16.msra.mxu1 %v6688_v12 }
 0x26c   :  { %4671 = vmatprep.subr.bf16.mxu1 %v6696_v18  ;;  %4637 = vmatpush2.bf16.msra.mxu0 %v6715_v16 }
 0x26d   :  { %4638 = vmatprep.subr.bf16.mxu0 %v6723_v4 }
 0x26f   :  { %4672 = vmatpush1.bf16.msra.mxu1 %v6694_v2 }
 0x270   :  { %4673 = vmatprep.subr.bf16.mxu1 %v6702_v56  ;;  %4639 = vmatpush2.bf16.msra.mxu0 %v6721_v50 }
 0x271   :  { %4640 = vmatprep.subr.bf16.mxu0 %v6729_v55 }
 0x273   :  { %4674 = vmatpush2.bf16.msra.mxu1 %v6700_v62 }
 0x274   :  { %4675 = vmatprep.subr.bf16.mxu1 %v6708_v46  ;;  %4641 = vmatpush2.bf16.msra.mxu0 %v6727_v58 }
 0x275   :  { %4642 = vmatprep.subr.bf16.mxu0 %v6735_v40 }
 0x277   :  { %4676 = vmatpush2.bf16.msra.mxu1 %v6706_v38 }
 0x278   :  { %4677 = vmatprep.subr.bf16.mxu1 %v6714_v63  ;;  %4643 = vmatpush2.bf16.msra.mxu0 %v6733_v24 }
 0x279   :  { %4644 = vmatprep.subr.bf16.mxu0 %v6741_v26 }
 0x27b   :  { %4678 = vmatpush2.bf16.msra.mxu1 %v6712_v52 }
 0x27c   :  { %4679 = vmatprep.subr.bf16.mxu1 %v6720_v11  ;;  %4645 = vmatpush2.bf16.msra.mxu0 %v6739_v61  ;;  %v151_v11 = vld [vmem:[#allocation3] sm:$0xff] }
 0x27f   :  { %4680 = vmatpush2.bf16.msra.mxu1 %v6718_v44  ;;  %4647 = vmatmul.mubr.bf16.vlgmr.msra.gmra.mxu0 %v8658_v31  ;;  %v3610_v31 = vld [vmem:[%s8885_s4] sm:$0xf] }
 0x280   :  { %4681 = vmatprep.subr.bf16.mxu1 %v6726_v15  ;;  %v3611_v17 = vmul.f32 0.125, %v3610_v31  ;;  %v6748_v31 = vld [vmem:[#allocation13 + $0x2e0] ss:$16 sps:$4 sm:$0xff]  }
 0x282   :  { %v3620_v22 = vrot.slane %v3611_v17, %v7485_v7  ;;  %v3616_v59 = vrot.slane %v3611_v17, %v7482_v6  ;;  %v3628_v19 = vrot.slane %v3611_v17, %v7491_v9 }
 0x283   :  { %4682 = vmatpush2.bf16.msra.mxu1 %v6724_v30 }
 0x284   :  { %4683 = vmatprep.subr.bf16.mxu1 %v6732_v25 }
 0x287   :  { %4684 = vmatpush2.bf16.msra.mxu1 %v6730_v10 }
 0x288   :  { %4685 = vmatprep.subr.bf16.mxu1 %v6738_v57  ;;  %v4700_v57 = vmul.f32 %v151_v11, %v151_v11 }
 0x28b   :  { %4686 = vmatpush2.bf16.msra.mxu1 %v6736_v60  ;;  %v152_v60 = vld [vmem:[#allocation3 + $0x8] sm:$0xff] }
 0x28c   :  { %4687 = vmatprep.subr.bf16.mxu1 %v6744_v54 }
 0x28f   :  { %4688 = vmatpush2.bf16.msra.mxu1 %v6742_v23  ;;  %v4701_v23 = vmul.f32 %v152_v60, %v152_v60 }
 0x292   :  { %4690 = vmatmul.mubr.bf16.vlgmr.msra.gmra.mxu1 %v8694_v53  ;;  %v3624_v53 = vrot.slane %v3611_v17, %v7488_v8 }
 0x2ff   :  { %v4562_v34 = vpop.f32.mrf.mxu0 }
 0x300   :  { %v4563_v41 = vadd.f32 %v4562_v34, %v3616_v59  ;;  %v6745_v34 = vld [vmem:[#allocation13 + $0xe0] ss:$16 sps:$4 sm:$0xff]  }
 0x301   :  { %v4564_v1 = vpop.f32.mrf.mxu0 }
 0x302   :  { %v4565_v42 = vadd.f32 %v4564_v1, %v3620_v22  ;;  %v6747_v1 = vld [vmem:[#allocation13 + $0xe4] ss:$16 sps:$4 sm:$0xff]  }
 0x303   :  { %v4566_v29 = vpop.f32.mrf.mxu0  ;;  %5724 = vmatprep.subr.bf16.mxu0 %v6747_v1 }
 0x304   :  { %v4567_v5 = vadd.f32 %v4566_v29, %v3616_v59  ;;  %v6750_v29 = vld [vmem:[#allocation13 + $0x2e4] ss:$16 sps:$4 sm:$0xff]   ;;  %5725 = vmatpush1.bf16.msra.mxu0 %v6745_v34 }
 0x305   :  { %v4568_v0 = vpop.f32.mrf.mxu0  ;;  %5767 = vmatprep.subr.bf16.mxu1 %v6750_v29 }
 0x306   :  { %v4569_v21 = vadd.f32 %v4568_v0, %v3620_v22  ;;  %5768 = vmatpush1.bf16.msra.mxu1 %v6748_v31 }
 0x312   :  { %v4605_v20 = vpop.f32.mrf.mxu1 }
 0x313   :  { %v8709_v32 = vadd.f32 %v4605_v20, %v4563_v41  ;;  %v4743_v41 = vld [vmem:[%s8891_s10] sm:$0xff]  ;;  %s6375_s10 = sld [smem:[#allocation16 + $0x1]] }
 0x314   :  { %v4607_v49 = vpop.f32.mrf.mxu1 }
 0x315   :  { %v8706_v37 = vadd.f32 %v4607_v49, %v4565_v42  ;;  %v4712_v28 = vmul.f32 %v8709_v32, %v8709_v32 }
 0x316   :  { %v4609_v43 = vpop.f32.mrf.mxu1 }
 0x317   :  { %v4713_v3 = vmul.f32 %v8706_v37, %v8706_v37  ;;  %v8717_v16 = vadd.f32 %v4609_v43, %v4567_v5  ;;  %v4828_v5 = vrot.slane %v4743_v41, %v7485_v7 }
 0x318   :  { %v4611_v47 = vpop.f32.mrf.mxu1 }
 0x319   :  { %v8713_v51 = vadd.f32 %v4611_v47, %v4569_v21  ;;  %v4720_v56 = vadd.f32 %v4713_v3, %v4712_v28  ;;  %v4716_v38 = vmul.f32 %v8717_v16, %v8717_v16  ;;  %v4742_v21 = vld [vmem:[%s8890_s9] sm:$0x3]  ;;  %s4811_s9 = sld [smem:[#allocation16]] }
 0x31a   :  { %v4747_v28 = vrot.slane %v4742_v21, %v7482_v6 }
 0x31b   :  { %v4717_v55 = vmul.f32 %v8713_v51, %v8713_v51 }
 0x31d   :  { %v4725_v61 = vadd.f32 %v4717_v55, %v4716_v38 }
 0x33f   :  { %v4648_v35 = vpop.f32.mrf.mxu0 }
 0x340   :  { %v4649_v27 = vadd.f32 %v4648_v35, %v3624_v53 }
 0x341   :  { %v4650_v36 = vpop.f32.mrf.mxu0 }
 0x342   :  { %v4651_v48 = vadd.f32 %v4650_v36, %v3628_v19  ;;  %v4758_v36 = vrot.slane %v4743_v41, %v7482_v6 }
 0x343   :  { %v4652_v45 = vpop.f32.mrf.mxu0 }
 0x344   :  { %v4653_v2 = vadd.f32 %v4652_v45, %v3624_v53  ;;  %v4762_v53 = vrot.slane %v4743_v41, %v7488_v8 }
 0x345   :  { %v4654_v18 = vpop.f32.mrf.mxu0 }
 0x346   :  { %v4655_v58 = vadd.f32 %v4654_v18, %v3628_v19  ;;  %v4778_v19 = vrot.slane %v4758_v36, %v7482_v6  ;;  %v4782_v45 = vrot.slane %v4762_v53, %v7482_v6 }
 0x352   :  { %v4691_v12 = vpop.f32.mrf.mxu1 }
 0x353   :  { %v8719_v4 = vadd.f32 %v4691_v12, %v4649_v27  ;;  %v4832_v27 = vrot.slane %v4743_v41, %v7491_v9 }
 0x354   :  { %v4693_v50 = vpop.f32.mrf.mxu1 }
 0x355   :  { %v4714_v62 = vmul.f32 %v8719_v4, %v8719_v4  ;;  %v8725_v46 = vadd.f32 %v4693_v50, %v4651_v48  ;;  %v4766_v48 = vrot.slane %v4743_v41, %v7792_v13  ;;  %v4852_v50 = vrot.slane %v4832_v27, %v7485_v7 }
 0x356   :  { %v4695_v40 = vpop.f32.mrf.mxu1  ;;  %v4836_v13 = vrot.slane %v4743_v41, %v7795_v14 }
 0x357   :  { %v4715_v63 = vmul.f32 %v8725_v46, %v8725_v46  ;;  %v8731_v24 = vadd.f32 %v4695_v40, %v4653_v2  ;;  %v4721_v26 = vadd.f32 %v4720_v56, %v4714_v62  ;;  %v4848_v56 = vrot.slane %v4828_v5, %v7485_v7  ;;  %v6756_v5 = vld [vmem:[#allocation13 + $0x2c4] ss:$16 sps:$4 sm:$0xff]  }
 0x358   :  { %v4697_v52 = vpop.f32.mrf.mxu1  ;;  %v4818_v40 = vrot.slane %v4742_v21, %v7485_v7  ;;  %v6753_v21 = vld [vmem:[#allocation13 + $0xc4] ss:$16 sps:$4 sm:$0xff]   ;;  %5769 = vmatprep.subr.bf16.mxu1 %v6756_v5  ;;  %v6826_v5 = vld [vmem:[#allocation13 + $0x340] ss:$16 sps:$4 sm:$0xff]  }
 0x359   :  { %v4718_v44 = vmul.f32 %v8731_v24, %v8731_v24  ;;  %v8735_v15 = vadd.f32 %v4697_v52, %v4655_v58  ;;  %v4722_v30 = vadd.f32 %v4721_v26, %v4715_v63  ;;  %v4786_v63 = vrot.slane %v4766_v48, %v7482_v6  ;;  %5726 = vmatprep.subr.bf16.mxu0 %v6753_v21  ;;  %v6825_v21 = vld [vmem:[#allocation13 + $0x144] ss:$16 sps:$4 sm:$0xff]  }
 0x35b   :  { %v4719_v25 = vmul.f32 %v8735_v15, %v8735_v15  ;;  %4723 = vadd.xlane.f32.xlu0 %v4722_v30  ;;  %v4726_v10 = vadd.f32 %v4725_v61, %v4718_v44  ;;  %v4840_v30 = vrot.slane %v4743_v41, %v7801_v39 }
 0x35d   :  { %v4727_v54 = vadd.f32 %v4726_v10, %v4719_v25 }
 0x35f   :  { %4728 = vadd.xlane.f32.xlu1 %v4727_v54  ;;  %4702 = vadd.xlane.f32.xlu0 %v4700_v57  ;;  %v4856_v54 = vrot.slane %v4836_v13, %v7485_v7  ;;  %v6771_v13 = vld [vmem:[#allocation13 + $0x64] ss:$16 sps:$4 sm:$0xff]  }
 0x363   :  { %4704 = vadd.xlane.f32.xlu1 %v4701_v23 }
 0x3e4   :  { %v4724_v17 = vpop.xlane.xlu0 %4723 }
 0x3e5   :  { %v4730_v20 = vmax.f32 %v4724_v17, 1e-24  ;;  %v4860_v17 = vrot.slane %v4840_v30, %v7485_v7  ;;  %v6784_v30 = vld [vmem:[#allocation13 + $0x220] ss:$16 sps:$4 sm:$0xff]  }
 0x3e7   :  { %7021 = vrsqrt.f32 %v4730_v20 }
 0x3e8   :  { %v4729_v22 = vpop.xlane.xlu1 %4728  ;;  %v4703_v0 = vpop.xlane.xlu0 %4702 }
 0x3e9   :  { %v4731_v59 = vmax.f32 %v4729_v22, 1e-24  ;;  %v4706_v35 = vmax.f32 %v4703_v0, 1e-24 }
 0x3eb   :  { %7023 = vrsqrt.f32 %v4731_v59 }
 0x3ec   :  { %7025 = vrsqrt.f32 %v4706_v35  ;;  %v4705_v42 = vpop.xlane.xlu1 %4704 }
 0x3ed   :  { %v4707_v49 = vmax.f32 %v4705_v42, 1e-24 }
 0x3ef   :  { %7027 = vrsqrt.f32 %v4707_v49 }
 0x3f4   :  { %v7022_v43 = vpop.eup %7021 }
 0x3f5   :  { %v8752_v3 = vmul.f32 %v7022_v43, %v8709_v32  ;;  %v8755_v47 = vmul.f32 %v7022_v43, %v8706_v37  ;;  %v4770_v32 = vrot.slane %v4743_v41, %v7798_v33  ;;  %v8775_v38 = vmul.f32 %v7022_v43, %v8719_v4 }
 0x3f6   :  { %v8792_v10 = vmul.f32 %v7022_v43, %v8725_v46  ;;  %v6751_v43 = vld [vmem:[#allocation13 + $0xc0] ss:$16 sps:$4 sm:$0xff]  }
 0x3f7   :  { %v4791_v18 = vmul.f32 %v4778_v19, %v8752_v3  ;;  %v4792_v2 = vmul.f32 %v4782_v45, %v8755_v47  ;;  %v4861_v61 = vmul.f32 %v4848_v56, %v8752_v3  ;;  %v4862_v14 = vmul.f32 %v4852_v50, %v8755_v47  ;;  %5727 = vmatpush1.bf16.msra.mxu0 %v6751_v43  ;;  %v6820_v43 = vld [vmem:[#allocation13 + $0x360] ss:$16 sps:$4 sm:$0xff]  }
 0x3f8   :  { %v7024_v12 = vpop.eup %7023  ;;  %v4790_v44 = vrot.slane %v4770_v32, %v7482_v6  ;;  %v4793_v57 = vmul.f32 %v4786_v63, %v8775_v38  ;;  %v4863_v20 = vmul.f32 %v4856_v54, %v8775_v38  ;;  %v4864_v41 = vmul.f32 %v4860_v17, %v8792_v10  ;;  %v6768_v32 = vld [vmem:[#allocation13 + $0x284] ss:$16 sps:$4 sm:$0xff]  }
 0x3f9   :  { %v7026_v55 = vpop.eup %7025  ;;  %v8765_v62 = vmul.f32 %v7024_v12, %v8717_v16  ;;  %v8768_v37 = vmul.f32 %v7024_v12, %v8713_v51  ;;  %v4799_v51 = vadd.f32 %v4792_v2, %v4791_v18  ;;  %v8787_v4 = vmul.f32 %v7024_v12, %v8731_v24  ;;  %v6760_v18 = vld [vmem:[#allocation13 + $0x2a0] ss:$16 sps:$4 sm:$0xff]   ;;  %v6762_v2 = vld [vmem:[#allocation13 + $0x2a4] ss:$16 sps:$4 sm:$0xff]  }
 0x3fa   :  { %v8771_v58 = vmul.f32 %v7026_v55, %v151_v11  ;;  %v4869_v31 = vadd.f32 %v4862_v14, %v4861_v61  ;;  %v8800_v39 = vmul.f32 %v7024_v12, %v8735_v15  ;;  %v4794_v29 = vmul.f32 %v4790_v44, %v8792_v10  ;;  %v6759_v12 = vld [vmem:[#allocation13 + $0xa4] ss:$16 sps:$4 sm:$0xff]   ;;  %v6766_v55 = vld [vmem:[#allocation13 + $0x280] ss:$16 sps:$4 sm:$0xff]  }
 0x3fb   :  { %v4795_v26 = vmul.f32 %v4778_v19, %v8765_v62  ;;  %v4796_v33 = vmul.f32 %v4782_v45, %v8768_v37  ;;  %v4865_v34 = vmul.f32 %v4848_v56, %v8765_v62  ;;  %v4866_v24 = vmul.f32 %v4852_v50, %v8768_v37  ;;  %v6754_v19 = vld [vmem:[#allocation13 + $0x2c0] ss:$16 sps:$4 sm:$0xff]   ;;  %5728 = vmatprep.subr.bf16.mxu0 %v6759_v12  ;;  %v6765_v50 = vld [vmem:[#allocation13 + $0x84] ss:$16 sps:$4 sm:$0xff]  }
 0x3fc   :  { %v7028_v16 = vpop.eup %7027  ;;  %v4748_v52 = vmul.f32 %v4747_v28, %v8771_v58  ;;  %v4819_v25 = vmul.f32 %v4818_v40, %v8771_v58  ;;  %v4800_v1 = vadd.f32 %v4799_v51, %v4793_v57  ;;  %v4797_v46 = vmul.f32 %v4786_v63, %v8787_v4  ;;  %5770 = vmatpush1.bf16.msra.mxu1 %v6754_v19  ;;  %v6763_v56 = vld [vmem:[#allocation13 + $0x80] ss:$16 sps:$4 sm:$0xff]   ;;  %v6783_v61 = vld [vmem:[#allocation13 + $0x24] ss:$16 sps:$4 sm:$0xff]  }
 0x3fd   :  { %v8783_v11 = vmul.f32 %v7028_v16, %v152_v60  ;;  %v4804_v23 = vadd.f32 %v4796_v33, %v4795_v26  ;;  %v4874_v59 = vadd.f32 %v4866_v24, %v4865_v34  ;;  %v4870_v42 = vadd.f32 %v4869_v31, %v4863_v20  ;;  %5771 = vmatprep.subr.bf16.mxu1 %v6762_v2  ;;  %v6769_v63 = vld [vmem:[#allocation13 + $0x60] ss:$16 sps:$4 sm:$0xff]   ;;  %v6777_v33 = vld [vmem:[#allocation13 + $0x44] ss:$16 sps:$4 sm:$0xff]  }
 0x3fe   :  { %4750 = vadd.xlane.f32.xlu0 %v4748_v52  ;;  %v4801_v35 = vadd.f32 %v4800_v1, %v4794_v29  ;;  %v4798_v49 = vmul.f32 %v4790_v44, %v8800_v39  ;;  %v4867_v15 = vmul.f32 %v4856_v54, %v8787_v4  ;;  %v4868_v27 = vmul.f32 %v4860_v17, %v8800_v39  ;;  %v6772_v26 = vld [vmem:[#allocation13 + $0x260] ss:$16 sps:$4 sm:$0xff]   ;;  %v6780_v16 = vld [vmem:[#allocation13 + $0x244] ss:$16 sps:$4 sm:$0xff]  }
 0x3ff   :  { %v4749_v60 = vmul.f32 %v4747_v28, %v8783_v11  ;;  %v4820_v22 = vmul.f32 %v4818_v40, %v8783_v11  ;;  %v4805_v0 = vadd.f32 %v4804_v23, %v4797_v46  ;;  %v4871_v45 = vadd.f32 %v4870_v42, %v4864_v41  ;;  %v6757_v28 = vld [vmem:[#allocation13 + $0xa0] ss:$16 sps:$4 sm:$0xff]   ;;  %v6774_v40 = vld [vmem:[#allocation13 + $0x264] ss:$16 sps:$4 sm:$0xff]  }
 0x400   :  { %v4875_v53 = vadd.f32 %v4874_v59, %v4867_v15  ;;  %5729 = vmatpush1.bf16.msra.mxu0 %v6757_v28  ;;  %5772 = vmatpush1.bf16.msra.mxu1 %v6760_v18  ;;  %v6775_v52 = vld [vmem:[#allocation13 + $0x40] ss:$16 sps:$4 sm:$0xff]   ;;  %v6786_v14 = vld [vmem:[#allocation13 + $0x224] ss:$16 sps:$4 sm:$0xff]  }
 0x401   :  { %4752 = vadd.xlane.f32.xlu1 %v4749_v60  ;;  %v4806_v36 = vadd.f32 %v4805_v0, %v4798_v49  ;;  %5730 = vmatprep.subr.bf16.mxu0 %v6765_v50  ;;  %v6778_v51 = vld [vmem:[#allocation13 + $0x240] ss:$16 sps:$4 sm:$0xff]   ;;  %v6792_v57 = vld [vmem:[#allocation13 + $0x204] ss:$16 sps:$4 sm:$0xff]  }
 0x402   :  { %4821 = vadd.xlane.f32.xlu0 %v4819_v25  ;;  %v4876_v48 = vadd.f32 %v4875_v53, %v4868_v27  ;;  %5773 = vmatprep.subr.bf16.mxu1 %v6768_v32  ;;  %v6781_v44 = vld [vmem:[#allocation13 + $0x20] ss:$16 sps:$4 sm:$0xff]   ;;  %v6789_v25 = vld [vmem:[#allocation13 + $0x4] ss:$16 sps:$4 sm:$0xff]   ;;  %v6846_v32 = vld [vmem:[#allocation13 + $0x2ec] ss:$16 sps:$4 sm:$0xff]  }
 0x403   :  { %v6787_v54 = vld [vmem:[#allocation13] ss:$16 sps:$4 sm:$0xff]   ;;  %v6795_v23 = vld [vmem:[#allocation13 + $0x1e4] ss:$16 sps:$4 sm:$0xff]  }
 0x404   :  { %5731 = vmatpush1.bf16.msra.mxu0 %v6763_v56  ;;  %5774 = vmatpush1.bf16.msra.mxu1 %v6766_v55  ;;  %v6790_v60 = vld [vmem:[#allocation13 + $0x200] ss:$16 sps:$4 sm:$0xff]   ;;  %v6798_v34 = vld [vmem:[#allocation13 + $0x3e4] ss:$16 sps:$4 sm:$0xff]   ;;  %v6843_v55 = vld [vmem:[#allocation13 + $0xec] ss:$16 sps:$4 sm:$0xff]  }
 0x405   :  { %4823 = vadd.xlane.f32.xlu1 %v4820_v22  ;;  %5732 = vmatprep.subr.bf16.mxu0 %v6771_v13  ;;  %v6793_v24 = vld [vmem:[#allocation13 + $0x1e0] ss:$16 sps:$4 sm:$0xff]   ;;  %v6801_v31 = vld [vmem:[#allocation13 + $0x1c4] ss:$16 sps:$4 sm:$0xff]  }
 0x406   :  { %4802 = vadd.xlane.f32.xlu0 %v4801_v35  ;;  %5775 = vmatprep.subr.bf16.mxu1 %v6774_v40  ;;  %v6796_v1 = vld [vmem:[#allocation13 + $0x3e0] ss:$16 sps:$4 sm:$0xff]   ;;  %v6804_v46 = vld [vmem:[#allocation13 + $0x3c4] ss:$16 sps:$4 sm:$0xff]  }
 0x407   :  { %v6799_v29 = vld [vmem:[#allocation13 + $0x1c0] ss:$16 sps:$4 sm:$0xff]   ;;  %v6807_v20 = vld [vmem:[#allocation13 + $0x1a4] ss:$16 sps:$4 sm:$0xff]  }
 0x408   :  { %5733 = vmatpush1.bf16.msra.mxu0 %v6769_v63  ;;  %5776 = vmatpush1.bf16.msra.mxu1 %v6772_v26  ;;  %v6802_v17 = vld [vmem:[#allocation13 + $0x3c0] ss:$16 sps:$4 sm:$0xff]   ;;  %v6810_v22 = vld [vmem:[#allocation13 + $0x3a4] ss:$16 sps:$4 sm:$0xff]  }
 0x409   :  { %4807 = vadd.xlane.f32.xlu1 %v4806_v36  ;;  %5734 = vmatprep.subr.bf16.mxu0 %v6777_v33  ;;  %v6805_v0 = vld [vmem:[#allocation13 + $0x1a0] ss:$16 sps:$4 sm:$0xff]   ;;  %v6813_v35 = vld [vmem:[#allocation13 + $0x184] ss:$16 sps:$4 sm:$0xff]  }
 0x40a   :  { %4872 = vadd.xlane.f32.xlu0 %v4871_v45  ;;  %5777 = vmatprep.subr.bf16.mxu1 %v6780_v16  ;;  %v6808_v59 = vld [vmem:[#allocation13 + $0x3a0] ss:$16 sps:$4 sm:$0xff]   ;;  %v6816_v42 = vld [vmem:[#allocation13 + $0x384] ss:$16 sps:$4 sm:$0xff]  }
 0x40b   :  { %v6811_v49 = vld [vmem:[#allocation13 + $0x180] ss:$16 sps:$4 sm:$0xff]   ;;  %v6819_v41 = vld [vmem:[#allocation13 + $0x164] ss:$16 sps:$4 sm:$0xff]  }
 0x40c   :  { %5735 = vmatpush1.bf16.msra.mxu0 %v6775_v52  ;;  %5778 = vmatpush1.bf16.msra.mxu1 %v6778_v51  ;;  %v6814_v15 = vld [vmem:[#allocation13 + $0x380] ss:$16 sps:$4 sm:$0xff]   ;;  %v6822_v36 = vld [vmem:[#allocation13 + $0x364] ss:$16 sps:$4 sm:$0xff]   ;;  %v4812_v51 = vstv %s4811_s9 }
 0x40d   :  { %4877 = vadd.xlane.f32.xlu1 %v4876_v48  ;;  %5736 = vmatprep.subr.bf16.mxu0 %v6783_v61  ;;  %v6817_v53 = vld [vmem:[#allocation13 + $0x160] ss:$16 sps:$4 sm:$0xff]   ;;  %v6828_v19 = vld [vmem:[#allocation13 + $0x344] ss:$16 sps:$4 sm:$0xff]   ;;  %v4882_v61 = vstv %s6375_s10 }
 0x40e   :  { %5779 = vmatprep.subr.bf16.mxu1 %v6786_v14  ;;  %v6823_v45 = vld [vmem:[#allocation13 + $0x140] ss:$16 sps:$4 sm:$0xff]   ;;  %v6831_v48 = vld [vmem:[#allocation13 + $0x124] ss:$16 sps:$4 sm:$0xff]  }
 0x40f   :  { %v6829_v27 = vld [vmem:[#allocation13 + $0x120] ss:$16 sps:$4 sm:$0xff]   ;;  %v6834_v12 = vld [vmem:[#allocation13 + $0x324] ss:$16 sps:$4 sm:$0xff]  }
 0x410   :  { %5737 = vmatpush1.bf16.msra.mxu0 %v6781_v44  ;;  %5780 = vmatpush1.bf16.msra.mxu1 %v6784_v30  ;;  %v6832_v28 = vld [vmem:[#allocation13 + $0x320] ss:$16 sps:$4 sm:$0xff]   ;;  %v6837_v18 = vld [vmem:[#allocation13 + $0x104] ss:$16 sps:$4 sm:$0xff]  }
 0x411   :  { %5738 = vmatprep.subr.bf16.mxu0 %v6789_v25  ;;  %5781 = vmatprep.subr.bf16.mxu1 %v6792_v57  ;;  %v6840_v2 = vld [vmem:[#allocation13 + $0x304] ss:$16 sps:$4 sm:$0xff]   ;;  %v6835_v56 = vld [vmem:[#allocation13 + $0x100] ss:$16 sps:$4 sm:$0xff]  }
 0x412   :  { %v6838_v50 = vld [vmem:[#allocation13 + $0x300] ss:$16 sps:$4 sm:$0xff]  }
 0x414   :  { %5739 = vmatpush1.bf16.msra.mxu0 %v6787_v54  ;;  %5782 = vmatpush1.bf16.msra.mxu1 %v6790_v60 }
 0x415   :  { %5740 = vmatprep.subr.bf16.mxu0 %v6795_v23  ;;  %5783 = vmatprep.subr.bf16.mxu1 %v6798_v34 }
 0x418   :  { %5741 = vmatpush2.bf16.msra.mxu0 %v6793_v24  ;;  %5784 = vmatpush2.bf16.msra.mxu1 %v6796_v1 }
 0x419   :  { %5742 = vmatprep.subr.bf16.mxu0 %v6801_v31  ;;  %5785 = vmatprep.subr.bf16.mxu1 %v6804_v46 }
 0x41c   :  { %5743 = vmatpush2.bf16.msra.mxu0 %v6799_v29  ;;  %5786 = vmatpush2.bf16.msra.mxu1 %v6802_v17 }
 0x41d   :  { %5744 = vmatprep.subr.bf16.mxu0 %v6807_v20  ;;  %5787 = vmatprep.subr.bf16.mxu1 %v6810_v22 }
 0x420   :  { %5745 = vmatpush2.bf16.msra.mxu0 %v6805_v0  ;;  %5788 = vmatpush2.bf16.msra.mxu1 %v6808_v59 }
 0x421   :  { %5746 = vmatprep.subr.bf16.mxu0 %v6813_v35  ;;  %5789 = vmatprep.subr.bf16.mxu1 %v6816_v42 }
 0x424   :  { %5747 = vmatpush2.bf16.msra.mxu0 %v6811_v49  ;;  %5790 = vmatpush2.bf16.msra.mxu1 %v6814_v15 }
 0x425   :  { %5748 = vmatprep.subr.bf16.mxu0 %v6819_v41  ;;  %5791 = vmatprep.subr.bf16.mxu1 %v6822_v36 }
 0x428   :  { %5749 = vmatpush2.bf16.msra.mxu0 %v6817_v53  ;;  %5792 = vmatpush2.bf16.msra.mxu1 %v6820_v43 }
 0x429   :  { %5750 = vmatprep.subr.bf16.mxu0 %v6825_v21  ;;  %5793 = vmatprep.subr.bf16.mxu1 %v6828_v19 }
 0x42c   :  { %5751 = vmatpush2.bf16.msra.mxu0 %v6823_v45  ;;  %5794 = vmatpush2.bf16.msra.mxu1 %v6826_v5 }
 0x42d   :  { %5752 = vmatprep.subr.bf16.mxu0 %v6831_v48  ;;  %5795 = vmatprep.subr.bf16.mxu1 %v6834_v12 }
 0x430   :  { %5753 = vmatpush2.bf16.msra.mxu0 %v6829_v27  ;;  %5796 = vmatpush2.bf16.msra.mxu1 %v6832_v28 }
 0x431   :  { %5754 = vmatprep.subr.bf16.mxu0 %v6837_v18  ;;  %5797 = vmatprep.subr.bf16.mxu1 %v6840_v2 }
 0x434   :  { %5755 = vmatpush2.bf16.msra.mxu0 %v6835_v56  ;;  %5798 = vmatpush2.bf16.msra.mxu1 %v6838_v50 }
 0x435   :  { %5810 = vmatprep.subr.bf16.mxu0 %v6843_v55  ;;  %5853 = vmatprep.subr.bf16.mxu1 %v6846_v32  ;;  %v6841_v55 = vld [vmem:[#allocation13 + $0xe8] ss:$16 sps:$4 sm:$0xff]  }
 0x436   :  { %v6844_v32 = vld [vmem:[#allocation13 + $0x2e8] ss:$16 sps:$4 sm:$0xff]  }
 0x487   :  { %v4751_v13 = vpop.xlane.xlu0 %4750 }
 0x48a   :  { %v4753_v40 = vpop.xlane.xlu1 %4752 }
 0x48b   :  { %v4822_v63 = vpop.xlane.xlu0 %4821 }
 0x48e   :  { %v4824_v26 = vpop.xlane.xlu1 %4823 }
 0x48f   :  { %v4803_v33 = vpop.xlane.xlu0 %4802 }
 0x490   :  { %v4809_v16 = vadd.f32 %v4803_v33, %v4751_v13  ;;  %v6856_v33 = vld [vmem:[#allocation13 + $0x2a8] ss:$16 sps:$4 sm:$0xff]  }
 0x492   :  { %v4808_v52 = vpop.xlane.xlu1 %4807  ;;  %v4813_v25 = vadd.f32 %v4812_v51, %v4809_v16  ;;  %v6861_v16 = vld [vmem:[#allocation13 + $0x8c] ss:$16 sps:$4 sm:$0xff]  }
 0x493   :  { %v4873_v14 = vpop.xlane.xlu0 %4872  ;;  %v4810_v30 = vadd.f32 %v4808_v52, %v4753_v40  ;;  %v6855_v40 = vld [vmem:[#allocation13 + $0xac] ss:$16 sps:$4 sm:$0xff]  }
 0x494   :  { %v4879_v44 = vadd.f32 %v4873_v14, %v4822_v63  ;;  %v6858_v63 = vld [vmem:[#allocation13 + $0x2ac] ss:$16 sps:$4 sm:$0xff]  }
 0x495   :  { %v4814_v34 = vadd.f32 %v4812_v51, %v4810_v30  ;;  %v6864_v52 = vld [vmem:[#allocation13 + $0x28c] ss:$16 sps:$4 sm:$0xff]   ;;  %v6859_v51 = vld [vmem:[#allocation13 + $0x88] ss:$16 sps:$4 sm:$0xff]  }
 0x496   :  { %v4883_v57 = vadd.f32 %v4882_v61, %v4879_v44  ;;  %v4878_v54 = vpop.xlane.xlu1 %4877  ;;  %v6867_v14 = vld [vmem:[#allocation13 + $0x6c] ss:$16 sps:$4 sm:$0xff]   ;;  %v6865_v30 = vld [vmem:[#allocation13 + $0x68] ss:$16 sps:$4 sm:$0xff]  }
 0x497   :  { %v4880_v60 = vadd.f32 %v4878_v54, %v4824_v26  ;;  %v6853_v26 = vld [vmem:[#allocation13 + $0xa8] ss:$16 sps:$4 sm:$0xff]   ;;  %v6870_v44 = vld [vmem:[#allocation13 + $0x26c] ss:$16 sps:$4 sm:$0xff]  }
 0x498   :  { %v4885_v23 = vmax.f32 %v4813_v25, %v4883_v57  ;;  %v6876_v54 = vld [vmem:[#allocation13 + $0x24c] ss:$16 sps:$4 sm:$0xff]  }
 0x499   :  { %v4884_v24 = vadd.f32 %v4882_v61, %v4880_v60  ;;  %v6862_v61 = vld [vmem:[#allocation13 + $0x288] ss:$16 sps:$4 sm:$0xff]  }
 0x49a   :  { %v4887_v1 = vsub.f32 %v4813_v25, %v4885_v23  ;;  %v4893_v31 = vsub.f32 %v4883_v57, %v4885_v23  ;;  %v6868_v25 = vld [vmem:[#allocation13 + $0x268] ss:$16 sps:$4 sm:$0xff]   ;;  %v6873_v57 = vld [vmem:[#allocation13 + $0x4c] ss:$16 sps:$4 sm:$0xff]  }
 0x49b   :  { %v4886_v46 = vmax.f32 %v4814_v34, %v4884_v24  ;;  %v6871_v60 = vld [vmem:[#allocation13 + $0x48] ss:$16 sps:$4 sm:$0xff]  }
 0x49c   :  { %v4889_v29 = vmul.f32 1.442695, %v4887_v1  ;;  %v4895_v17 = vmul.f32 1.442695, %v4893_v31  ;;  %v6874_v23 = vld [vmem:[#allocation13 + $0x248] ss:$16 sps:$4 sm:$0xff]  }
 0x49d   :  { %v4888_v20 = vsub.f32 %v4814_v34, %v4886_v46  ;;  %v4894_v22 = vsub.f32 %v4884_v24, %v4886_v46  ;;  %v6879_v34 = vld [vmem:[#allocation13 + $0x2c] ss:$16 sps:$4 sm:$0xff]   ;;  %v6877_v1 = vld [vmem:[#allocation13 + $0x28] ss:$16 sps:$4 sm:$0xff]  }
 0x49e   :  { %7029 = vpow2.f32 %v4889_v29  ;;  %v6882_v24 = vld [vmem:[#allocation13 + $0x22c] ss:$16 sps:$4 sm:$0xff]   ;;  %v6880_v31 = vld [vmem:[#allocation13 + $0x228] ss:$16 sps:$4 sm:$0xff]  }
 0x49f   :  { %7031 = vpow2.f32 %v4895_v17  ;;  %v4891_v0 = vmul.f32 1.442695, %v4888_v20  ;;  %v4897_v59 = vmul.f32 1.442695, %v4894_v22  ;;  %v6885_v46 = vld [vmem:[#allocation13 + $0xc] ss:$16 sps:$4 sm:$0xff]  }
 0x4a0   :  { %v6888_v29 = vld [vmem:[#allocation13 + $0x20c] ss:$16 sps:$4 sm:$0xff]   ;;  %v6883_v17 = vld [vmem:[#allocation13 + $0x8] ss:$16 sps:$4 sm:$0xff]  }
 0x4a1   :  { %7033 = vpow2.f32 %v4891_v0  ;;  %v6886_v20 = vld [vmem:[#allocation13 + $0x208] ss:$16 sps:$4 sm:$0xff]   ;;  %v6891_v22 = vld [vmem:[#allocation13 + $0x1ec] ss:$16 sps:$4 sm:$0xff]  }
 0x4a2   :  { %7035 = vpow2.f32 %v4897_v59  ;;  %v6894_v0 = vld [vmem:[#allocation13 + $0x3ec] ss:$16 sps:$4 sm:$0xff]   ;;  %v6889_v59 = vld [vmem:[#allocation13 + $0x1e8] ss:$16 sps:$4 sm:$0xff]  }
 0x4ab   :  { %v7030_v35 = vpop.eup %7029 }
 0x4ac   :  { %v7032_v42 = vpop.eup %7031 }
 0x4ad   :  { %v4899_v49 = vadd.f32 %v7032_v42, %v7030_v35 }
 0x4ae   :  { %v7034_v15 = vpop.eup %7033 }
 0x4af   :  { %v7036_v41 = vpop.eup %7035  ;;  %7037 = vrcp.f32 %v4899_v49  ;;  %v6900_v49 = vld [vmem:[#allocation13 + $0x3cc] ss:$16 sps:$4 sm:$0xff]  }
 0x4b0   :  { %v4900_v36 = vadd.f32 %v7036_v41, %v7034_v15 }
 0x4b2   :  { %7039 = vrcp.f32 %v4900_v36  ;;  %v6903_v36 = vld [vmem:[#allocation13 + $0x1ac] ss:$16 sps:$4 sm:$0xff]  }
 0x4bc   :  { %v7038_v53 = vpop.eup %7037 }
 0x4bd   :  { %v8811_v43 = vmul.f32 %v7038_v53, %v7030_v35  ;;  %v8813_v21 = vmul.f32 %v7038_v53, %v7032_v42  ;;  %v6892_v35 = vld [vmem:[#allocation13 + $0x3e8] ss:$16 sps:$4 sm:$0xff]   ;;  %v6897_v42 = vld [vmem:[#allocation13 + $0x1cc] ss:$16 sps:$4 sm:$0xff]  }
 0x4be   :  { %v6906_v53 = vld [vmem:[#allocation13 + $0x3ac] ss:$16 sps:$4 sm:$0xff]  }
 0x4bf   :  { %v7040_v19 = vpop.eup %7039  ;;  %v4945_v27 = vmul.f32 %v8813_v21, %v8755_v47  ;;  %v4947_v48 = vmul.f32 %v8813_v21, %v8792_v10  ;;  %v4944_v28 = vmul.f32 %v8813_v21, %v8752_v3  ;;  %v4946_v12 = vmul.f32 %v8813_v21, %v8775_v38 }
 0x4c0   :  { %v8815_v45 = vmul.f32 %v7040_v19, %v7034_v15  ;;  %v8817_v5 = vmul.f32 %v7040_v19, %v7036_v41  ;;  %v4909_v10 = vmul.f32 %v8811_v43, %v8771_v58  ;;  %v6847_v58 = vld [vmem:[#allocation13 + $0xc8] ss:$16 sps:$4 sm:$0xff]  }
 0x4c1   :  { %v6895_v15 = vld [vmem:[#allocation13 + $0x1c8] ss:$16 sps:$4 sm:$0xff]  }
 0x4c2   :  { %v4949_v18 = vmul.f32 %v8817_v5, %v8768_v37  ;;  %v4951_v2 = vmul.f32 %v8817_v5, %v8800_v39  ;;  %v4948_v56 = vmul.f32 %v8817_v5, %v8765_v62  ;;  %v4950_v47 = vmul.f32 %v8817_v5, %v8787_v4  ;;  %v6849_v62 = vld [vmem:[#allocation13 + $0xcc] ss:$16 sps:$4 sm:$0xff]   ;;  %v6898_v41 = vld [vmem:[#allocation13 + $0x3c8] ss:$16 sps:$4 sm:$0xff]  }
 0x4c3   :  { %v4910_v3 = vmul.f32 %v8815_v45, %v8783_v11  ;;  %v6852_v4 = vld [vmem:[#allocation13 + $0x2cc] ss:$16 sps:$4 sm:$0xff]   ;;  %v6850_v11 = vld [vmem:[#allocation13 + $0x2c8] ss:$16 sps:$4 sm:$0xff]  }
 0x4c4   :  { %v4953_v50 = vpack.c.bf16 %v4949_v18, %v4945_v27  ;;  %v4955_v38 = vpack.c.bf16 %v4951_v2, %v4947_v48  ;;  %v8839_v37 = vpack.c.bf16 %v4948_v56, %v4944_v28  ;;  %v8841_v13 = vpack.c.bf16 %v4950_v47, %v4946_v12  ;;  %v6901_v19 = vld [vmem:[#allocation13 + $0x1a8] ss:$16 sps:$4 sm:$0xff]   ;;  %v6909_v48 = vld [vmem:[#allocation13 + $0x18c] ss:$16 sps:$4 sm:$0xff]  }
 0x4c5   :  { %v8843_v39 = vpack.c.bf16 %v4910_v3, %v4909_v10  ;;  %v6904_v27 = vld [vmem:[#allocation13 + $0x3a8] ss:$16 sps:$4 sm:$0xff]   ;;  %v6912_v28 = vld [vmem:[#allocation13 + $0x38c] ss:$16 sps:$4 sm:$0xff]  }
 0x4c6   :  { %5756 = vmatprep.mubr.bf16.mxu0 %v4953_v50  ;;  %5799 = vmatprep.mubr.bf16.mxu1 %v4955_v38  ;;  %v6907_v12 = vld [vmem:[#allocation13 + $0x188] ss:$16 sps:$4 sm:$0xff]   ;;  %v6915_v2 = vld [vmem:[#allocation13 + $0x16c] ss:$16 sps:$4 sm:$0xff]  }
 0x4c7   :  { %5757 = vmatmul.mubr.bf16.vlgmr.msra.gmra.mxu0 %v8839_v37  ;;  %5800 = vmatmul.mubr.bf16.vlgmr.msra.gmra.mxu1 %v8841_v13  ;;  %v6910_v18 = vld [vmem:[#allocation13 + $0x388] ss:$16 sps:$4 sm:$0xff]   ;;  %v6918_v56 = vld [vmem:[#allocation13 + $0x36c] ss:$16 sps:$4 sm:$0xff]  }
 0x4c8   :  { %5811 = vmatpush1.bf16.msra.mxu0 %v6841_v55  ;;  %5854 = vmatpush1.bf16.msra.mxu1 %v6844_v32  ;;  %v6913_v47 = vld [vmem:[#allocation13 + $0x168] ss:$16 sps:$4 sm:$0xff]   ;;  %v6921_v3 = vld [vmem:[#allocation13 + $0x14c] ss:$16 sps:$4 sm:$0xff]  }
 0x4c9   :  { %5842 = vmatprep.mubr.bf16.mxu0 %v4953_v50  ;;  %5885 = vmatprep.mubr.bf16.mxu1 %v4955_v38  ;;  %v6916_v10 = vld [vmem:[#allocation13 + $0x368] ss:$16 sps:$4 sm:$0xff]   ;;  %v6924_v50 = vld [vmem:[#allocation13 + $0x34c] ss:$16 sps:$4 sm:$0xff]  }
 0x4ca   :  { %5812 = vmatprep.subr.bf16.mxu0 %v6849_v62  ;;  %5855 = vmatprep.subr.bf16.mxu1 %v6852_v4  ;;  %v6919_v38 = vld [vmem:[#allocation13 + $0x148] ss:$16 sps:$4 sm:$0xff]   ;;  %v6927_v32 = vld [vmem:[#allocation13 + $0x12c] ss:$16 sps:$4 sm:$0xff]  }
 0x4cb   :  { %v6922_v55 = vld [vmem:[#allocation13 + $0x348] ss:$16 sps:$4 sm:$0xff]   ;;  %v6930_v62 = vld [vmem:[#allocation13 + $0x32c] ss:$16 sps:$4 sm:$0xff]  }
 0x4cc   :  { %5813 = vmatpush1.bf16.msra.mxu0 %v6847_v58  ;;  %5856 = vmatpush1.bf16.msra.mxu1 %v6850_v11  ;;  %v6925_v4 = vld [vmem:[#allocation13 + $0x128] ss:$16 sps:$4 sm:$0xff]   ;;  %v6933_v11 = vld [vmem:[#allocation13 + $0x10c] ss:$16 sps:$4 sm:$0xff]  }
 0x4cd   :  { %5814 = vmatprep.subr.bf16.mxu0 %v6855_v40  ;;  %5857 = vmatprep.subr.bf16.mxu1 %v6858_v63  ;;  %v6928_v58 = vld [vmem:[#allocation13 + $0x328] ss:$16 sps:$4 sm:$0xff]   ;;  %v6936_v40 = vld [vmem:[#allocation13 + $0x30c] ss:$16 sps:$4 sm:$0xff]  }
 0x4ce   :  { %v6931_v63 = vld [vmem:[#allocation13 + $0x108] ss:$16 sps:$4 sm:$0xff]  }
 0x4d0   :  { %5815 = vmatpush1.bf16.msra.mxu0 %v6853_v26  ;;  %5858 = vmatpush1.bf16.msra.mxu1 %v6856_v33  ;;  %v6934_v26 = vld [vmem:[#allocation13 + $0x308] ss:$16 sps:$4 sm:$0xff]   ;;  %v6939_v33 = vld [vmem:[#allocation10 + $0xe4] ss:$16 sps:$4 sm:$0xff]  }
 0x4d1   :  { %5816 = vmatprep.subr.bf16.mxu0 %v6861_v16  ;;  %5859 = vmatprep.subr.bf16.mxu1 %v6864_v52  ;;  %v6942_v16 = vld [vmem:[#allocation10 + $0xec] ss:$16 sps:$4 sm:$0xff]   ;;  %v6937_v52 = vld [vmem:[#allocation10 + $0xe0] ss:$16 sps:$4 sm:$0xff]  }
 0x4d4   :  { %5817 = vmatpush1.bf16.msra.mxu0 %v6859_v51  ;;  %5860 = vmatpush1.bf16.msra.mxu1 %v6862_v61  ;;  %v6940_v51 = vld [vmem:[#allocation10 + $0xe8] ss:$16 sps:$4 sm:$0xff]   ;;  %v6945_v61 = vld [vmem:[#allocation10 + $0xc4] ss:$16 sps:$4 sm:$0xff]  }
 0x4d5   :  { %5818 = vmatprep.subr.bf16.mxu0 %v6867_v14  ;;  %5861 = vmatprep.subr.bf16.mxu1 %v6870_v44  ;;  %v6948_v14 = vld [vmem:[#allocation10 + $0xcc] ss:$16 sps:$4 sm:$0xff]   ;;  %v6943_v44 = vld [vmem:[#allocation10 + $0xc0] ss:$16 sps:$4 sm:$0xff]  }
 0x4d8   :  { %5819 = vmatpush1.bf16.msra.mxu0 %v6865_v30  ;;  %5862 = vmatpush1.bf16.msra.mxu1 %v6868_v25  ;;  %v6946_v30 = vld [vmem:[#allocation10 + $0xc8] ss:$16 sps:$4 sm:$0xff]   ;;  %v6951_v25 = vld [vmem:[#allocation10 + $0xa4] ss:$16 sps:$4 sm:$0xff]  }
 0x4d9   :  { %5820 = vmatprep.subr.bf16.mxu0 %v6873_v57  ;;  %5863 = vmatprep.subr.bf16.mxu1 %v6876_v54  ;;  %v6954_v57 = vld [vmem:[#allocation10 + $0xac] ss:$16 sps:$4 sm:$0xff]   ;;  %v7368_v54 = vmov 0  }
 0x4dc   :  { %5821 = vmatpush1.bf16.msra.mxu0 %v6871_v60  ;;  %5864 = vmatpush1.bf16.msra.mxu1 %v6874_v23  ;;  %v6949_v60 = vld [vmem:[#allocation10 + $0xa0] ss:$16 sps:$4 sm:$0xff]   ;;  %v6952_v23 = vld [vmem:[#allocation10 + $0xa8] ss:$16 sps:$4 sm:$0xff]  }
 0x4dd   :  { %5822 = vmatprep.subr.bf16.mxu0 %v6879_v34  ;;  %5865 = vmatprep.subr.bf16.mxu1 %v6882_v24  ;;  %v6960_v34 = vld [vmem:[#allocation10 + $0x8c] ss:$16 sps:$4 sm:$0xff]   ;;  %v6958_v24 = vld [vmem:[#allocation10 + $0x88] ss:$16 sps:$4 sm:$0xff]  }
 0x4e0   :  { %5823 = vmatpush1.bf16.msra.mxu0 %v6877_v1  ;;  %5866 = vmatpush1.bf16.msra.mxu1 %v6880_v31  ;;  %v6963_v1 = vld [vmem:[#allocation10 + $0x64] ss:$16 sps:$4 sm:$0xff]   ;;  %v6966_v31 = vld [vmem:[#allocation10 + $0x6c] ss:$16 sps:$4 sm:$0xff]  }
 0x4e1   :  { %5824 = vmatprep.subr.bf16.mxu0 %v6885_v46  ;;  %5867 = vmatprep.subr.bf16.mxu1 %v6888_v29  ;;  %v6961_v46 = vld [vmem:[#allocation10 + $0x60] ss:$16 sps:$4 sm:$0xff]   ;;  %v6964_v29 = vld [vmem:[#allocation10 + $0x68] ss:$16 sps:$4 sm:$0xff]  }
 0x4e4   :  { %5825 = vmatpush1.bf16.msra.mxu0 %v6883_v17  ;;  %5868 = vmatpush1.bf16.msra.mxu1 %v6886_v20  ;;  %v6969_v17 = vld [vmem:[#allocation10 + $0x44] ss:$16 sps:$4 sm:$0xff]   ;;  %v6972_v20 = vld [vmem:[#allocation10 + $0x4c] ss:$16 sps:$4 sm:$0xff]  }
 0x4e5   :  { %5826 = vmatprep.subr.bf16.mxu0 %v6891_v22  ;;  %5869 = vmatprep.subr.bf16.mxu1 %v6894_v0  ;;  %v6967_v22 = vld [vmem:[#allocation10 + $0x40] ss:$16 sps:$4 sm:$0xff]   ;;  %v6970_v0 = vld [vmem:[#allocation10 + $0x48] ss:$16 sps:$4 sm:$0xff]  }
 0x4e8   :  { %5827 = vmatpush2.bf16.msra.mxu0 %v6889_v59  ;;  %5870 = vmatpush2.bf16.msra.mxu1 %v6892_v35  ;;  %v6975_v59 = vld [vmem:[#allocation10 + $0x24] ss:$16 sps:$4 sm:$0xff]   ;;  %v6978_v35 = vld [vmem:[#allocation10 + $0x2c] ss:$16 sps:$4 sm:$0xff]  }
 0x4e9   :  { %5828 = vmatprep.subr.bf16.mxu0 %v6897_v42  ;;  %5871 = vmatprep.subr.bf16.mxu1 %v6900_v49  ;;  %v6973_v42 = vld [vmem:[#allocation10 + $0x20] ss:$16 sps:$4 sm:$0xff]   ;;  %v6976_v49 = vld [vmem:[#allocation10 + $0x28] ss:$16 sps:$4 sm:$0xff]  }
 0x4ec   :  { %5829 = vmatpush2.bf16.msra.mxu0 %v6895_v15  ;;  %5872 = vmatpush2.bf16.msra.mxu1 %v6898_v41  ;;  %v6981_v15 = vld [vmem:[#allocation10 + $0x4] ss:$16 sps:$4 sm:$0xff]   ;;  %v6984_v41 = vld [vmem:[#allocation10 + $0xc] ss:$16 sps:$4 sm:$0xff]  }
 0x4ed   :  { %5830 = vmatprep.subr.bf16.mxu0 %v6903_v36  ;;  %5873 = vmatprep.subr.bf16.mxu1 %v6906_v53  ;;  %v6979_v36 = vld [vmem:[#allocation10] ss:$16 sps:$4 sm:$0xff]   ;;  %v6982_v53 = vld [vmem:[#allocation10 + $0x8] ss:$16 sps:$4 sm:$0xff]  }
 0x4f0   :  { %5831 = vmatpush2.bf16.msra.mxu0 %v6901_v19  ;;  %5874 = vmatpush2.bf16.msra.mxu1 %v6904_v27 }
 0x4f1   :  { %5832 = vmatprep.subr.bf16.mxu0 %v6909_v48  ;;  %5875 = vmatprep.subr.bf16.mxu1 %v6912_v28 }
 0x4f4   :  { %5833 = vmatpush2.bf16.msra.mxu0 %v6907_v12  ;;  %5876 = vmatpush2.bf16.msra.mxu1 %v6910_v18 }
 0x4f5   :  { %5834 = vmatprep.subr.bf16.mxu0 %v6915_v2  ;;  %5877 = vmatprep.subr.bf16.mxu1 %v6918_v56 }
 0x4f8   :  { %5835 = vmatpush2.bf16.msra.mxu0 %v6913_v47  ;;  %5878 = vmatpush2.bf16.msra.mxu1 %v6916_v10 }
 0x4f9   :  { %5836 = vmatprep.subr.bf16.mxu0 %v6921_v3  ;;  %5879 = vmatprep.subr.bf16.mxu1 %v6924_v50 }
 0x4fc   :  { %5837 = vmatpush2.bf16.msra.mxu0 %v6919_v38  ;;  %5880 = vmatpush2.bf16.msra.mxu1 %v6922_v55  ;;  %v6142_v38 = vld [vmem:[#allocation12] sm:$0xf]  ;;  %v6180_v55 = vld [vmem:[#allocation15] sm:$0xf] }
 0x4fd   :  { %5838 = vmatprep.subr.bf16.mxu0 %v6927_v32  ;;  %5881 = vmatprep.subr.bf16.mxu1 %v6930_v62 }
 0x500   :  { %5839 = vmatpush2.bf16.msra.mxu0 %v6925_v4  ;;  %5882 = vmatpush2.bf16.msra.mxu1 %v6928_v58  ;;  %v6147_v4 = vrot.slane %v6142_v38, %v7482_v6  ;;  %v6155_v58 = vrot.slane %v6142_v38, %v7488_v8 }
 0x501   :  { %5840 = vmatprep.subr.bf16.mxu0 %v6933_v11  ;;  %5883 = vmatprep.subr.bf16.mxu1 %v6936_v40  ;;  %v6193_v11 = vrot.slane %v6180_v55, %v7488_v8  ;;  %v6151_v40 = vrot.slane %v6142_v38, %v7485_v7 }
 0x502   :  { %v6166_v8 = vmul.f32 %v6155_v58, %v8811_v43 }
 0x504   :  { %5841 = vmatpush2.bf16.msra.mxu0 %v6931_v63  ;;  %5884 = vmatpush2.bf16.msra.mxu1 %v6934_v26  ;;  %v6189_v63 = vrot.slane %v6180_v55, %v7485_v7  ;;  %v6165_v7 = vmul.f32 %v6151_v40, %v8811_v43 }
 0x505   :  { %6056 = vmatprep.subr.bf16.mxu0 %v6939_v33  ;;  %6099 = vmatprep.subr.bf16.mxu1 %v6942_v16  ;;  %v6159_v16 = vrot.slane %v6142_v38, %v7491_v9 }
 0x507   :  { %5843 = vmatmul.mubr.bf16.vlgmr.msra.gmra.mxu0 %v8839_v37  ;;  %5886 = vmatmul.mubr.bf16.vlgmr.msra.gmra.mxu1 %v8841_v13  ;;  %v6957_v37 = vld [vmem:[#allocation10 + $0x84] ss:$16 sps:$4 sm:$0xff]   ;;  %v6955_v13 = vld [vmem:[#allocation10 + $0x80] ss:$16 sps:$4 sm:$0xff]  }
 0x508   :  { %6057 = vmatpush1.bf16.msra.mxu0 %v6937_v52  ;;  %6100 = vmatpush1.bf16.msra.mxu1 %v6940_v51  ;;  %v6197_v52 = vrot.slane %v6180_v55, %v7491_v9 }
 0x509   :  { %6058 = vmatprep.subr.bf16.mxu0 %v6945_v61  ;;  %6101 = vmatprep.subr.bf16.mxu1 %v6948_v14  ;;  %v6164_v14 = vmul.f32 %v6147_v4, %v8811_v43 }
 0x50a   :  { %6088 = vmatprep.mubr.bf16.mxu0 %v7368_v54  ;;  %6131 = vmatprep.mubr.bf16.mxu1 %v7368_v54 }
 0x50c   :  { %6059 = vmatpush1.bf16.msra.mxu0 %v6943_v44  ;;  %6102 = vmatpush1.bf16.msra.mxu1 %v6946_v30 }
 0x50d   :  { %6060 = vmatprep.subr.bf16.mxu0 %v6951_v25  ;;  %6103 = vmatprep.subr.bf16.mxu1 %v6954_v57  ;;  %v6204_v25 = vmul.f32 %v6193_v11, %v8813_v21  ;;  %v6203_v57 = vmul.f32 %v6189_v63, %v8813_v21 }
 0x510   :  { %6061 = vmatpush1.bf16.msra.mxu0 %v6949_v60  ;;  %6104 = vmatpush1.bf16.msra.mxu1 %v6952_v23 }
 0x511   :  { %6062 = vmatprep.subr.bf16.mxu0 %v6957_v37  ;;  %6105 = vmatprep.subr.bf16.mxu1 %v6960_v34 }
 0x514   :  { %6063 = vmatpush1.bf16.msra.mxu0 %v6955_v13  ;;  %6106 = vmatpush1.bf16.msra.mxu1 %v6958_v24  ;;  %v6167_v13 = vmul.f32 %v6159_v16, %v8811_v43  ;;  %v6205_v24 = vmul.f32 %v6197_v52, %v8813_v21 }
 0x515   :  { %6064 = vmatprep.subr.bf16.mxu0 %v6963_v1  ;;  %6107 = vmatprep.subr.bf16.mxu1 %v6966_v31  ;;  %v6168_v1 = vmul.f32 %v6147_v4, %v8815_v45  ;;  %v6170_v31 = vmul.f32 %v6155_v58, %v8815_v45 }
 0x518   :  { %6065 = vmatpush1.bf16.msra.mxu0 %v6961_v46  ;;  %6108 = vmatpush1.bf16.msra.mxu1 %v6964_v29 }
 0x519   :  { %6066 = vmatprep.subr.bf16.mxu0 %v6969_v17  ;;  %6109 = vmatprep.subr.bf16.mxu1 %v6972_v20 }
 0x51c   :  { %6067 = vmatpush1.bf16.msra.mxu0 %v6967_v22  ;;  %6110 = vmatpush1.bf16.msra.mxu1 %v6970_v0 }
 0x51d   :  { %6068 = vmatprep.subr.bf16.mxu0 %v6975_v59  ;;  %6111 = vmatprep.subr.bf16.mxu1 %v6978_v35 }
 0x520   :  { %6069 = vmatpush1.bf16.msra.mxu0 %v6973_v42  ;;  %6112 = vmatpush1.bf16.msra.mxu1 %v6976_v49 }
 0x521   :  { %6070 = vmatprep.subr.bf16.mxu0 %v6981_v15  ;;  %6113 = vmatprep.subr.bf16.mxu1 %v6984_v41 }
 0x524   :  { %6071 = vmatpush1.bf16.msra.mxu0 %v6979_v36  ;;  %6114 = vmatpush1.bf16.msra.mxu1 %v6982_v53 }
 0x527   :  { %6089 = vmatmul.mubr.bf16.vlgmr.msra.gmra.mxu0 %v8843_v39  ;;  %6132 = vmatmul.mubr.bf16.vlgmr.msra.gmra.mxu1 %v8843_v39  ;;  %v6185_v39 = vrot.slane %v6180_v55, %v7482_v6  ;;  %v6207_v55 = vmul.f32 %v6189_v63, %v8817_v5 }
 0x529   :  { %v6202_v6 = vmul.f32 %v6185_v39, %v8813_v21 }
 0x587   :  { %v5758_v19 = vpop.f32.mrf.mxu0  ;;  %v5801_v27 = vpop.f32.mrf.mxu1 }
 0x588   :  { %v5802_v51 = vadd.f32 %v5801_v27, %v5758_v19  ;;  %v6169_v27 = vmul.f32 %v6151_v40, %v8815_v45 }
 0x589   :  { %v5760_v48 = vpop.f32.mrf.mxu0  ;;  %v5803_v28 = vpop.f32.mrf.mxu1 }
 0x58a   :  { %v5804_v54 = vadd.f32 %v5803_v28, %v5760_v48  ;;  %v6171_v28 = vmul.f32 %v6159_v16, %v8815_v45 }
 0x58b   :  { %v5762_v12 = vpop.f32.mrf.mxu0  ;;  %v5805_v18 = vpop.f32.mrf.mxu1 }
 0x58c   :  { %v5806_v22 = vadd.f32 %v5805_v18, %v5762_v12 }
 0x58d   :  { %v5764_v2 = vpop.f32.mrf.mxu0  ;;  %v5807_v56 = vpop.f32.mrf.mxu1 }
 0x58e   :  { %v5808_v0 = vadd.f32 %v5807_v56, %v5764_v2 }
 0x5c7   :  { %v5844_v47 = vpop.f32.mrf.mxu0  ;;  %v5887_v10 = vpop.f32.mrf.mxu1 }
 0x5c8   :  { %v5888_v61 = vadd.f32 %v5887_v10, %v5844_v47  ;;  %v6206_v10 = vmul.f32 %v6185_v39, %v8817_v5 }
 0x5c9   :  { %v5846_v3 = vpop.f32.mrf.mxu0  ;;  %v5889_v50 = vpop.f32.mrf.mxu1 }
 0x5ca   :  { %v5890_v60 = vadd.f32 %v5889_v50, %v5846_v3  ;;  %v6208_v50 = vmul.f32 %v6193_v11, %v8817_v5 }
 0x5cb   :  { %v5848_v32 = vpop.f32.mrf.mxu0  ;;  %v5891_v62 = vpop.f32.mrf.mxu1 }
 0x5cc   :  { %v5892_v59 = vadd.f32 %v5891_v62, %v5848_v32  ;;  %v6209_v32 = vmul.f32 %v6197_v52, %v8817_v5 }
 0x5cd   :  { %v5850_v26 = vpop.f32.mrf.mxu0  ;;  %v5893_v33 = vpop.f32.mrf.mxu1 }
 0x5ce   :  { %v5894_v35 = vadd.f32 %v5893_v33, %v5850_v26 }
 0x5e7   :  { %v6090_v44 = vpop.f32.mrf.mxu0  ;;  %v6133_v30 = vpop.f32.mrf.mxu1 }
 0x5e8   :  { %v6091_v23 = vadd.f32 %v6090_v44, %v5802_v51  ;;  %v6134_v9 = vadd.f32 %v6133_v30, %v5888_v61 }
 0x5e9   :  { %v6092_v37 = vpop.f32.mrf.mxu0  ;;  %v6135_v34 = vpop.f32.mrf.mxu1 }
 0x5ea   :  { %v6172_v46 = vadd.f32 %v6164_v14, %v6091_v23  ;;  %v6174_v29 = vadd.f32 %v6166_v8, %v6134_v9  ;;  %v6093_v17 = vadd.f32 %v6092_v37, %v5804_v54  ;;  %v6136_v20 = vadd.f32 %v6135_v34, %v5890_v60 }
 0x5eb   :  { %v6094_v42 = vpop.f32.mrf.mxu0  ;;  %v6137_v49 = vpop.f32.mrf.mxu1 }
 0x5ec   :  { %v6210_v15 = vadd.f32 %v6202_v6, %v6172_v46  ;;  %v6212_v41 = vadd.f32 %v6204_v25, %v6174_v29  ;;  %v6173_v36 = vadd.f32 %v6165_v7, %v6093_v17  ;;  %v6175_v43 = vadd.f32 %v6167_v13, %v6136_v20 }
 0x5ed   :  { %v6095_v53 = vadd.f32 %v6094_v42, %v5806_v22  ;;  %v6138_v21 = vadd.f32 %v6137_v49, %v5892_v59  ;;  %v6096_v19 = vpop.f32.mrf.mxu0  ;;  %v6139_v48 = vpop.f32.mrf.mxu1 }
 0x5ee   :  { %6218 = vst [vmem:[#allocation17] sm:$0xff] %v6210_v15  ;;  %6220 = vst [vmem:[#allocation17 + $0x10] sm:$0xff] %v6212_v41  ;;  %v6211_v12 = vadd.f32 %v6203_v57, %v6173_v36  ;;  %v6213_v18 = vadd.f32 %v6205_v24, %v6175_v43  ;;  %v6097_v2 = vadd.f32 %v6096_v19, %v5808_v0 }
 0x5ef   :  { %v6140_v56 = vadd.f32 %v6139_v48, %v5894_v35  ;;  %v6176_v47 = vadd.f32 %v6168_v1, %v6095_v53  ;;  %v6178_v3 = vadd.f32 %v6170_v31, %v6138_v21 }
 0x5f0   :  { %6219 = vst [vmem:[#allocation17 + $0x8] sm:$0xff] %v6211_v12  ;;  %6221 = vst [vmem:[#allocation17 + $0x18] sm:$0xff] %v6213_v18  ;;  %v6177_v38 = vadd.f32 %v6169_v27, %v6097_v2 }
 0x5f1   :  { %v6179_v45 = vadd.f32 %v6171_v28, %v6140_v56  ;;  %v6214_v62 = vadd.f32 %v6206_v10, %v6176_v47  ;;  %v6216_v4 = vadd.f32 %v6208_v50, %v6178_v3 }
 0x5f2   :  { %v6215_v58 = vadd.f32 %v6207_v55, %v6177_v38 }
 0x5f3   :  { %v6217_v40 = vadd.f32 %v6209_v32, %v6179_v45  ;;  %6222 = vst [vmem:[#allocation17 + $0x20] sm:$0xff] %v6214_v62  ;;  %6224 = vst [vmem:[#allocation17 + $0x30] sm:$0xff] %v6216_v4 }
 0x5f4   :  { %6223 = vst [vmem:[#allocation17 + $0x28] sm:$0xff] %v6215_v58 }
 0x5f5   :  { %6225 = vst [vmem:[#allocation17 + $0x38] sm:$0xff] %v6217_v40 }
 0x5f6   :  { %7332 = shalt.err (!%p7329_p2)
}
 0x5f7   :  { %6237 = dma.vmem_to_hbm [thread:$0]  %s6232_s23, 1024, %s8894_s13, [#allocation5], %s7354_s28, %s7354_s28, %s7355_s29  }
 0x5f8   :  { %7351 = dma.done.wait [#allocation5], 1024  }
 0x5f9   :  { %7352 = vsyncadd [#allocation5], 4294966272 }
 0x5fa   :  { %6241 = vsyncpa [#allocation4], 1 }
 0x5fb   :  { %6242 = vsyncpa [#allocation8], 1 }
 0x5fc   :  { %6243 = vsyncpa [#allocation11], 1 }
 0x5fd   :  { %6244 = vsyncpa [#allocation14], 1 }
 0x5fe   :  { %6245 = vsyncpa [#allocation5], 1 }
 0x5ff   :  { %6246 = vsyncpa [#allocation6], 1 }

</bundles_post_ra>
